<compile_context>
chip_gen: v6e
topology: v6e:2x2x1
jax: 0.10.0
libtpu: 0.0.40
codegen_flags: <defaults>
</compile_context>

<pallas_src>
import functools
import math

import jax
import jax.numpy as jnp
from jax.experimental import pallas as pl
from jax.experimental.pallas import tpu as pltpu

_VMEM_LIMIT = 32 * 1024 * 1024     # explicit scoped limit, safe on v5e/v6e/v7x
_TILE_BUDGET = 24 * 1024 * 1024    # double-buffered per-call footprint budget


def _rows(shape):
    r = 1
    for d in shape[:-1]:
        r *= d
    return max(r, 1)


def _divisor_tile(dim, cap, align):
    """Largest tile <= cap dividing `dim`, `align`-aligned; full dim if dim <= cap."""
    if dim <= cap:
        return dim
    t = (cap // align) * align
    while t >= align:
        if dim % t == 0:
            return t
        t -= align
    return dim


def _itemsize(dt):
    return jnp.dtype(dt).itemsize


def _mm_tiles(R, K, N, x_bytes, out_bytes, budget=_TILE_BUDGET):
    """Pick (tm, tk, tn): prefer full K (kills the reduction loop), then full N."""
    tm = _divisor_tile(R, 512, 8)

    def fp(tk, tn):
        return (2 * tm * tk * x_bytes        # x (double-buffered)
                + 2 * tk * tn * 2            # bf16 weight (double-buffered)
                + 2 * tn * 4                 # bias
                + 2 * tm * tn * out_bytes    # output
                + tm * tn * 4)               # f32 accumulator (worst case)

    tk_opts, tn_opts = [], []
    for c in (K, 4096, 2048, 1024, 512, 256, 128):
        t = _divisor_tile(K, c, 128)
        if t not in tk_opts:
            tk_opts.append(t)
    for c in (N, 4096, 2048, 1024, 512, 256, 128):
        t = _divisor_tile(N, c, 128)
        if t not in tn_opts:
            tn_opts.append(t)

    for tk in tk_opts:
        for tn in tn_opts:
            if fp(tk, tn) <= budget:
                # v7x megacore: keep >= 2 blocks on a parallel axis when cheap.
                if (R // tm < 2 and tn == N and N >= 256
                        and (N // 2) % 128 == 0 and fp(tk, N // 2) <= budget):
                    tn = N // 2
                return tm, tk, tn
    return tm, tk_opts[-1], tn_opts[-1]


# ----------------------------- Pallas kernels ------------------------------ #

def _to_bf16(x):
    return x if x.dtype == jnp.bfloat16 else x.astype(jnp.bfloat16)


def _apply_act(y, act):
    if act == "relu":
        return jnp.maximum(y, 0.0)
    if act == "gelu":
        return jax.nn.gelu(y)        # tanh approx == HF GPT-2 "gelu_new"
    return y


def _matmul_1k_kernel(*refs, act, has_bias):
    """Single K-step matmul: y = act(x @ w + b) in one shot (no accumulator)."""
    if has_bias:
        x_ref, w_ref, b_ref, o_ref = refs
    else:
        x_ref, w_ref, o_ref = refs
        b_ref = None
    y = jnp.dot(_to_bf16(x_ref[...]), w_ref[...],
                preferred_element_type=jnp.float32)
    if has_bias:
        y = y + b_ref[...]
    o_ref[...] = _apply_act(y, act).astype(o_ref.dtype)


def _matmul_kernel(*refs, act, has_bias):
    """Multi K-step matmul with f32 VMEM accumulator (fallback for huge K)."""
    if has_bias:
        x_ref, w_ref, b_ref, o_ref, acc_ref = refs
    else:
        x_ref, w_ref, o_ref, acc_ref = refs
        b_ref = None
    k = pl.program_id(2)

    @pl.when(k == 0)
    def _():
        acc_ref[...] = jnp.zeros_like(acc_ref)

    acc_ref[...] += jnp.dot(_to_bf16(x_ref[...]), w_ref[...],
                            preferred_element_type=jnp.float32)

    @pl.when(k == pl.num_programs(2) - 1)
    def _():
        y = acc_ref[...]
        if has_bias:
            y = y + b_ref[...]
        o_ref[...] = _apply_act(y, act).astype(o_ref.dtype)


def _linear_res_ln_1k_kernel(x_ref, w_ref, b_ref, r_ref, g_ref, be_ref,
                             h_ref, y_ref, *, eps):
    h = (jnp.dot(_to_bf16(x_ref[...]), w_ref[...],
                 preferred_element_type=jnp.float32)
         + b_ref[...] + r_ref[...])
    h_ref[...] = h
    mu = jnp.mean(h, axis=-1, keepdims=True)
    var = jnp.mean((h - mu) ** 2, axis=-1, keepdims=True)
    y_ref[...] = ((h - mu) * jax.lax.rsqrt(var + eps) * g_ref[...]
                  + be_ref[...]).astype(y_ref.dtype)


def _linear_res_ln_kernel(x_ref, w_ref, b_ref, r_ref, g_ref, be_ref,
                          h_ref, y_ref, acc_ref, *, eps):
    k = pl.program_id(1)

    @pl.when(k == 0)
    def _():
        acc_ref[...] = jnp.zeros_like(acc_ref)

    acc_ref[...] += jnp.dot(_to_bf16(x_ref[...]), w_ref[...],
                            preferred_element_type=jnp.float32)

    @pl.when(k == pl.num_programs(1) - 1)
    def _():
        h = acc_ref[...] + b_ref[...] + r_ref[...]
        h_ref[...] = h
        mu = jnp.mean(h, axis=-1, keepdims=True)
        var = jnp.mean((h - mu) ** 2, axis=-1, keepdims=True)
        y_ref[...] = ((h - mu) * jax.lax.rsqrt(var + eps) * g_ref[...]
                      + be_ref[...]).astype(y_ref.dtype)


def _mha_heads_store(o_ref, q, k, v, *, num_heads, scale, causal):
    """q:(Sq,D) f32, k/v:(Sk,D). Per-head attention, direct lane-slice stores."""
    Sq, D = q.shape
    Sk = k.shape[0]
    Dh = D // num_heads
    if causal:
        qi = jax.lax.broadcasted_iota(jnp.int32, (Sq, Sk), 0)
        ki = jax.lax.broadcasted_iota(jnp.int32, (Sq, Sk), 1)
        neg = jnp.where(ki <= qi, 0.0,
                        jnp.finfo(jnp.float32).min / 2).astype(jnp.float32)
    for h in range(num_heads):
        sl = slice(h * Dh, (h + 1) * Dh)
        qh = (q[:, sl].astype(jnp.float32) * scale).astype(jnp.bfloat16)
        kh = _to_bf16(k[:, sl])
        vh = _to_bf16(v[:, sl])
        s = jax.lax.dot_general(qh, kh, (((1,), (1,)), ((), ())),
                                preferred_element_type=jnp.float32)
        if causal:
            s = s + neg
        m = jnp.max(s, axis=-1, keepdims=True)
        p = jnp.exp(s - m)
        denom = jnp.sum(p, axis=-1, keepdims=True)
        p = p * pl.reciprocal(denom, approx=True)
        oh = jnp.dot(p.astype(jnp.bfloat16), vh,
                     preferred_element_type=jnp.float32)
        o_ref[0, :, sl] = oh.astype(o_ref.dtype)     # direct per-head slice store


def _fused_self_attn_kernel(x_ref, w_ref, b_ref, o_ref, *, num_heads, scale, causal):
    """QKV projection fused with multi-head self-attention (one batch element)."""
    x = _to_bf16(x_ref[0])                                        # (S, D)
    qkv = jnp.dot(x, w_ref[...], preferred_element_type=jnp.float32) + b_ref[...]
    D = x.shape[-1]
    _mha_heads_store(o_ref, qkv[:, :D], qkv[:, D:2 * D], qkv[:, 2 * D:],
                     num_heads=num_heads, scale=scale, causal=causal)


def _fused_cross_attn_kernel(x_ref, wq_ref, bq_ref, kv_ref, o_ref, *, num_heads, scale):
    """Q projection fused with cross attention against shared (Sk, 2D) kv."""
    x = _to_bf16(x_ref[0])                                        # (Sq, D)
    q = jnp.dot(x, wq_ref[...], preferred_element_type=jnp.float32) + bq_ref[...]
    kv = kv_ref[0]
    D = q.shape[-1]
    _mha_heads_store(o_ref, q, kv[:, :D], kv[:, D:],
                     num_heads=num_heads, scale=scale, causal=False)


def _add_ln_kernel(x_ref, p_ref, g_ref, b_ref, h_ref, y_ref, *, eps):
    h = x_ref[0].astype(jnp.float32) + p_ref[0]
    h_ref[0] = h
    mu = jnp.mean(h, axis=-1, keepdims=True)
    var = jnp.mean((h - mu) ** 2, axis=-1, keepdims=True)
    y_ref[0] = ((h - mu) * jax.lax.rsqrt(var + eps) * g_ref[0]
                + b_ref[0]).astype(y_ref.dtype)


def _revin_kernel(x_ref, xn_ref, mean_ref, std_ref, *, eps):
    x = x_ref[0].astype(jnp.float32)          # (L, M)
    mu = jnp.mean(x, axis=0, keepdims=True)   # (1, M)
    xc = x - mu
    var = jnp.mean(xc * xc, axis=0, keepdims=True)   # unbiased=False
    std = jnp.sqrt(var + eps)
    xn_ref[0] = xc / std
    mean_ref[0] = mu
    std_ref[0] = std


def _bmm_kernel(x_ref, w_ref, o_ref):
    o_ref[0] = jnp.dot(_to_bf16(x_ref[0]), w_ref[0],
                       preferred_element_type=jnp.float32).astype(o_ref.dtype)


# ------------------------------ kernel wrappers ----------------------------- #

def linear(x, w, b=None, act=None, out_dtype=jnp.float32):
    """y = act(x @ w + b). x: (..., K) f32/bf16, w: (K, N) bf16, b: (N,) f32."""
    orig = x.shape
    K = orig[-1]
    N = w.shape[1]
    R = _rows(orig)
    x2 = x.reshape(R, K)
    tm, tk, tn = _mm_tiles(R, K, N, _itemsize(x.dtype), _itemsize(out_dtype))
    has_bias = b is not None

    if tk == K:
        grid = (R // tm, N // tn)
        in_specs = [pl.BlockSpec((tm, K), lambda i, j: (i, 0)),
                    pl.BlockSpec((K, tn), lambda i, j: (0, j))]
        args = [x2, w]
        if has_bias:
            in_specs.append(pl.BlockSpec((1, tn), lambda i, j: (0, j)))
            args.append(b.reshape(1, N))
        out = pl.pallas_call(
            functools.partial(_matmul_1k_kernel, act=act, has_bias=has_bias),
            out_shape=jax.ShapeDtypeStruct((R, N), out_dtype),
            grid=grid,
            in_specs=in_specs,
            out_specs=pl.BlockSpec((tm, tn), lambda i, j: (i, j)),
            compiler_params=pltpu.CompilerParams(
                dimension_semantics=("parallel", "parallel"),
                vmem_limit_bytes=_VMEM_LIMIT),
        )(*args)
    else:
        grid = (R // tm, N // tn, K // tk)
        in_specs = [pl.BlockSpec((tm, tk), lambda i, j, k: (i, k)),
                    pl.BlockSpec((tk, tn), lambda i, j, k: (k, j))]
        args = [x2, w]
        if has_bias:
            in_specs.append(pl.BlockSpec((1, tn), lambda i, j, k: (0, j)))
            args.append(b.reshape(1, N))
        out = pl.pallas_call(
            functools.partial(_matmul_kernel, act=act, has_bias=has_bias),
            out_shape=jax.ShapeDtypeStruct((R, N), out_dtype),
            grid=grid,
            in_specs=in_specs,
            out_specs=pl.BlockSpec((tm, tn), lambda i, j, k: (i, j)),
            scratch_shapes=[pltpu.VMEM((tm, tn), jnp.float32)],
            compiler_params=pltpu.CompilerParams(
                dimension_semantics=("parallel", "parallel", "arbitrary"),
                vmem_limit_bytes=_VMEM_LIMIT),
        )(*args)
    return out.reshape(orig[:-1] + (N,))


def linear_res_ln(x, w, b, res, gamma, beta, eps=1e-5, y_dtype=jnp.float32):
    """h = res + x @ w + b ; y = LayerNorm(h). Returns (h f32, y y_dtype)."""
    orig = res.shape
    K = x.shape[-1]
    N = w.shape[1]
    R = _rows(orig)
    x2 = x.reshape(R, K)
    r2 = res.reshape(R, N)
    xb = _itemsize(x.dtype)
    yb = _itemsize(y_dtype)
    tm = _divisor_tile(R, 256, 8)

    fp_full = (2 * tm * K * xb + 2 * K * N * 2 + 6 * N * 4
               + 2 * tm * N * 4 + 2 * tm * N * 4 + 2 * tm * N * yb)
    out_shape = (jax.ShapeDtypeStruct((R, N), jnp.float32),
                 jax.ShapeDtypeStruct((R, N), y_dtype))
    scalars = (b.reshape(1, N), gamma.reshape(1, N), beta.reshape(1, N))

    if fp_full <= _TILE_BUDGET:
        h, y = pl.pallas_call(
            functools.partial(_linear_res_ln_1k_kernel, eps=eps),
            out_shape=out_shape,
            grid=(R // tm,),
            in_specs=[pl.BlockSpec((tm, K), lambda i: (i, 0)),
                      pl.BlockSpec((K, N), lambda i: (0, 0)),
                      pl.BlockSpec((1, N), lambda i: (0, 0)),
                      pl.BlockSpec((tm, N), lambda i: (i, 0)),
                      pl.BlockSpec((1, N), lambda i: (0, 0)),
                      pl.BlockSpec((1, N), lambda i: (0, 0))],
            out_specs=[pl.BlockSpec((tm, N), lambda i: (i, 0)),
                       pl.BlockSpec((tm, N), lambda i: (i, 0))],
            compiler_params=pltpu.CompilerParams(
                dimension_semantics=("parallel",),
                vmem_limit_bytes=_VMEM_LIMIT),
        )(x2, w, scalars[0], r2, scalars[1], scalars[2])
    else:
        tk = _divisor_tile(K, 1024, 128)
        h, y = pl.pallas_call(
            functools.partial(_linear_res_ln_kernel, eps=eps),
            out_shape=out_shape,
            grid=(R // tm, K // tk),
            in_specs=[pl.BlockSpec((tm, tk), lambda i, k: (i, k)),
                      pl.BlockSpec((tk, N), lambda i, k: (k, 0)),
                      pl.BlockSpec((1, N), lambda i, k: (0, 0)),
                      pl.BlockSpec((tm, N), lambda i, k: (i, 0)),
                      pl.BlockSpec((1, N), lambda i, k: (0, 0)),
                      pl.BlockSpec((1, N), lambda i, k: (0, 0))],
            out_specs=[pl.BlockSpec((tm, N), lambda i, k: (i, 0)),
                       pl.BlockSpec((tm, N), lambda i, k: (i, 0))],
            scratch_shapes=[pltpu.VMEM((tm, N), jnp.float32)],
            compiler_params=pltpu.CompilerParams(
                dimension_semantics=("parallel", "arbitrary"),
                vmem_limit_bytes=_VMEM_LIMIT),
        )(x2, w, scalars[0], r2, scalars[1], scalars[2])
    return h.reshape(orig), y.reshape(orig)


def self_attention_qkv(x, wqkv, bqkv, num_heads, causal, out_dtype=jnp.bfloat16):
    """Fused QKV projection + MHA. x: (B,S,D); wqkv: (D,3D) bf16 -> (B,S,D)."""
    B, S, D = x.shape
    scale = 1.0 / math.sqrt(D // num_heads)
    return pl.pallas_call(
        functools.partial(_fused_self_attn_kernel, num_heads=num_heads,
                          scale=scale, causal=causal),
        out_shape=jax.ShapeDtypeStruct((B, S, D), out_dtype),
        grid=(B,),
        in_specs=[pl.BlockSpec((1, S, D), lambda i: (i, 0, 0)),
                  pl.BlockSpec((D, 3 * D), lambda i: (0, 0)),      # stays resident
                  pl.BlockSpec((1, 3 * D), lambda i: (0, 0))],
        out_specs=pl.BlockSpec((1, S, D), lambda i: (i, 0, 0)),
        compiler_params=pltpu.CompilerParams(
            dimension_semantics=("parallel",),
            vmem_limit_bytes=_VMEM_LIMIT),
    )(x, wqkv, bqkv.reshape(1, 3 * D))


def cross_attention_q(x, wq, bq, kv, num_heads, out_dtype=jnp.bfloat16):
    """Fused Q projection + cross-MHA. x: (B,Sq,D); kv: (1,Sk,2D) shared."""
    B, Sq, D = x.shape
    Sk = kv.shape[1]
    scale = 1.0 / math.sqrt(D // num_heads)
    return pl.pallas_call(
        functools.partial(_fused_cross_attn_kernel, num_heads=num_heads, scale=scale),
        out_shape=jax.ShapeDtypeStruct((B, Sq, D), out_dtype),
        grid=(B,),
        in_specs=[pl.BlockSpec((1, Sq, D), lambda i: (i, 0, 0)),
                  pl.BlockSpec((D, D), lambda i: (0, 0)),
                  pl.BlockSpec((1, D), lambda i: (0, 0)),
                  pl.BlockSpec((1, Sk, 2 * D), lambda i: (0, 0, 0))],
        out_specs=pl.BlockSpec((1, Sq, D), lambda i: (i, 0, 0)),
        compiler_params=pltpu.CompilerParams(
            dimension_semantics=("parallel",),
            vmem_limit_bytes=_VMEM_LIMIT),
    )(x, wq, bq.reshape(1, D), kv)


def add_pos_ln(x, pos, gamma, beta, eps=1e-5, y_dtype=jnp.float32):
    """h = x + pos ; y = LayerNorm(h). Returns (h f32, y y_dtype)."""
    B, S, D = x.shape
    return pl.pallas_call(
        functools.partial(_add_ln_kernel, eps=eps),
        out_shape=(jax.ShapeDtypeStruct((B, S, D), jnp.float32),
                   jax.ShapeDtypeStruct((B, S, D), y_dtype)),
        grid=(B,),
        in_specs=[pl.BlockSpec((1, S, D), lambda i: (i, 0, 0)),
                  pl.BlockSpec((1, S, D), lambda i: (0, 0, 0)),
                  pl.BlockSpec((1, 1, D), lambda i: (0, 0, 0)),
                  pl.BlockSpec((1, 1, D), lambda i: (0, 0, 0))],
        out_specs=[pl.BlockSpec((1, S, D), lambda i: (i, 0, 0)),
                   pl.BlockSpec((1, S, D), lambda i: (i, 0, 0))],
        compiler_params=pltpu.CompilerParams(
            dimension_semantics=("parallel",),
            vmem_limit_bytes=_VMEM_LIMIT),
    )(x, pos, gamma.reshape(1, 1, D), beta.reshape(1, 1, D))


def revin_normalize(x, eps=1e-5):
    """x: (B, L, M) -> normalized x, mean (B,1,M), std (B,1,M)."""
    # TODO(synk): channels (M) on lanes gives masked partial stores; tensor is tiny.
    B, L, M = x.shape
    return pl.pallas_call(
        functools.partial(_revin_kernel, eps=eps),
        out_shape=(jax.ShapeDtypeStruct((B, L, M), jnp.float32),
                   jax.ShapeDtypeStruct((B, 1, M), jnp.float32),
                   jax.ShapeDtypeStruct((B, 1, M), jnp.float32)),
        grid=(B,),
        in_specs=[pl.BlockSpec((1, L, M), lambda i: (i, 0, 0))],
        out_specs=[pl.BlockSpec((1, L, M), lambda i: (i, 0, 0)),
                   pl.BlockSpec((1, 1, M), lambda i: (i, 0, 0)),
                   pl.BlockSpec((1, 1, M), lambda i: (i, 0, 0))],
        compiler_params=pltpu.CompilerParams(
            dimension_semantics=("parallel",),
            vmem_limit_bytes=_VMEM_LIMIT),
    )(x.astype(jnp.float32))


def batched_proj2(feat_time, feat_text, w_time, w_text):
    """Project both feature streams in a single batched pallas_call."""
    n = len(feat_time)
    B, S, D = feat_time[0].shape
    xs = jnp.stack([f.astype(jnp.float32) for f in (list(feat_time) + list(feat_text))])
    xs = xs.reshape(2 * n, B * S, D)
    ws = jnp.concatenate([w_time, w_text], axis=0)            # (2n, D, D) bf16
    out = pl.pallas_call(
        _bmm_kernel,
        out_shape=jax.ShapeDtypeStruct((2 * n, B * S, D), jnp.float32),
        grid=(2 * n,),
        in_specs=[pl.BlockSpec((1, B * S, D), lambda i: (i, 0, 0)),
                  pl.BlockSpec((1, D, D), lambda i: (i, 0, 0))],
        out_specs=pl.BlockSpec((1, B * S, D), lambda i: (i, 0, 0)),
        compiler_params=pltpu.CompilerParams(
            dimension_semantics=("parallel",),
            vmem_limit_bytes=_VMEM_LIMIT),
    )(xs, ws)
    out = out.reshape(2 * n, B, S, D)
    return (tuple(out[i] for i in range(n)),
            tuple(out[n + i] for i in range(n)))


# --------------------------- model building blocks -------------------------- #

def encoder_pca(x, p, num_heads):
    """x: (B, M, L) -> (x_time, x_text), each (B, M, D)."""
    e = p["enc"]
    h = linear(x, p["in_w"], p["in_b"])                         # (B, M, D) f32

    # TransformerEncoderLayer (post-norm, relu FFN), dropout = identity.
    ao = self_attention_qkv(h, e["attn"]["wqkv"], e["attn"]["bqkv"],
                            num_heads, causal=False)            # bf16
    _, h1 = linear_res_ln(ao, e["attn"]["wo"], e["attn"]["bo"], h,
                          e["ln1_g"], e["ln1_b"])               # f32 (it IS the residual)
    f = linear(h1, e["lin1_w"], e["lin1_b"], act="relu",
               out_dtype=jnp.bfloat16)
    _, h2 = linear_res_ln(f, e["lin2_w"], e["lin2_b"], h1,
                          e["ln2_g"], e["ln2_b"])               # f32
    x_time = h2

    # Cross attention against shared word-embedding prototypes.
    c = p["cross"]
    kv = linear(p["word_embedding"], c["wkv"], c["bkv"],
                out_dtype=jnp.bfloat16)                         # (n_tok, 2D)
    kv = kv[None]                                               # (1, n_tok, 2D)
    o = cross_attention_q(h2, c["wq"], c["bq"], kv, num_heads)  # bf16
    x_text = linear(o, c["wo"], c["bo"])                        # f32
    return x_time, x_text


def gpt2_model(inputs_embeds, p, num_heads):
    """Pre-norm GPT-2 stack; residual/LN fused into the projecting matmuls."""
    B, S, D = inputs_embeds.shape
    blocks = p["blocks"]
    n = len(blocks)
    pos = p["wpe"][:S].reshape(1, S, D)

    # h0 = emb + wpe ; a0 = ln1_0(h0)   (fused; a feeds only the fused QKV matmul)
    h, a = add_pos_ln(inputs_embeds, pos, blocks[0]["ln1_g"], blocks[0]["ln1_b"],
                      y_dtype=jnp.bfloat16)
    hidden_states = [h]

    for idx, blk in enumerate(blocks):
        attn_o = self_attention_qkv(a, blk["c_attn_w"], blk["c_attn_b"],
                                    num_heads, causal=True)     # bf16
        # h += attn_o @ c_proj ; m = ln2(h)
        h, m = linear_res_ln(attn_o, blk["c_proj_w"], blk["c_proj_b"], h,
                             blk["ln2_g"], blk["ln2_b"], y_dtype=jnp.bfloat16)
        f = linear(m, blk["c_fc_w"], blk["c_fc_b"], act="gelu",
                   out_dtype=jnp.bfloat16)
        last = (idx + 1 == n)
        if last:
            ng, nb = p["lnf_g"], p["lnf_b"]
        else:
            ng, nb = blocks[idx + 1]["ln1_g"], blocks[idx + 1]["ln1_b"]
        # h += f @ c_proj2 ; a = next block's ln1 (or final lnf) applied to h
        h, a = linear_res_ln(f, blk["c_proj2_w"], blk["c_proj2_b"], h, ng, nb,
                             y_dtype=jnp.float32 if last else jnp.bfloat16)
        if not last:
            hidden_states.append(h)

    hidden_states.append(a)                                     # lnf(h_final), f32
    return a, tuple(hidden_states)


def forecast(x, params, num_heads):
    """x: (B, L, M) time series."""
    B, L, M = x.shape

    xn, means, stdev = revin_normalize(x)                       # RevIN
    xc = jnp.transpose(xn, (0, 2, 1))                           # b l m -> b m l

    out_time1, out_text1 = encoder_pca(xc, params["in_layer"], num_heads)

    out_time, feat_time = gpt2_model(out_time1, params["gpt2"], num_heads)
    out_text, feat_text = gpt2_model(out_text1, params["gpt2_text"], num_heads)

    out_time = out_time + out_time1
    out_text = out_text + out_text1

    feat_time, feat_text = batched_proj2(feat_time, feat_text,
                                         params["time_proj"], params["text_proj"])

    # Batch the two identical out_layer projections into a single call.
    head_in = jnp.concatenate([out_time[:, -M:, :], out_text[:, -M:, :]], axis=0)
    head_out = linear(head_in, params["out_w"], params["out_b"])   # (2B, M, pred)

    ot = jnp.transpose(head_out[:B], (0, 2, 1))                 # b m l -> b l m
    ox = jnp.transpose(head_out[B:], (0, 2, 1))

    ox = ox * stdev + means
    ot = ot * stdev + means

    return {"outputs_text": ox, "outputs_time": ot,
            "intermidiate_time": feat_time, "intermidiate_text": feat_text}


# ------------------------------ parameter init ------------------------------ #

def _randn(key, shape, scale=0.02, dtype=jnp.float32):
    return (jax.random.normal(key, shape, jnp.float32) * scale).astype(dtype)


def _mha_self_init(key, D):
    ks = jax.random.split(key, 4)
    return dict(wqkv=_randn(ks[0], (D, 3 * D), dtype=jnp.bfloat16),
                bqkv=_randn(ks[1], (3 * D,)),
                wo=_randn(ks[2], (D, D), dtype=jnp.bfloat16),
                bo=_randn(ks[3], (D,)))


def _mha_cross_init(key, D):
    ks = jax.random.split(key, 6)
    return dict(wq=_randn(ks[0], (D, D), dtype=jnp.bfloat16),
                bq=_randn(ks[1], (D,)),
                wkv=_randn(ks[2], (D, 2 * D), dtype=jnp.bfloat16),
                bkv=_randn(ks[3], (2 * D,)),
                wo=_randn(ks[4], (D, D), dtype=jnp.bfloat16),
                bo=_randn(ks[5], (D,)))


def _gpt2_block_init(key, D):
    ks = jax.random.split(key, 8)
    ones = jnp.ones((D,), jnp.float32)
    zeros = jnp.zeros((D,), jnp.float32)
    return dict(ln1_g=ones, ln1_b=zeros, ln2_g=ones, ln2_b=zeros,
                c_attn_w=_randn(ks[0], (D, 3 * D), dtype=jnp.bfloat16),
                c_attn_b=_randn(ks[1], (3 * D,)),
                c_proj_w=_randn(ks[2], (D, D), dtype=jnp.bfloat16),
                c_proj_b=_randn(ks[3], (D,)),
                c_fc_w=_randn(ks[4], (D, 4 * D), dtype=jnp.bfloat16),
                c_fc_b=_randn(ks[5], (4 * D,)),
                c_proj2_w=_randn(ks[6], (4 * D, D), dtype=jnp.bfloat16),
                c_proj2_b=_randn(ks[7], (D,)))


def _gpt2_init(key, D, n_layers, max_pos):
    ks = jax.random.split(key, n_layers + 1)
    return dict(blocks=[_gpt2_block_init(ks[i], D) for i in range(n_layers)],
                wpe=_randn(ks[-1], (max_pos, D)),
                lnf_g=jnp.ones((D,), jnp.float32),
                lnf_b=jnp.zeros((D,), jnp.float32))


def init_params(key, *, seq_len, d_model, num_heads, pred_len, gpt_layers,
                n_word_tokens, enc_ffn):
    del num_heads  # static, passed separately at call time
    D = d_model
    keys = jax.random.split(key, 16)

    enc = dict(attn=_mha_self_init(keys[0], D),
               ln1_g=jnp.ones((D,), jnp.float32), ln1_b=jnp.zeros((D,), jnp.float32),
               ln2_g=jnp.ones((D,), jnp.float32), ln2_b=jnp.zeros((D,), jnp.float32),
               lin1_w=_randn(keys[1], (D, enc_ffn), dtype=jnp.bfloat16),
               lin1_b=_randn(keys[2], (enc_ffn,)),
               lin2_w=_randn(keys[3], (enc_ffn, D), dtype=jnp.bfloat16),
               lin2_b=_randn(keys[4], (D,)))
    in_layer = dict(in_w=_randn(keys[5], (seq_len, D), dtype=jnp.bfloat16),
                    in_b=_randn(keys[6], (D,)),
                    enc=enc,
                    cross=_mha_cross_init(keys[7], D),
                    # word_embedding stored already transposed: (n_tokens, d_model)
                    word_embedding=_randn(keys[8], (n_word_tokens, D)))

    gpt2 = _gpt2_init(keys[9], D, gpt_layers, max_pos=64)
    gpt2_text = _gpt2_init(keys[10], D, gpt_layers, max_pos=64)

    tp = jax.random.split(keys[11], gpt_layers + 1)
    xp = jax.random.split(keys[12], gpt_layers + 1)
    time_proj = jnp.stack([_randn(k, (D, D)) for k in tp]).astype(jnp.bfloat16)
    text_proj = jnp.stack([_randn(k, (D, D)) for k in xp]).astype(jnp.bfloat16)

    out_w = _randn(keys[13], (D, pred_len), dtype=jnp.bfloat16)
    out_b = _randn(keys[14], (pred_len,))

    return dict(in_layer=in_layer, gpt2=gpt2, gpt2_text=gpt2_text,
                time_proj=time_proj, text_proj=text_proj,
                out_w=out_w, out_b=out_b)


# ----------------------------------- main ----------------------------------- #

if __name__ == "__main__":
    # Small synthetic config (Encoder_PCA hardcodes nhead=12 for d_model=768;
    # here 4 heads for d_model=32, same structure).
    B, L, M = 2, 16, 4            # batch, seq_len, enc_in (channels)
    D = 32                        # d_model
    H = 4                         # num_heads
    PRED = 8                      # pred_len
    GPT_LAYERS = 2
    N_TOK = 8                     # word-embedding prototype tokens
    ENC_FFN = 64                  # TransformerEncoderLayer dim_feedforward (scaled down)

    key = jax.random.PRNGKey(0)
    k_params, k_x = jax.random.split(key)

    params = init_params(k_params, seq_len=L, d_model=D, num_heads=H,
                         pred_len=PRED, gpt_layers=GPT_LAYERS,
                         n_word_tokens=N_TOK, enc_ffn=ENC_FFN)

    x = jax.random.normal(k_x, (B, L, M), jnp.float32)

    fwd = jax.jit(forecast, static_argnums=(2,))
    out = fwd(x, params, H)
    jax.block_until_ready(out["outputs_time"])
    jax.block_until_ready(out["outputs_text"])

    assert out["outputs_time"].shape == (B, PRED, M)
    assert out["outputs_text"].shape == (B, PRED, M)
    assert len(out["intermidiate_time"]) == GPT_LAYERS + 1
    assert len(out["intermidiate_text"]) == GPT_LAYERS + 1
    for t in out["intermidiate_time"] + out["intermidiate_text"]:
        assert t.shape == (B, M, D)
    assert bool(jnp.all(jnp.isfinite(out["outputs_time"])))
    assert bool(jnp.all(jnp.isfinite(out["outputs_text"])))

    print("KERNEL_OK")
</pallas_src>

<mosaic_0001>
module attributes {stable_mosaic.version = 11 : i64} {
  func.func @_matmul_1k_kernel(%arg0: i32, %arg1: i32, %arg2: memref<8x32xf32, #tpu.memory_space<vmem>>, %arg3: memref<32x64xbf16, #tpu.memory_space<vmem>>, %arg4: memref<1x64xf32, #tpu.memory_space<vmem>>, %arg5: memref<8x64xbf16, #tpu.memory_space<vmem>>) attributes {dimension_semantics = [#tpu.dimension_semantics<parallel>, #tpu.dimension_semantics<parallel>], iteration_bounds = array<i64: 1, 1>, scalar_prefetch = 0 : i64, scratch_operands = 0 : i64, tpu.core_type = #tpu.core_type<tc>, window_params = [{transform_indices = @transform_0, window_bounds = array<i64: 8, 32>}, {transform_indices = @transform_1, window_bounds = array<i64: 32, 64>}, {transform_indices = @transform_2, window_bounds = array<i64: 1, 64>}, {transform_indices = @transform_3, window_bounds = array<i64: 8, 64>}]} {
    %c0 = arith.constant 0 : index
    %c0_0 = arith.constant 0 : index
    %0 = vector.load %arg2[%c0, %c0_0] : memref<8x32xf32, #tpu.memory_space<vmem>>, vector<8x32xf32>
    %1 = arith.truncf %0 : vector<8x32xf32> to vector<8x32xbf16>
    %c0_1 = arith.constant 0 : index
    %c0_2 = arith.constant 0 : index
    %2 = vector.load %arg3[%c0_1, %c0_2] : memref<32x64xbf16, #tpu.memory_space<vmem>>, vector<32x64xbf16>
    %cst = arith.constant dense<0.000000e+00> : vector<8x64xf32>
    %3 = tpu.matmul %1, %2, %cst {dimension_numbers = #tpu.dot_dimension_numbers<[1], [0], [0], [1], [0, 0, 1, 1], [], []>} : vector<8x32xbf16>, vector<32x64xbf16>, vector<8x64xf32> -> vector<8x64xf32>
    %c0_3 = arith.constant 0 : index
    %c0_4 = arith.constant 0 : index
    %4 = vector.load %arg4[%c0_3, %c0_4] : memref<1x64xf32, #tpu.memory_space<vmem>>, vector<1x64xf32>
    %5 = vector.broadcast %4 : vector<1x64xf32> to vector<8x64xf32>
    %6 = arith.addf %3, %5 : vector<8x64xf32>
    %7 = arith.truncf %6 : vector<8x64xf32> to vector<8x64xbf16>
    %c0_5 = arith.constant 0 : index
    %c0_6 = arith.constant 0 : index
    %8 = vector.load %arg5[%c0_5, %c0_6] : memref<8x64xbf16, #tpu.memory_space<vmem>>, vector<8x64xbf16>
    tpu.vector_store %arg5[%c0_5, %c0_6], %7 {strides = array<i32>} : memref<8x64xbf16, #tpu.memory_space<vmem>>, vector<8x64xbf16>,
    return
  }
  func.func @transform_0(%arg0: i32, %arg1: i32) -> (i32, i32) {
    %c0_i32 = arith.constant 0 : i32
    %c0_i32_0 = arith.constant 0 : i32
    return %arg0, %c0_i32 : i32, i32
  }
  func.func @transform_1(%arg0: i32, %arg1: i32) -> (i32, i32) {
    %c0_i32 = arith.constant 0 : i32
    %c0_i32_0 = arith.constant 0 : i32
    return %c0_i32, %arg1 : i32, i32
  }
  func.func @transform_2(%arg0: i32, %arg1: i32) -> (i32, i32) {
    %c0_i32 = arith.constant 0 : i32
    %c0_i32_0 = arith.constant 0 : i32
    return %c0_i32, %arg1 : i32, i32
  }
  func.func @transform_3(%arg0: i32, %arg1: i32) -> (i32, i32) {
    %c0_i32 = arith.constant 0 : i32
    return %arg0, %arg1 : i32, i32
  }
}

module attributes {stable_mosaic.version = 11 : i64} {
  func.func @_revin_kernel(%arg0: i32, %arg1: memref<1x16x4xf32, #tpu.memory_space<vmem>>, %arg2: memref<1x16x4xf32, #tpu.memory_space<vmem>>, %arg3: memref<1x1x4xf32, #tpu.memory_space<vmem>>, %arg4: memref<1x1x4xf32, #tpu.memory_space<vmem>>) attributes {dimension_semantics = [#tpu.dimension_semantics<parallel>], iteration_bounds = array<i64: 2>, scalar_prefetch = 0 : i64, scratch_operands = 0 : i64, tpu.core_type = #tpu.core_type<tc>, window_params = [{transform_indices = @transform_0, window_bounds = array<i64: 1, 16, 4>}, {transform_indices = @transform_1, window_bounds = array<i64: 1, 16, 4>}, {transform_indices = @transform_2, window_bounds = array<i64: 1, 1, 4>}, {transform_indices = @transform_3, window_bounds = array<i64: 1, 1, 4>}]} {
    %c0 = arith.constant 0 : index
    %c0_0 = arith.constant 0 : index
    %c0_1 = arith.constant 0 : index
    %0 = vector.load %arg1[%c0, %c0_0, %c0_1] : memref<1x16x4xf32, #tpu.memory_space<vmem>>, vector<1x16x4xf32>
    %1 = vector.shape_cast %0 : vector<1x16x4xf32> to vector<16x4xf32>
    %cst = arith.constant dense<0.000000e+00> : vector<4xf32>
    %2 = vector.multi_reduction <add>, %1, %cst [0] : vector<16x4xf32> to vector<4xf32>
    %3 = vector.shape_cast %2 : vector<4xf32> to vector<1x4xf32>
    %cst_2 = arith.constant 1.600000e+01 : f32
    %4 = vector.broadcast %cst_2 : f32 to vector<1x4xf32>
    %5 = arith.divf %3, %4 : vector<1x4xf32>
    %6 = vector.broadcast %5 : vector<1x4xf32> to vector<16x4xf32>
    %7 = arith.subf %1, %6 : vector<16x4xf32>
    %8 = arith.mulf %7, %7 : vector<16x4xf32>
    %cst_3 = arith.constant dense<0.000000e+00> : vector<4xf32>
    %9 = vector.multi_reduction <add>, %8, %cst_3 [0] : vector<16x4xf32> to vector<4xf32>
    %10 = vector.shape_cast %9 : vector<4xf32> to vector<1x4xf32>
    %cst_4 = arith.constant 1.600000e+01 : f32
    %11 = vector.broadcast %cst_4 : f32 to vector<1x4xf32>
    %12 = arith.divf %10, %11 : vector<1x4xf32>
    %cst_5 = arith.constant 9.99999974E-6 : f32
    %13 = vector.broadcast %cst_5 : f32 to vector<1x4xf32>
    %14 = arith.addf %12, %13 : vector<1x4xf32>
    %15 = math.sqrt %14 : vector<1x4xf32>
    %16 = vector.broadcast %15 : vector<1x4xf32> to vector<16x4xf32>
    %17 = arith.divf %7, %16 : vector<16x4xf32>
    %c0_6 = arith.constant 0 : index
    %c0_7 = arith.constant 0 : index
    %c0_8 = arith.constant 0 : index
    %18 = vector.load %arg2[%c0_6, %c0_7, %c0_8] : memref<1x16x4xf32, #tpu.memory_space<vmem>>, vector<1x16x4xf32>
    %19 = vector.shape_cast %18 : vector<1x16x4xf32> to vector<16x4xf32>
    %20 = vector.shape_cast %17 : vector<16x4xf32> to vector<1x16x4xf32>
    tpu.vector_store %arg2[%c0_6, %c0_7, %c0_8], %20 {strides = array<i32>} : memref<1x16x4xf32, #tpu.memory_space<vmem>>, vector<1x16x4xf32>,
    %c0_9 = arith.constant 0 : index
    %c0_10 = arith.constant 0 : index
    %c0_11 = arith.constant 0 : index
    %21 = vector.load %arg3[%c0_9, %c0_10, %c0_11] : memref<1x1x4xf32, #tpu.memory_space<vmem>>, vector<1x1x4xf32>
    %22 = vector.shape_cast %21 : vector<1x1x4xf32> to vector<1x4xf32>
    %23 = vector.shape_cast %5 : vector<1x4xf32> to vector<1x1x4xf32>
    tpu.vector_store %arg3[%c0_9, %c0_10, %c0_11], %23 {strides = array<i32>} : memref<1x1x4xf32, #tpu.memory_space<vmem>>, vector<1x1x4xf32>,
    %c0_12 = arith.constant 0 : index
    %c0_13 = arith.constant 0 : index
    %c0_14 = arith.constant 0 : index
    %24 = vector.load %arg4[%c0_12, %c0_13, %c0_14] : memref<1x1x4xf32, #tpu.memory_space<vmem>>, vector<1x1x4xf32>
    %25 = vector.shape_cast %24 : vector<1x1x4xf32> to vector<1x4xf32>
    %26 = vector.shape_cast %15 : vector<1x4xf32> to vector<1x1x4xf32>
    tpu.vector_store %arg4[%c0_12, %c0_13, %c0_14], %26 {strides = array<i32>} : memref<1x1x4xf32, #tpu.memory_space<vmem>>, vector<1x1x4xf32>,
    return
  }
  func.func @transform_0(%arg0: i32) -> (i32, i32, i32) {
    %c0_i32 = arith.constant 0 : i32
    %c0_i32_0 = arith.constant 0 : i32
    %c0_i32_1 = arith.constant 0 : i32
    return %arg0, %c0_i32, %c0_i32_0 : i32, i32, i32
  }
  func.func @transform_1(%arg0: i32) -> (i32, i32, i32) {
    %c0_i32 = arith.constant 0 : i32
    %c0_i32_0 = arith.constant 0 : i32
    %c0_i32_1 = arith.constant 0 : i32
    return %arg0, %c0_i32, %c0_i32_0 : i32, i32, i32
  }
  func.func @transform_2(%arg0: i32) -> (i32, i32, i32) {
    %c0_i32 = arith.constant 0 : i32
    %c0_i32_0 = arith.constant 0 : i32
    %c0_i32_1 = arith.constant 0 : i32
    return %arg0, %c0_i32, %c0_i32_0 : i32, i32, i32
  }
  func.func @transform_3(%arg0: i32) -> (i32, i32, i32) {
    %c0_i32 = arith.constant 0 : i32
    %c0_i32_0 = arith.constant 0 : i32
    %c0_i32_1 = arith.constant 0 : i32
    return %arg0, %c0_i32, %c0_i32_0 : i32, i32, i32
  }
}

module attributes {stable_mosaic.version = 11 : i64} {
  func.func @_matmul_1k_kernel(%arg0: i32, %arg1: i32, %arg2: memref<8x16xf32, #tpu.memory_space<vmem>>, %arg3: memref<16x32xbf16, #tpu.memory_space<vmem>>, %arg4: memref<1x32xf32, #tpu.memory_space<vmem>>, %arg5: memref<8x32xf32, #tpu.memory_space<vmem>>) attributes {dimension_semantics = [#tpu.dimension_semantics<parallel>, #tpu.dimension_semantics<parallel>], iteration_bounds = array<i64: 1, 1>, scalar_prefetch = 0 : i64, scratch_operands = 0 : i64, tpu.core_type = #tpu.core_type<tc>, window_params = [{transform_indices = @transform_0, window_bounds = array<i64: 8, 16>}, {transform_indices = @transform_1, window_bounds = array<i64: 16, 32>}, {transform_indices = @transform_2, window_bounds = array<i64: 1, 32>}, {transform_indices = @transform_3, window_bounds = array<i64: 8, 32>}]} {
    %c0 = arith.constant 0 : index
    %c0_0 = arith.constant 0 : index
    %0 = vector.load %arg2[%c0, %c0_0] : memref<8x16xf32, #tpu.memory_space<vmem>>, vector<8x16xf32>
    %1 = arith.truncf %0 : vector<8x16xf32> to vector<8x16xbf16>
    %c0_1 = arith.constant 0 : index
    %c0_2 = arith.constant 0 : index
    %2 = vector.load %arg3[%c0_1, %c0_2] : memref<16x32xbf16, #tpu.memory_space<vmem>>, vector<16x32xbf16>
    %cst = arith.constant dense<0.000000e+00> : vector<8x32xf32>
    %3 = tpu.matmul %1, %2, %cst {dimension_numbers = #tpu.dot_dimension_numbers<[1], [0], [0], [1], [0, 0, 1, 1], [], []>} : vector<8x16xbf16>, vector<16x32xbf16>, vector<8x32xf32> -> vector<8x32xf32>
    %c0_3 = arith.constant 0 : index
    %c0_4 = arith.constant 0 : index
    %4 = vector.load %arg4[%c0_3, %c0_4] : memref<1x32xf32, #tpu.memory_space<vmem>>, vector<1x32xf32>
    %5 = vector.broadcast %4 : vector<1x32xf32> to vector<8x32xf32>
    %6 = arith.addf %3, %5 : vector<8x32xf32>
    %c0_5 = arith.constant 0 : index
    %c0_6 = arith.constant 0 : index
    %7 = vector.load %arg5[%c0_5, %c0_6] : memref<8x32xf32, #tpu.memory_space<vmem>>, vector<8x32xf32>
    tpu.vector_store %arg5[%c0_5, %c0_6], %6 {strides = array<i32>} : memref<8x32xf32, #tpu.memory_space<vmem>>, vector<8x32xf32>,
    return
  }
  func.func @transform_0(%arg0: i32, %arg1: i32) -> (i32, i32) {
    %c0_i32 = arith.constant 0 : i32
    %c0_i32_0 = arith.constant 0 : i32
    return %arg0, %c0_i32 : i32, i32
  }
  func.func @transform_1(%arg0: i32, %arg1: i32) -> (i32, i32) {
    %c0_i32 = arith.constant 0 : i32
    %c0_i32_0 = arith.constant 0 : i32
    return %c0_i32, %arg1 : i32, i32
  }
  func.func @transform_2(%arg0: i32, %arg1: i32) -> (i32, i32) {
    %c0_i32 = arith.constant 0 : i32
    %c0_i32_0 = arith.constant 0 : i32
    return %c0_i32, %arg1 : i32, i32
  }
  func.func @transform_3(%arg0: i32, %arg1: i32) -> (i32, i32) {
    %c0_i32 = arith.constant 0 : i32
    return %arg0, %arg1 : i32, i32
  }
}

module attributes {stable_mosaic.version = 11 : i64} {
  func.func @_fused_self_attn_kernel(%arg0: i32, %arg1: memref<1x4x32xf32, #tpu.memory_space<vmem>>, %arg2: memref<32x96xbf16, #tpu.memory_space<vmem>>, %arg3: memref<1x96xf32, #tpu.memory_space<vmem>>, %arg4: memref<1x4x32xbf16, #tpu.memory_space<vmem>>) attributes {dimension_semantics = [#tpu.dimension_semantics<parallel>], iteration_bounds = array<i64: 2>, scalar_prefetch = 0 : i64, scratch_operands = 0 : i64, tpu.core_type = #tpu.core_type<tc>, window_params = [{transform_indices = @transform_0, window_bounds = array<i64: 1, 4, 32>}, {pipeline_mode = #tpu.pipeline_mode<synchronous>, transform_indices = @transform_1, window_bounds = array<i64: 32, 96>}, {pipeline_mode = #tpu.pipeline_mode<synchronous>, transform_indices = @transform_2, window_bounds = array<i64: 1, 96>}, {transform_indices = @transform_3, window_bounds = array<i64: 1, 4, 32>}]} {
    %c0 = arith.constant 0 : index
    %c0_0 = arith.constant 0 : index
    %c0_1 = arith.constant 0 : index
    %0 = vector.load %arg1[%c0, %c0_0, %c0_1] : memref<1x4x32xf32, #tpu.memory_space<vmem>>, vector<1x4x32xf32>
    %1 = vector.shape_cast %0 : vector<1x4x32xf32> to vector<4x32xf32>
    %2 = arith.truncf %1 : vector<4x32xf32> to vector<4x32xbf16>
    %c0_2 = arith.constant 0 : index
    %c0_3 = arith.constant 0 : index
    %3 = vector.load %arg2[%c0_2, %c0_3] : memref<32x96xbf16, #tpu.memory_space<vmem>>, vector<32x96xbf16>
    %cst = arith.constant dense<0.000000e+00> : vector<4x96xf32>
    %4 = tpu.matmul %2, %3, %cst {dimension_numbers = #tpu.dot_dimension_numbers<[1], [0], [0], [1], [0, 0, 1, 1], [], []>} : vector<4x32xbf16>, vector<32x96xbf16>, vector<4x96xf32> -> vector<4x96xf32>
    %c0_4 = arith.constant 0 : index
    %c0_5 = arith.constant 0 : index
    %5 = vector.load %arg3[%c0_4, %c0_5] : memref<1x96xf32, #tpu.memory_space<vmem>>, vector<1x96xf32>
    %6 = vector.broadcast %5 : vector<1x96xf32> to vector<4x96xf32>
    %7 = arith.addf %4, %6 : vector<4x96xf32>
    %8 = vector.extract_strided_slice %7 {offsets = [0, 0], sizes = [4, 32], strides = [1, 1]} : vector<4x96xf32> to vector<4x32xf32>
    %9 = vector.extract_strided_slice %7 {offsets = [0, 32], sizes = [4, 32], strides = [1, 1]} : vector<4x96xf32> to vector<4x32xf32>
    %10 = vector.extract_strided_slice %7 {offsets = [0, 64], sizes = [4, 32], strides = [1, 1]} : vector<4x96xf32> to vector<4x32xf32>
    %11 = vector.extract_strided_slice %8 {offsets = [0, 0], sizes = [4, 8], strides = [1, 1]} : vector<4x32xf32> to vector<4x8xf32>
    %cst_6 = arith.constant 0.353553385 : f32
    %12 = vector.broadcast %cst_6 : f32 to vector<4x8xf32>
    %13 = arith.mulf %11, %12 : vector<4x8xf32>
    %14 = arith.truncf %13 : vector<4x8xf32> to vector<4x8xbf16>
    %15 = vector.extract_strided_slice %9 {offsets = [0, 0], sizes = [4, 8], strides = [1, 1]} : vector<4x32xf32> to vector<4x8xf32>
    %16 = arith.truncf %15 : vector<4x8xf32> to vector<4x8xbf16>
    %17 = vector.extract_strided_slice %10 {offsets = [0, 0], sizes = [4, 8], strides = [1, 1]} : vector<4x32xf32> to vector<4x8xf32>
    %18 = arith.truncf %17 : vector<4x8xf32> to vector<4x8xbf16>
    %cst_7 = arith.constant dense<0.000000e+00> : vector<4x4xf32>
    %19 = tpu.matmul %14, %16, %cst_7 {dimension_numbers = #tpu.dot_dimension_numbers<[1], [1], [0], [0], [0, 0, 1, 0], [], []>} : vector<4x8xbf16>, vector<4x8xbf16>, vector<4x4xf32> -> vector<4x4xf32>
    %cst_8 = arith.constant dense<0xFF800000> : vector<4xf32>
    %20 = vector.multi_reduction <maximumf>, %19, %cst_8 [1] : vector<4x4xf32> to vector<4xf32>
    %21 = vector.shape_cast %20 : vector<4xf32> to vector<4x1xf32>
    %22 = vector.broadcast %21 : vector<4x1xf32> to vector<4x4xf32>
    %23 = arith.subf %19, %22 : vector<4x4xf32>
    %24 = math.exp %23 : vector<4x4xf32>
    %cst_9 = arith.constant dense<0.000000e+00> : vector<4xf32>
    %25 = vector.multi_reduction <add>, %24, %cst_9 [1] : vector<4x4xf32> to vector<4xf32>
    %26 = vector.shape_cast %25 : vector<4xf32> to vector<4x1xf32>
    %27 = tpu.reciprocal %26 {approx = true} : vector<4x1xf32> -> vector<4x1xf32>
    %28 = vector.broadcast %27 : vector<4x1xf32> to vector<4x4xf32>
    %29 = arith.mulf %24, %28 : vector<4x4xf32>
    %30 = arith.truncf %29 : vector<4x4xf32> to vector<4x4xbf16>
    %cst_10 = arith.constant dense<0.000000e+00> : vector<4x8xf32>
    %31 = tpu.matmul %30, %18, %cst_10 {dimension_numbers = #tpu.dot_dimension_numbers<[1], [0], [0], [1], [0, 0, 1, 1], [], []>} : vector<4x4xbf16>, vector<4x8xbf16>, vector<4x8xf32> -> vector<4x8xf32>
    %32 = arith.truncf %31 : vector<4x8xf32> to vector<4x8xbf16>
    %c0_11 = arith.constant 0 : index
    %c0_12 = arith.constant 0 : index
    %c0_13 = arith.constant 0 : index
    %33 = vector.load %arg4[%c0_11, %c0_12, %c0_13] : memref<1x4x32xbf16, #tpu.memory_space<vmem>>, vector<1x4x8xbf16>
    %34 = vector.shape_cast %33 : vector<1x4x8xbf16> to vector<4x8xbf16>
    %35 = vector.shape_cast %32 : vector<4x8xbf16> to vector<1x4x8xbf16>
    tpu.vector_store %arg4[%c0_11, %c0_12, %c0_13], %35 {strides = array<i32>} : memref<1x4x32xbf16, #tpu.memory_space<vmem>>, vector<1x4x8xbf16>,
    %36 = vector.extract_strided_slice %8 {offsets = [0, 8], sizes = [4, 8], strides = [1, 1]} : vector<4x32xf32> to vector<4x8xf32>
    %cst_14 = arith.constant 0.353553385 : f32
    %37 = vector.broadcast %cst_14 : f32 to vector<4x8xf32>
    %38 = arith.mulf %36, %37 : vector<4x8xf32>
    %39 = arith.truncf %38 : vector<4x8xf32> to vector<4x8xbf16>
    %40 = vector.extract_strided_slice %9 {offsets = [0, 8], sizes = [4, 8], strides = [1, 1]} : vector<4x32xf32> to vector<4x8xf32>
    %41 = arith.truncf %40 : vector<4x8xf32> to vector<4x8xbf16>
    %42 = vector.extract_strided_slice %10 {offsets = [0, 8], sizes = [4, 8], strides = [1, 1]} : vector<4x32xf32> to vector<4x8xf32>
    %43 = arith.truncf %42 : vector<4x8xf32> to vector<4x8xbf16>
    %cst_15 = arith.constant dense<0.000000e+00> : vector<4x4xf32>
    %44 = tpu.matmul %39, %41, %cst_15 {dimension_numbers = #tpu.dot_dimension_numbers<[1], [1], [0], [0], [0, 0, 1, 0], [], []>} : vector<4x8xbf16>, vector<4x8xbf16>, vector<4x4xf32> -> vector<4x4xf32>
    %cst_16 = arith.constant dense<0xFF800000> : vector<4xf32>
    %45 = vector.multi_reduction <maximumf>, %44, %cst_16 [1] : vector<4x4xf32> to vector<4xf32>
    %46 = vector.shape_cast %45 : vector<4xf32> to vector<4x1xf32>
    %47 = vector.broadcast %46 : vector<4x1xf32> to vector<4x4xf32>
    %48 = arith.subf %44, %47 : vector<4x4xf32>
    %49 = math.exp %48 : vector<4x4xf32>
    %cst_17 = arith.constant dense<0.000000e+00> : vector<4xf32>
    %50 = vector.multi_reduction <add>, %49, %cst_17 [1] : vector<4x4xf32> to vector<4xf32>
    %51 = vector.shape_cast %50 : vector<4xf32> to vector<4x1xf32>
    %52 = tpu.reciprocal %51 {approx = true} : vector<4x1xf32> -> vector<4x1xf32>
    %53 = vector.broadcast %52 : vector<4x1xf32> to vector<4x4xf32>
    %54 = arith.mulf %49, %53 : vector<4x4xf32>
    %55 = arith.truncf %54 : vector<4x4xf32> to vector<4x4xbf16>
    %cst_18 = arith.constant dense<0.000000e+00> : vector<4x8xf32>
    %56 = tpu.matmul %55, %43, %cst_18 {dimension_numbers = #tpu.dot_dimension_numbers<[1], [0], [0], [1], [0, 0, 1, 1], [], []>} : vector<4x4xbf16>, vector<4x8xbf16>, vector<4x8xf32> -> vector<4x8xf32>
    %57 = arith.truncf %56 : vector<4x8xf32> to vector<4x8xbf16>
    %c0_19 = arith.constant 0 : index
    %c0_20 = arith.constant 0 : index
    %c8 = arith.constant 8 : index
    %58 = vector.load %arg4[%c0_19, %c0_20, %c8] : memref<1x4x32xbf16, #tpu.memory_space<vmem>>, vector<1x4x8xbf16>
    %59 = vector.shape_cast %58 : vector<1x4x8xbf16> to vector<4x8xbf16>
    %60 = vector.shape_cast %57 : vector<4x8xbf16> to vector<1x4x8xbf16>
    tpu.vector_store %arg4[%c0_19, %c0_20, %c8], %60 {strides = array<i32>} : memref<1x4x32xbf16, #tpu.memory_space<vmem>>, vector<1x4x8xbf16>,
    %61 = vector.extract_strided_slice %8 {offsets = [0, 16], sizes = [4, 8], strides = [1, 1]} : vector<4x32xf32> to vector<4x8xf32>
    %cst_21 = arith.constant 0.353553385 : f32
    %62 = vector.broadcast %cst_21 : f32 to vector<4x8xf32>
    %63 = arith.mulf %61, %62 : vector<4x8xf32>
    %64 = arith.truncf %63 : vector<4x8xf32> to vector<4x8xbf16>
    %65 = vector.extract_strided_slice %9 {offsets = [0, 16], sizes = [4, 8], strides = [1, 1]} : vector<4x32xf32> to vector<4x8xf32>
    %66 = arith.truncf %65 : vector<4x8xf32> to vector<4x8xbf16>
    %67 = vector.extract_strided_slice %10 {offsets = [0, 16], sizes = [4, 8], strides = [1, 1]} : vector<4x32xf32> to vector<4x8xf32>
    %68 = arith.truncf %67 : vector<4x8xf32> to vector<4x8xbf16>
    %cst_22 = arith.constant dense<0.000000e+00> : vector<4x4xf32>
    %69 = tpu.matmul %64, %66, %cst_22 {dimension_numbers = #tpu.dot_dimension_numbers<[1], [1], [0], [0], [0, 0, 1, 0], [], []>} : vector<4x8xbf16>, vector<4x8xbf16>, vector<4x4xf32> -> vector<4x4xf32>
    %cst_23 = arith.constant dense<0xFF800000> : vector<4xf32>
    %70 = vector.multi_reduction <maximumf>, %69, %cst_23 [1] : vector<4x4xf32> to vector<4xf32>
    %71 = vector.shape_cast %70 : vector<4xf32> to vector<4x1xf32>
    %72 = vector.broadcast %71 : vector<4x1xf32> to vector<4x4xf32>
    %73 = arith.subf %69, %72 : vector<4x4xf32>
    %74 = math.exp %73 : vector<4x4xf32>
    %cst_24 = arith.constant dense<0.000000e+00> : vector<4xf32>
    %75 = vector.multi_reduction <add>, %74, %cst_24 [1] : vector<4x4xf32> to vector<4xf32>
    %76 = vector.shape_cast %75 : vector<4xf32> to vector<4x1xf32>
    %77 = tpu.reciprocal %76 {approx = true} : vector<4x1xf32> -> vector<4x1xf32>
    %78 = vector.broadcast %77 : vector<4x1xf32> to vector<4x4xf32>
    %79 = arith.mulf %74, %78 : vector<4x4xf32>
    %80 = arith.truncf %79 : vector<4x4xf32> to vector<4x4xbf16>
    %cst_25 = arith.constant dense<0.000000e+00> : vector<4x8xf32>
    %81 = tpu.matmul %80, %68, %cst_25 {dimension_numbers = #tpu.dot_dimension_numbers<[1], [0], [0], [1], [0, 0, 1, 1], [], []>} : vector<4x4xbf16>, vector<4x8xbf16>, vector<4x8xf32> -> vector<4x8xf32>
    %82 = arith.truncf %81 : vector<4x8xf32> to vector<4x8xbf16>
    %c0_26 = arith.constant 0 : index
    %c0_27 = arith.constant 0 : index
    %c16 = arith.constant 16 : index
    %83 = vector.load %arg4[%c0_26, %c0_27, %c16] : memref<1x4x32xbf16, #tpu.memory_space<vmem>>, vector<1x4x8xbf16>
    %84 = vector.shape_cast %83 : vector<1x4x8xbf16> to vector<4x8xbf16>
    %85 = vector.shape_cast %82 : vector<4x8xbf16> to vector<1x4x8xbf16>
    tpu.vector_store %arg4[%c0_26, %c0_27, %c16], %85 {strides = array<i32>} : memref<1x4x32xbf16, #tpu.memory_space<vmem>>, vector<1x4x8xbf16>,
    %86 = vector.extract_strided_slice %8 {offsets = [0, 24], sizes = [4, 8], strides = [1, 1]} : vector<4x32xf32> to vector<4x8xf32>
    %cst_28 = arith.constant 0.353553385 : f32
    %87 = vector.broadcast %cst_28 : f32 to vector<4x8xf32>
    %88 = arith.mulf %86, %87 : vector<4x8xf32>
    %89 = arith.truncf %88 : vector<4x8xf32> to vector<4x8xbf16>
    %90 = vector.extract_strided_slice %9 {offsets = [0, 24], sizes = [4, 8], strides = [1, 1]} : vector<4x32xf32> to vector<4x8xf32>
    %91 = arith.truncf %90 : vector<4x8xf32> to vector<4x8xbf16>
    %92 = vector.extract_strided_slice %10 {offsets = [0, 24], sizes = [4, 8], strides = [1, 1]} : vector<4x32xf32> to vector<4x8xf32>
    %93 = arith.truncf %92 : vector<4x8xf32> to vector<4x8xbf16>
    %cst_29 = arith.constant dense<0.000000e+00> : vector<4x4xf32>
    %94 = tpu.matmul %89, %91, %cst_29 {dimension_numbers = #tpu.dot_dimension_numbers<[1], [1], [0], [0], [0, 0, 1, 0], [], []>} : vector<4x8xbf16>, vector<4x8xbf16>, vector<4x4xf32> -> vector<4x4xf32>
    %cst_30 = arith.constant dense<0xFF800000> : vector<4xf32>
    %95 = vector.multi_reduction <maximumf>, %94, %cst_30 [1] : vector<4x4xf32> to vector<4xf32>
    %96 = vector.shape_cast %95 : vector<4xf32> to vector<4x1xf32>
    %97 = vector.broadcast %96 : vector<4x1xf32> to vector<4x4xf32>
    %98 = arith.subf %94, %97 : vector<4x4xf32>
    %99 = math.exp %98 : vector<4x4xf32>
    %cst_31 = arith.constant dense<0.000000e+00> : vector<4xf32>
    %100 = vector.multi_reduction <add>, %99, %cst_31 [1] : vector<4x4xf32> to vector<4xf32>
    %101 = vector.shape_cast %100 : vector<4xf32> to vector<4x1xf32>
    %102 = tpu.reciprocal %101 {approx = true} : vector<4x1xf32> -> vector<4x1xf32>
    %103 = vector.broadcast %102 : vector<4x1xf32> to vector<4x4xf32>
    %104 = arith.mulf %99, %103 : vector<4x4xf32>
    %105 = arith.truncf %104 : vector<4x4xf32> to vector<4x4xbf16>
    %cst_32 = arith.constant dense<0.000000e+00> : vector<4x8xf32>
    %106 = tpu.matmul %105, %93, %cst_32 {dimension_numbers = #tpu.dot_dimension_numbers<[1], [0], [0], [1], [0, 0, 1, 1], [], []>} : vector<4x4xbf16>, vector<4x8xbf16>, vector<4x8xf32> -> vector<4x8xf32>
    %107 = arith.truncf %106 : vector<4x8xf32> to vector<4x8xbf16>
    %c0_33 = arith.constant 0 : index
    %c0_34 = arith.constant 0 : index
    %c24 = arith.constant 24 : index
    %108 = vector.load %arg4[%c0_33, %c0_34, %c24] : memref<1x4x32xbf16, #tpu.memory_space<vmem>>, vector<1x4x8xbf16>
    %109 = vector.shape_cast %108 : vector<1x4x8xbf16> to vector<4x8xbf16>
    %110 = vector.shape_cast %107 : vector<4x8xbf16> to vector<1x4x8xbf16>
    tpu.vector_store %arg4[%c0_33, %c0_34, %c24], %110 {strides = array<i32>} : memref<1x4x32xbf16, #tpu.memory_space<vmem>>, vector<1x4x8xbf16>,
    return
  }
  func.func @transform_0(%arg0: i32) -> (i32, i32, i32) {
    %c0_i32 = arith.constant 0 : i32
    %c0_i32_0 = arith.constant 0 : i32
    %c0_i32_1 = arith.constant 0 : i32
    return %arg0, %c0_i32, %c0_i32_0 : i32, i32, i32
  }
  func.func @transform_1(%arg0: i32) -> (i32, i32) {
    %c0_i32 = arith.constant 0 : i32
    %c0_i32_0 = arith.constant 0 : i32
    %c0_i32_1 = arith.constant 0 : i32
    return %c0_i32, %c0_i32_0 : i32, i32
  }
  func.func @transform_2(%arg0: i32) -> (i32, i32) {
    %c0_i32 = arith.constant 0 : i32
    %c0_i32_0 = arith.constant 0 : i32
    %c0_i32_1 = arith.constant 0 : i32
    return %c0_i32, %c0_i32_0 : i32, i32
  }
  func.func @transform_3(%arg0: i32) -> (i32, i32, i32) {
    %c0_i32 = arith.constant 0 : i32
    %c0_i32_0 = arith.constant 0 : i32
    %c0_i32_1 = arith.constant 0 : i32
    return %arg0, %c0_i32, %c0_i32_0 : i32, i32, i32
  }
}

module attributes {stable_mosaic.version = 11 : i64} {
  func.func @_matmul_1k_kernel(%arg0: i32, %arg1: i32, %arg2: memref<8x32xf32, #tpu.memory_space<vmem>>, %arg3: memref<32x64xbf16, #tpu.memory_space<vmem>>, %arg4: memref<1x64xf32, #tpu.memory_space<vmem>>, %arg5: memref<8x64xbf16, #tpu.memory_space<vmem>>) attributes {dimension_semantics = [#tpu.dimension_semantics<parallel>, #tpu.dimension_semantics<parallel>], iteration_bounds = array<i64: 1, 1>, scalar_prefetch = 0 : i64, scratch_operands = 0 : i64, tpu.core_type = #tpu.core_type<tc>, window_params = [{transform_indices = @transform_0, window_bounds = array<i64: 8, 32>}, {transform_indices = @transform_1, window_bounds = array<i64: 32, 64>}, {transform_indices = @transform_2, window_bounds = array<i64: 1, 64>}, {transform_indices = @transform_3, window_bounds = array<i64: 8, 64>}]} {
    %c0 = arith.constant 0 : index
    %c0_0 = arith.constant 0 : index
    %0 = vector.load %arg2[%c0, %c0_0] : memref<8x32xf32, #tpu.memory_space<vmem>>, vector<8x32xf32>
    %1 = arith.truncf %0 : vector<8x32xf32> to vector<8x32xbf16>
    %c0_1 = arith.constant 0 : index
    %c0_2 = arith.constant 0 : index
    %2 = vector.load %arg3[%c0_1, %c0_2] : memref<32x64xbf16, #tpu.memory_space<vmem>>, vector<32x64xbf16>
    %cst = arith.constant dense<0.000000e+00> : vector<8x64xf32>
    %3 = tpu.matmul %1, %2, %cst {dimension_numbers = #tpu.dot_dimension_numbers<[1], [0], [0], [1], [0, 0, 1, 1], [], []>} : vector<8x32xbf16>, vector<32x64xbf16>, vector<8x64xf32> -> vector<8x64xf32>
    %c0_3 = arith.constant 0 : index
    %c0_4 = arith.constant 0 : index
    %4 = vector.load %arg4[%c0_3, %c0_4] : memref<1x64xf32, #tpu.memory_space<vmem>>, vector<1x64xf32>
    %5 = vector.broadcast %4 : vector<1x64xf32> to vector<8x64xf32>
    %6 = arith.addf %3, %5 : vector<8x64xf32>
    %cst_5 = arith.constant 0.000000e+00 : f32
    %7 = vector.broadcast %cst_5 : f32 to vector<8x64xf32>
    %8 = arith.maximumf %6, %7 : vector<8x64xf32>
    %9 = arith.truncf %8 : vector<8x64xf32> to vector<8x64xbf16>
    %c0_6 = arith.constant 0 : index
    %c0_7 = arith.constant 0 : index
    %10 = vector.load %arg5[%c0_6, %c0_7] : memref<8x64xbf16, #tpu.memory_space<vmem>>, vector<8x64xbf16>
    tpu.vector_store %arg5[%c0_6, %c0_7], %9 {strides = array<i32>} : memref<8x64xbf16, #tpu.memory_space<vmem>>, vector<8x64xbf16>,
    return
  }
  func.func @transform_0(%arg0: i32, %arg1: i32) -> (i32, i32) {
    %c0_i32 = arith.constant 0 : i32
    %c0_i32_0 = arith.constant 0 : i32
    return %arg0, %c0_i32 : i32, i32
  }
  func.func @transform_1(%arg0: i32, %arg1: i32) -> (i32, i32) {
    %c0_i32 = arith.constant 0 : i32
    %c0_i32_0 = arith.constant 0 : i32
    return %c0_i32, %arg1 : i32, i32
  }
  func.func @transform_2(%arg0: i32, %arg1: i32) -> (i32, i32) {
    %c0_i32 = arith.constant 0 : i32
    %c0_i32_0 = arith.constant 0 : i32
    return %c0_i32, %arg1 : i32, i32
  }
  func.func @transform_3(%arg0: i32, %arg1: i32) -> (i32, i32) {
    %c0_i32 = arith.constant 0 : i32
    return %arg0, %arg1 : i32, i32
  }
}

module attributes {stable_mosaic.version = 11 : i64} {
  func.func @_linear_res_ln_1k_kernel(%arg0: i32, %arg1: memref<8x32xbf16, #tpu.memory_space<vmem>>, %arg2: memref<32x32xbf16, #tpu.memory_space<vmem>>, %arg3: memref<1x32xf32, #tpu.memory_space<vmem>>, %arg4: memref<8x32xf32, #tpu.memory_space<vmem>>, %arg5: memref<1x32xf32, #tpu.memory_space<vmem>>, %arg6: memref<1x32xf32, #tpu.memory_space<vmem>>, %arg7: memref<8x32xf32, #tpu.memory_space<vmem>>, %arg8: memref<8x32xf32, #tpu.memory_space<vmem>>) attributes {dimension_semantics = [#tpu.dimension_semantics<parallel>], iteration_bounds = array<i64: 1>, scalar_prefetch = 0 : i64, scratch_operands = 0 : i64, tpu.core_type = #tpu.core_type<tc>, window_params = [{transform_indices = @transform_0, window_bounds = array<i64: 8, 32>}, {pipeline_mode = #tpu.pipeline_mode<synchronous>, transform_indices = @transform_1, window_bounds = array<i64: 32, 32>}, {pipeline_mode = #tpu.pipeline_mode<synchronous>, transform_indices = @transform_2, window_bounds = array<i64: 1, 32>}, {transform_indices = @transform_3, window_bounds = array<i64: 8, 32>}, {pipeline_mode = #tpu.pipeline_mode<synchronous>, transform_indices = @transform_4, window_bounds = array<i64: 1, 32>}, {pipeline_mode = #tpu.pipeline_mode<synchronous>, transform_indices = @transform_5, window_bounds = array<i64: 1, 32>}, {transform_indices = @transform_6, window_bounds = array<i64: 8, 32>}, {transform_indices = @transform_7, window_bounds = array<i64: 8, 32>}]} {
    %c0 = arith.constant 0 : index
    %c0_0 = arith.constant 0 : index
    %0 = vector.load %arg1[%c0, %c0_0] : memref<8x32xbf16, #tpu.memory_space<vmem>>, vector<8x32xbf16>
    %c0_1 = arith.constant 0 : index
    %c0_2 = arith.constant 0 : index
    %1 = vector.load %arg2[%c0_1, %c0_2] : memref<32x32xbf16, #tpu.memory_space<vmem>>, vector<32x32xbf16>
    %cst = arith.constant dense<0.000000e+00> : vector<8x32xf32>
    %2 = tpu.matmul %0, %1, %cst {dimension_numbers = #tpu.dot_dimension_numbers<[1], [0], [0], [1], [0, 0, 1, 1], [], []>} : vector<8x32xbf16>, vector<32x32xbf16>, vector<8x32xf32> -> vector<8x32xf32>
    %c0_3 = arith.constant 0 : index
    %c0_4 = arith.constant 0 : index
    %3 = vector.load %arg3[%c0_3, %c0_4] : memref<1x32xf32, #tpu.memory_space<vmem>>, vector<1x32xf32>
    %4 = vector.broadcast %3 : vector<1x32xf32> to vector<8x32xf32>
    %5 = arith.addf %2, %4 : vector<8x32xf32>
    %c0_5 = arith.constant 0 : index
    %c0_6 = arith.constant 0 : index
    %6 = vector.load %arg4[%c0_5, %c0_6] : memref<8x32xf32, #tpu.memory_space<vmem>>, vector<8x32xf32>
    %7 = arith.addf %5, %6 : vector<8x32xf32>
    %c0_7 = arith.constant 0 : index
    %c0_8 = arith.constant 0 : index
    %8 = vector.load %arg7[%c0_7, %c0_8] : memref<8x32xf32, #tpu.memory_space<vmem>>, vector<8x32xf32>
    tpu.vector_store %arg7[%c0_7, %c0_8], %7 {strides = array<i32>} : memref<8x32xf32, #tpu.memory_space<vmem>>, vector<8x32xf32>,
    %cst_9 = arith.constant dense<0.000000e+00> : vector<8xf32>
    %9 = vector.multi_reduction <add>, %7, %cst_9 [1] : vector<8x32xf32> to vector<8xf32>
    %10 = vector.shape_cast %9 : vector<8xf32> to vector<8x1xf32>
    %cst_10 = arith.constant 3.200000e+01 : f32
    %11 = vector.broadcast %cst_10 : f32 to vector<8x1xf32>
    %12 = arith.divf %10, %11 : vector<8x1xf32>
    %13 = vector.broadcast %12 : vector<8x1xf32> to vector<8x32xf32>
    %14 = arith.subf %7, %13 : vector<8x32xf32>
    %15 = arith.mulf %14, %14 : vector<8x32xf32>
    %cst_11 = arith.constant dense<0.000000e+00> : vector<8xf32>
    %16 = vector.multi_reduction <add>, %15, %cst_11 [1] : vector<8x32xf32> to vector<8xf32>
    %17 = vector.shape_cast %16 : vector<8xf32> to vector<8x1xf32>
    %cst_12 = arith.constant 3.200000e+01 : f32
    %18 = vector.broadcast %cst_12 : f32 to vector<8x1xf32>
    %19 = arith.divf %17, %18 : vector<8x1xf32>
    %20 = vector.broadcast %12 : vector<8x1xf32> to vector<8x32xf32>
    %21 = arith.subf %7, %20 : vector<8x32xf32>
    %cst_13 = arith.constant 9.99999974E-6 : f32
    %22 = vector.broadcast %cst_13 : f32 to vector<8x1xf32>
    %23 = arith.addf %19, %22 : vector<8x1xf32>
    %24 = math.rsqrt %23 : vector<8x1xf32>
    %25 = vector.broadcast %24 : vector<8x1xf32> to vector<8x32xf32>
    %26 = arith.mulf %21, %25 : vector<8x32xf32>
    %c0_14 = arith.constant 0 : index
    %c0_15 = arith.constant 0 : index
    %27 = vector.load %arg5[%c0_14, %c0_15] : memref<1x32xf32, #tpu.memory_space<vmem>>, vector<1x32xf32>
    %28 = vector.broadcast %27 : vector<1x32xf32> to vector<8x32xf32>
    %29 = arith.mulf %26, %28 : vector<8x32xf32>
    %c0_16 = arith.constant 0 : index
    %c0_17 = arith.constant 0 : index
    %30 = vector.load %arg6[%c0_16, %c0_17] : memref<1x32xf32, #tpu.memory_space<vmem>>, vector<1x32xf32>
    %31 = vector.broadcast %30 : vector<1x32xf32> to vector<8x32xf32>
    %32 = arith.addf %29, %31 : vector<8x32xf32>
    %c0_18 = arith.constant 0 : index
    %c0_19 = arith.constant 0 : index
    %33 = vector.load %arg8[%c0_18, %c0_19] : memref<8x32xf32, #tpu.memory_space<vmem>>, vector<8x32xf32>
    tpu.vector_store %arg8[%c0_18, %c0_19], %32 {strides = array<i32>} : memref<8x32xf32, #tpu.memory_space<vmem>>, vector<8x32xf32>,
    return
  }
  func.func @transform_0(%arg0: i32) -> (i32, i32) {
    %c0_i32 = arith.constant 0 : i32
    %c0_i32_0 = arith.constant 0 : i32
    return %arg0, %c0_i32 : i32, i32
  }
  func.func @transform_1(%arg0: i32) -> (i32, i32) {
    %c0_i32 = arith.constant 0 : i32
    %c0_i32_0 = arith.constant 0 : i32
    %c0_i32_1 = arith.constant 0 : i32
    return %c0_i32, %c0_i32_0 : i32, i32
  }
  func.func @transform_2(%arg0: i32) -> (i32, i32) {
    %c0_i32 = arith.constant 0 : i32
    %c0_i32_0 = arith.constant 0 : i32
    %c0_i32_1 = arith.constant 0 : i32
    return %c0_i32, %c0_i32_0 : i32, i32
  }
  func.func @transform_3(%arg0: i32) -> (i32, i32) {
    %c0_i32 = arith.constant 0 : i32
    %c0_i32_0 = arith.constant 0 : i32
    return %arg0, %c0_i32 : i32, i32
  }
  func.func @transform_4(%arg0: i32) -> (i32, i32) {
    %c0_i32 = arith.constant 0 : i32
    %c0_i32_0 = arith.constant 0 : i32
    %c0_i32_1 = arith.constant 0 : i32
    return %c0_i32, %c0_i32_0 : i32, i32
  }
  func.func @transform_5(%arg0: i32) -> (i32, i32) {
    %c0_i32 = arith.constant 0 : i32
    %c0_i32_0 = arith.constant 0 : i32
    %c0_i32_1 = arith.constant 0 : i32
    return %c0_i32, %c0_i32_0 : i32, i32
  }
  func.func @transform_6(%arg0: i32) -> (i32, i32) {
    %c0_i32 = arith.constant 0 : i32
    %c0_i32_0 = arith.constant 0 : i32
    return %arg0, %c0_i32 : i32, i32
  }
  func.func @transform_7(%arg0: i32) -> (i32, i32) {
    %c0_i32 = arith.constant 0 : i32
    %c0_i32_0 = arith.constant 0 : i32
    return %arg0, %c0_i32 : i32, i32
  }
}

module attributes {stable_mosaic.version = 11 : i64} {
  func.func @_linear_res_ln_1k_kernel(%arg0: i32, %arg1: memref<8x64xbf16, #tpu.memory_space<vmem>>, %arg2: memref<64x32xbf16, #tpu.memory_space<vmem>>, %arg3: memref<1x32xf32, #tpu.memory_space<vmem>>, %arg4: memref<8x32xf32, #tpu.memory_space<vmem>>, %arg5: memref<1x32xf32, #tpu.memory_space<vmem>>, %arg6: memref<1x32xf32, #tpu.memory_space<vmem>>, %arg7: memref<8x32xf32, #tpu.memory_space<vmem>>, %arg8: memref<8x32xf32, #tpu.memory_space<vmem>>) attributes {dimension_semantics = [#tpu.dimension_semantics<parallel>], iteration_bounds = array<i64: 1>, scalar_prefetch = 0 : i64, scratch_operands = 0 : i64, tpu.core_type = #tpu.core_type<tc>, window_params = [{transform_indices = @transform_0, window_bounds = array<i64: 8, 64>}, {pipeline_mode = #tpu.pipeline_mode<synchronous>, transform_indices = @transform_1, window_bounds = array<i64: 64, 32>}, {pipeline_mode = #tpu.pipeline_mode<synchronous>, transform_indices = @transform_2, window_bounds = array<i64: 1, 32>}, {transform_indices = @transform_3, window_bounds = array<i64: 8, 32>}, {pipeline_mode = #tpu.pipeline_mode<synchronous>, transform_indices = @transform_4, window_bounds = array<i64: 1, 32>}, {pipeline_mode = #tpu.pipeline_mode<synchronous>, transform_indices = @transform_5, window_bounds = array<i64: 1, 32>}, {transform_indices = @transform_6, window_bounds = array<i64: 8, 32>}, {transform_indices = @transform_7, window_bounds = array<i64: 8, 32>}]} {
    %c0 = arith.constant 0 : index
    %c0_0 = arith.constant 0 : index
    %0 = vector.load %arg1[%c0, %c0_0] : memref<8x64xbf16, #tpu.memory_space<vmem>>, vector<8x64xbf16>
    %c0_1 = arith.constant 0 : index
    %c0_2 = arith.constant 0 : index
    %1 = vector.load %arg2[%c0_1, %c0_2] : memref<64x32xbf16, #tpu.memory_space<vmem>>, vector<64x32xbf16>
    %cst = arith.constant dense<0.000000e+00> : vector<8x32xf32>
    %2 = tpu.matmul %0, %1, %cst {dimension_numbers = #tpu.dot_dimension_numbers<[1], [0], [0], [1], [0, 0, 1, 1], [], []>} : vector<8x64xbf16>, vector<64x32xbf16>, vector<8x32xf32> -> vector<8x32xf32>
    %c0_3 = arith.constant 0 : index
    %c0_4 = arith.constant 0 : index
    %3 = vector.load %arg3[%c0_3, %c0_4] : memref<1x32xf32, #tpu.memory_space<vmem>>, vector<1x32xf32>
    %4 = vector.broadcast %3 : vector<1x32xf32> to vector<8x32xf32>
    %5 = arith.addf %2, %4 : vector<8x32xf32>
    %c0_5 = arith.constant 0 : index
    %c0_6 = arith.constant 0 : index
    %6 = vector.load %arg4[%c0_5, %c0_6] : memref<8x32xf32, #tpu.memory_space<vmem>>, vector<8x32xf32>
    %7 = arith.addf %5, %6 : vector<8x32xf32>
    %c0_7 = arith.constant 0 : index
    %c0_8 = arith.constant 0 : index
    %8 = vector.load %arg7[%c0_7, %c0_8] : memref<8x32xf32, #tpu.memory_space<vmem>>, vector<8x32xf32>
    tpu.vector_store %arg7[%c0_7, %c0_8], %7 {strides = array<i32>} : memref<8x32xf32, #tpu.memory_space<vmem>>, vector<8x32xf32>,
    %cst_9 = arith.constant dense<0.000000e+00> : vector<8xf32>
    %9 = vector.multi_reduction <add>, %7, %cst_9 [1] : vector<8x32xf32> to vector<8xf32>
    %10 = vector.shape_cast %9 : vector<8xf32> to vector<8x1xf32>
    %cst_10 = arith.constant 3.200000e+01 : f32
    %11 = vector.broadcast %cst_10 : f32 to vector<8x1xf32>
    %12 = arith.divf %10, %11 : vector<8x1xf32>
    %13 = vector.broadcast %12 : vector<8x1xf32> to vector<8x32xf32>
    %14 = arith.subf %7, %13 : vector<8x32xf32>
    %15 = arith.mulf %14, %14 : vector<8x32xf32>
    %cst_11 = arith.constant dense<0.000000e+00> : vector<8xf32>
    %16 = vector.multi_reduction <add>, %15, %cst_11 [1] : vector<8x32xf32> to vector<8xf32>
    %17 = vector.shape_cast %16 : vector<8xf32> to vector<8x1xf32>
    %cst_12 = arith.constant 3.200000e+01 : f32
    %18 = vector.broadcast %cst_12 : f32 to vector<8x1xf32>
    %19 = arith.divf %17, %18 : vector<8x1xf32>
    %20 = vector.broadcast %12 : vector<8x1xf32> to vector<8x32xf32>
    %21 = arith.subf %7, %20 : vector<8x32xf32>
    %cst_13 = arith.constant 9.99999974E-6 : f32
    %22 = vector.broadcast %cst_13 : f32 to vector<8x1xf32>
    %23 = arith.addf %19, %22 : vector<8x1xf32>
    %24 = math.rsqrt %23 : vector<8x1xf32>
    %25 = vector.broadcast %24 : vector<8x1xf32> to vector<8x32xf32>
    %26 = arith.mulf %21, %25 : vector<8x32xf32>
    %c0_14 = arith.constant 0 : index
    %c0_15 = arith.constant 0 : index
    %27 = vector.load %arg5[%c0_14, %c0_15] : memref<1x32xf32, #tpu.memory_space<vmem>>, vector<1x32xf32>
    %28 = vector.broadcast %27 : vector<1x32xf32> to vector<8x32xf32>
    %29 = arith.mulf %26, %28 : vector<8x32xf32>
    %c0_16 = arith.constant 0 : index
    %c0_17 = arith.constant 0 : index
    %30 = vector.load %arg6[%c0_16, %c0_17] : memref<1x32xf32, #tpu.memory_space<vmem>>, vector<1x32xf32>
    %31 = vector.broadcast %30 : vector<1x32xf32> to vector<8x32xf32>
    %32 = arith.addf %29, %31 : vector<8x32xf32>
    %c0_18 = arith.constant 0 : index
    %c0_19 = arith.constant 0 : index
    %33 = vector.load %arg8[%c0_18, %c0_19] : memref<8x32xf32, #tpu.memory_space<vmem>>, vector<8x32xf32>
    tpu.vector_store %arg8[%c0_18, %c0_19], %32 {strides = array<i32>} : memref<8x32xf32, #tpu.memory_space<vmem>>, vector<8x32xf32>,
    return
  }
  func.func @transform_0(%arg0: i32) -> (i32, i32) {
    %c0_i32 = arith.constant 0 : i32
    %c0_i32_0 = arith.constant 0 : i32
    return %arg0, %c0_i32 : i32, i32
  }
  func.func @transform_1(%arg0: i32) -> (i32, i32) {
    %c0_i32 = arith.constant 0 : i32
    %c0_i32_0 = arith.constant 0 : i32
    %c0_i32_1 = arith.constant 0 : i32
    return %c0_i32, %c0_i32_0 : i32, i32
  }
  func.func @transform_2(%arg0: i32) -> (i32, i32) {
    %c0_i32 = arith.constant 0 : i32
    %c0_i32_0 = arith.constant 0 : i32
    %c0_i32_1 = arith.constant 0 : i32
    return %c0_i32, %c0_i32_0 : i32, i32
  }
  func.func @transform_3(%arg0: i32) -> (i32, i32) {
    %c0_i32 = arith.constant 0 : i32
    %c0_i32_0 = arith.constant 0 : i32
    return %arg0, %c0_i32 : i32, i32
  }
  func.func @transform_4(%arg0: i32) -> (i32, i32) {
    %c0_i32 = arith.constant 0 : i32
    %c0_i32_0 = arith.constant 0 : i32
    %c0_i32_1 = arith.constant 0 : i32
    return %c0_i32, %c0_i32_0 : i32, i32
  }
  func.func @transform_5(%arg0: i32) -> (i32, i32) {
    %c0_i32 = arith.constant 0 : i32
    %c0_i32_0 = arith.constant 0 : i32
    %c0_i32_1 = arith.constant 0 : i32
    return %c0_i32, %c0_i32_0 : i32, i32
  }
  func.func @transform_6(%arg0: i32) -> (i32, i32) {
    %c0_i32 = arith.constant 0 : i32
    %c0_i32_0 = arith.constant 0 : i32
    return %arg0, %c0_i32 : i32, i32
  }
  func.func @transform_7(%arg0: i32) -> (i32, i32) {
    %c0_i32 = arith.constant 0 : i32
    %c0_i32_0 = arith.constant 0 : i32
    return %arg0, %c0_i32 : i32, i32
  }
}

module attributes {stable_mosaic.version = 11 : i64} {
  func.func @_matmul_1k_kernel(%arg0: i32, %arg1: i32, %arg2: memref<8x32xbf16, #tpu.memory_space<vmem>>, %arg3: memref<32x32xbf16, #tpu.memory_space<vmem>>, %arg4: memref<1x32xf32, #tpu.memory_space<vmem>>, %arg5: memref<8x32xf32, #tpu.memory_space<vmem>>) attributes {dimension_semantics = [#tpu.dimension_semantics<parallel>, #tpu.dimension_semantics<parallel>], iteration_bounds = array<i64: 1, 1>, scalar_prefetch = 0 : i64, scratch_operands = 0 : i64, tpu.core_type = #tpu.core_type<tc>, window_params = [{transform_indices = @transform_0, window_bounds = array<i64: 8, 32>}, {transform_indices = @transform_1, window_bounds = array<i64: 32, 32>}, {transform_indices = @transform_2, window_bounds = array<i64: 1, 32>}, {transform_indices = @transform_3, window_bounds = array<i64: 8, 32>}]} {
    %c0 = arith.constant 0 : index
    %c0_0 = arith.constant 0 : index
    %0 = vector.load %arg2[%c0, %c0_0] : memref<8x32xbf16, #tpu.memory_space<vmem>>, vector<8x32xbf16>
    %c0_1 = arith.constant 0 : index
    %c0_2 = arith.constant 0 : index
    %1 = vector.load %arg3[%c0_1, %c0_2] : memref<32x32xbf16, #tpu.memory_space<vmem>>, vector<32x32xbf16>
    %cst = arith.constant dense<0.000000e+00> : vector<8x32xf32>
    %2 = tpu.matmul %0, %1, %cst {dimension_numbers = #tpu.dot_dimension_numbers<[1], [0], [0], [1], [0, 0, 1, 1], [], []>} : vector<8x32xbf16>, vector<32x32xbf16>, vector<8x32xf32> -> vector<8x32xf32>
    %c0_3 = arith.constant 0 : index
    %c0_4 = arith.constant 0 : index
    %3 = vector.load %arg4[%c0_3, %c0_4] : memref<1x32xf32, #tpu.memory_space<vmem>>, vector<1x32xf32>
    %4 = vector.broadcast %3 : vector<1x32xf32> to vector<8x32xf32>
    %5 = arith.addf %2, %4 : vector<8x32xf32>
    %c0_5 = arith.constant 0 : index
    %c0_6 = arith.constant 0 : index
    %6 = vector.load %arg5[%c0_5, %c0_6] : memref<8x32xf32, #tpu.memory_space<vmem>>, vector<8x32xf32>
    tpu.vector_store %arg5[%c0_5, %c0_6], %5 {strides = array<i32>} : memref<8x32xf32, #tpu.memory_space<vmem>>, vector<8x32xf32>,
    return
  }
  func.func @transform_0(%arg0: i32, %arg1: i32) -> (i32, i32) {
    %c0_i32 = arith.constant 0 : i32
    %c0_i32_0 = arith.constant 0 : i32
    return %arg0, %c0_i32 : i32, i32
  }
  func.func @transform_1(%arg0: i32, %arg1: i32) -> (i32, i32) {
    %c0_i32 = arith.constant 0 : i32
    %c0_i32_0 = arith.constant 0 : i32
    return %c0_i32, %arg1 : i32, i32
  }
  func.func @transform_2(%arg0: i32, %arg1: i32) -> (i32, i32) {
    %c0_i32 = arith.constant 0 : i32
    %c0_i32_0 = arith.constant 0 : i32
    return %c0_i32, %arg1 : i32, i32
  }
  func.func @transform_3(%arg0: i32, %arg1: i32) -> (i32, i32) {
    %c0_i32 = arith.constant 0 : i32
    return %arg0, %arg1 : i32, i32
  }
}

module attributes {stable_mosaic.version = 11 : i64} {
  func.func @_fused_cross_attn_kernel(%arg0: i32, %arg1: memref<1x4x32xf32, #tpu.memory_space<vmem>>, %arg2: memref<32x32xbf16, #tpu.memory_space<vmem>>, %arg3: memref<1x32xf32, #tpu.memory_space<vmem>>, %arg4: memref<1x8x64xbf16, #tpu.memory_space<vmem>>, %arg5: memref<1x4x32xbf16, #tpu.memory_space<vmem>>) attributes {dimension_semantics = [#tpu.dimension_semantics<parallel>], iteration_bounds = array<i64: 2>, scalar_prefetch = 0 : i64, scratch_operands = 0 : i64, tpu.core_type = #tpu.core_type<tc>, window_params = [{transform_indices = @transform_0, window_bounds = array<i64: 1, 4, 32>}, {pipeline_mode = #tpu.pipeline_mode<synchronous>, transform_indices = @transform_1, window_bounds = array<i64: 32, 32>}, {pipeline_mode = #tpu.pipeline_mode<synchronous>, transform_indices = @transform_2, window_bounds = array<i64: 1, 32>}, {pipeline_mode = #tpu.pipeline_mode<synchronous>, transform_indices = @transform_3, window_bounds = array<i64: 1, 8, 64>}, {transform_indices = @transform_4, window_bounds = array<i64: 1, 4, 32>}]} {
    %c0 = arith.constant 0 : index
    %c0_0 = arith.constant 0 : index
    %c0_1 = arith.constant 0 : index
    %0 = vector.load %arg1[%c0, %c0_0, %c0_1] : memref<1x4x32xf32, #tpu.memory_space<vmem>>, vector<1x4x32xf32>
    %1 = vector.shape_cast %0 : vector<1x4x32xf32> to vector<4x32xf32>
    %2 = arith.truncf %1 : vector<4x32xf32> to vector<4x32xbf16>
    %c0_2 = arith.constant 0 : index
    %c0_3 = arith.constant 0 : index
    %3 = vector.load %arg2[%c0_2, %c0_3] : memref<32x32xbf16, #tpu.memory_space<vmem>>, vector<32x32xbf16>
    %cst = arith.constant dense<0.000000e+00> : vector<4x32xf32>
    %4 = tpu.matmul %2, %3, %cst {dimension_numbers = #tpu.dot_dimension_numbers<[1], [0], [0], [1], [0, 0, 1, 1], [], []>} : vector<4x32xbf16>, vector<32x32xbf16>, vector<4x32xf32> -> vector<4x32xf32>
    %c0_4 = arith.constant 0 : index
    %c0_5 = arith.constant 0 : index
    %5 = vector.load %arg3[%c0_4, %c0_5] : memref<1x32xf32, #tpu.memory_space<vmem>>, vector<1x32xf32>
    %6 = vector.broadcast %5 : vector<1x32xf32> to vector<4x32xf32>
    %7 = arith.addf %4, %6 : vector<4x32xf32>
    %c0_6 = arith.constant 0 : index
    %c0_7 = arith.constant 0 : index
    %c0_8 = arith.constant 0 : index
    %8 = vector.load %arg4[%c0_6, %c0_7, %c0_8] : memref<1x8x64xbf16, #tpu.memory_space<vmem>>, vector<1x8x64xbf16>
    %9 = vector.shape_cast %8 : vector<1x8x64xbf16> to vector<8x64xbf16>
    %10 = vector.extract_strided_slice %9 {offsets = [0, 0], sizes = [8, 32], strides = [1, 1]} : vector<8x64xbf16> to vector<8x32xbf16>
    %11 = vector.extract_strided_slice %9 {offsets = [0, 32], sizes = [8, 32], strides = [1, 1]} : vector<8x64xbf16> to vector<8x32xbf16>
    %12 = vector.extract_strided_slice %7 {offsets = [0, 0], sizes = [4, 8], strides = [1, 1]} : vector<4x32xf32> to vector<4x8xf32>
    %cst_9 = arith.constant 0.353553385 : f32
    %13 = vector.broadcast %cst_9 : f32 to vector<4x8xf32>
    %14 = arith.mulf %12, %13 : vector<4x8xf32>
    %15 = arith.truncf %14 : vector<4x8xf32> to vector<4x8xbf16>
    %16 = vector.extract_strided_slice %10 {offsets = [0, 0], sizes = [8, 8], strides = [1, 1]} : vector<8x32xbf16> to vector<8x8xbf16>
    %17 = vector.extract_strided_slice %11 {offsets = [0, 0], sizes = [8, 8], strides = [1, 1]} : vector<8x32xbf16> to vector<8x8xbf16>
    %cst_10 = arith.constant dense<0.000000e+00> : vector<4x8xf32>
    %18 = tpu.matmul %15, %16, %cst_10 {dimension_numbers = #tpu.dot_dimension_numbers<[1], [1], [0], [0], [0, 0, 1, 0], [], []>} : vector<4x8xbf16>, vector<8x8xbf16>, vector<4x8xf32> -> vector<4x8xf32>
    %cst_11 = arith.constant dense<0xFF800000> : vector<4xf32>
    %19 = vector.multi_reduction <maximumf>, %18, %cst_11 [1] : vector<4x8xf32> to vector<4xf32>
    %20 = vector.shape_cast %19 : vector<4xf32> to vector<4x1xf32>
    %21 = vector.broadcast %20 : vector<4x1xf32> to vector<4x8xf32>
    %22 = arith.subf %18, %21 : vector<4x8xf32>
    %23 = math.exp %22 : vector<4x8xf32>
    %cst_12 = arith.constant dense<0.000000e+00> : vector<4xf32>
    %24 = vector.multi_reduction <add>, %23, %cst_12 [1] : vector<4x8xf32> to vector<4xf32>
    %25 = vector.shape_cast %24 : vector<4xf32> to vector<4x1xf32>
    %26 = tpu.reciprocal %25 {approx = true} : vector<4x1xf32> -> vector<4x1xf32>
    %27 = vector.broadcast %26 : vector<4x1xf32> to vector<4x8xf32>
    %28 = arith.mulf %23, %27 : vector<4x8xf32>
    %29 = arith.truncf %28 : vector<4x8xf32> to vector<4x8xbf16>
    %cst_13 = arith.constant dense<0.000000e+00> : vector<4x8xf32>
    %30 = tpu.matmul %29, %17, %cst_13 {dimension_numbers = #tpu.dot_dimension_numbers<[1], [0], [0], [1], [0, 0, 1, 1], [], []>} : vector<4x8xbf16>, vector<8x8xbf16>, vector<4x8xf32> -> vector<4x8xf32>
    %31 = arith.truncf %30 : vector<4x8xf32> to vector<4x8xbf16>
    %c0_14 = arith.constant 0 : index
    %c0_15 = arith.constant 0 : index
    %c0_16 = arith.constant 0 : index
    %32 = vector.load %arg5[%c0_14, %c0_15, %c0_16] : memref<1x4x32xbf16, #tpu.memory_space<vmem>>, vector<1x4x8xbf16>
    %33 = vector.shape_cast %32 : vector<1x4x8xbf16> to vector<4x8xbf16>
    %34 = vector.shape_cast %31 : vector<4x8xbf16> to vector<1x4x8xbf16>
    tpu.vector_store %arg5[%c0_14, %c0_15, %c0_16], %34 {strides = array<i32>} : memref<1x4x32xbf16, #tpu.memory_space<vmem>>, vector<1x4x8xbf16>,
    %35 = vector.extract_strided_slice %7 {offsets = [0, 8], sizes = [4, 8], strides = [1, 1]} : vector<4x32xf32> to vector<4x8xf32>
    %cst_17 = arith.constant 0.353553385 : f32
    %36 = vector.broadcast %cst_17 : f32 to vector<4x8xf32>
    %37 = arith.mulf %35, %36 : vector<4x8xf32>
    %38 = arith.truncf %37 : vector<4x8xf32> to vector<4x8xbf16>
    %39 = vector.extract_strided_slice %10 {offsets = [0, 8], sizes = [8, 8], strides = [1, 1]} : vector<8x32xbf16> to vector<8x8xbf16>
    %40 = vector.extract_strided_slice %11 {offsets = [0, 8], sizes = [8, 8], strides = [1, 1]} : vector<8x32xbf16> to vector<8x8xbf16>
    %cst_18 = arith.constant dense<0.000000e+00> : vector<4x8xf32>
    %41 = tpu.matmul %38, %39, %cst_18 {dimension_numbers = #tpu.dot_dimension_numbers<[1], [1], [0], [0], [0, 0, 1, 0], [], []>} : vector<4x8xbf16>, vector<8x8xbf16>, vector<4x8xf32> -> vector<4x8xf32>
    %cst_19 = arith.constant dense<0xFF800000> : vector<4xf32>
    %42 = vector.multi_reduction <maximumf>, %41, %cst_19 [1] : vector<4x8xf32> to vector<4xf32>
    %43 = vector.shape_cast %42 : vector<4xf32> to vector<4x1xf32>
    %44 = vector.broadcast %43 : vector<4x1xf32> to vector<4x8xf32>
    %45 = arith.subf %41, %44 : vector<4x8xf32>
    %46 = math.exp %45 : vector<4x8xf32>
    %cst_20 = arith.constant dense<0.000000e+00> : vector<4xf32>
    %47 = vector.multi_reduction <add>, %46, %cst_20 [1] : vector<4x8xf32> to vector<4xf32>
    %48 = vector.shape_cast %47 : vector<4xf32> to vector<4x1xf32>
    %49 = tpu.reciprocal %48 {approx = true} : vector<4x1xf32> -> vector<4x1xf32>
    %50 = vector.broadcast %49 : vector<4x1xf32> to vector<4x8xf32>
    %51 = arith.mulf %46, %50 : vector<4x8xf32>
    %52 = arith.truncf %51 : vector<4x8xf32> to vector<4x8xbf16>
    %cst_21 = arith.constant dense<0.000000e+00> : vector<4x8xf32>
    %53 = tpu.matmul %52, %40, %cst_21 {dimension_numbers = #tpu.dot_dimension_numbers<[1], [0], [0], [1], [0, 0, 1, 1], [], []>} : vector<4x8xbf16>, vector<8x8xbf16>, vector<4x8xf32> -> vector<4x8xf32>
    %54 = arith.truncf %53 : vector<4x8xf32> to vector<4x8xbf16>
    %c0_22 = arith.constant 0 : index
    %c0_23 = arith.constant 0 : index
    %c8 = arith.constant 8 : index
    %55 = vector.load %arg5[%c0_22, %c0_23, %c8] : memref<1x4x32xbf16, #tpu.memory_space<vmem>>, vector<1x4x8xbf16>
    %56 = vector.shape_cast %55 : vector<1x4x8xbf16> to vector<4x8xbf16>
    %57 = vector.shape_cast %54 : vector<4x8xbf16> to vector<1x4x8xbf16>
    tpu.vector_store %arg5[%c0_22, %c0_23, %c8], %57 {strides = array<i32>} : memref<1x4x32xbf16, #tpu.memory_space<vmem>>, vector<1x4x8xbf16>,
    %58 = vector.extract_strided_slice %7 {offsets = [0, 16], sizes = [4, 8], strides = [1, 1]} : vector<4x32xf32> to vector<4x8xf32>
    %cst_24 = arith.constant 0.353553385 : f32
    %59 = vector.broadcast %cst_24 : f32 to vector<4x8xf32>
    %60 = arith.mulf %58, %59 : vector<4x8xf32>
    %61 = arith.truncf %60 : vector<4x8xf32> to vector<4x8xbf16>
    %62 = vector.extract_strided_slice %10 {offsets = [0, 16], sizes = [8, 8], strides = [1, 1]} : vector<8x32xbf16> to vector<8x8xbf16>
    %63 = vector.extract_strided_slice %11 {offsets = [0, 16], sizes = [8, 8], strides = [1, 1]} : vector<8x32xbf16> to vector<8x8xbf16>
    %cst_25 = arith.constant dense<0.000000e+00> : vector<4x8xf32>
    %64 = tpu.matmul %61, %62, %cst_25 {dimension_numbers = #tpu.dot_dimension_numbers<[1], [1], [0], [0], [0, 0, 1, 0], [], []>} : vector<4x8xbf16>, vector<8x8xbf16>, vector<4x8xf32> -> vector<4x8xf32>
    %cst_26 = arith.constant dense<0xFF800000> : vector<4xf32>
    %65 = vector.multi_reduction <maximumf>, %64, %cst_26 [1] : vector<4x8xf32> to vector<4xf32>
    %66 = vector.shape_cast %65 : vector<4xf32> to vector<4x1xf32>
    %67 = vector.broadcast %66 : vector<4x1xf32> to vector<4x8xf32>
    %68 = arith.subf %64, %67 : vector<4x8xf32>
    %69 = math.exp %68 : vector<4x8xf32>
    %cst_27 = arith.constant dense<0.000000e+00> : vector<4xf32>
    %70 = vector.multi_reduction <add>, %69, %cst_27 [1] : vector<4x8xf32> to vector<4xf32>
    %71 = vector.shape_cast %70 : vector<4xf32> to vector<4x1xf32>
    %72 = tpu.reciprocal %71 {approx = true} : vector<4x1xf32> -> vector<4x1xf32>
    %73 = vector.broadcast %72 : vector<4x1xf32> to vector<4x8xf32>
    %74 = arith.mulf %69, %73 : vector<4x8xf32>
    %75 = arith.truncf %74 : vector<4x8xf32> to vector<4x8xbf16>
    %cst_28 = arith.constant dense<0.000000e+00> : vector<4x8xf32>
    %76 = tpu.matmul %75, %63, %cst_28 {dimension_numbers = #tpu.dot_dimension_numbers<[1], [0], [0], [1], [0, 0, 1, 1], [], []>} : vector<4x8xbf16>, vector<8x8xbf16>, vector<4x8xf32> -> vector<4x8xf32>
    %77 = arith.truncf %76 : vector<4x8xf32> to vector<4x8xbf16>
    %c0_29 = arith.constant 0 : index
    %c0_30 = arith.constant 0 : index
    %c16 = arith.constant 16 : index
    %78 = vector.load %arg5[%c0_29, %c0_30, %c16] : memref<1x4x32xbf16, #tpu.memory_space<vmem>>, vector<1x4x8xbf16>
    %79 = vector.shape_cast %78 : vector<1x4x8xbf16> to vector<4x8xbf16>
    %80 = vector.shape_cast %77 : vector<4x8xbf16> to vector<1x4x8xbf16>
    tpu.vector_store %arg5[%c0_29, %c0_30, %c16], %80 {strides = array<i32>} : memref<1x4x32xbf16, #tpu.memory_space<vmem>>, vector<1x4x8xbf16>,
    %81 = vector.extract_strided_slice %7 {offsets = [0, 24], sizes = [4, 8], strides = [1, 1]} : vector<4x32xf32> to vector<4x8xf32>
    %cst_31 = arith.constant 0.353553385 : f32
    %82 = vector.broadcast %cst_31 : f32 to vector<4x8xf32>
    %83 = arith.mulf %81, %82 : vector<4x8xf32>
    %84 = arith.truncf %83 : vector<4x8xf32> to vector<4x8xbf16>
    %85 = vector.extract_strided_slice %10 {offsets = [0, 24], sizes = [8, 8], strides = [1, 1]} : vector<8x32xbf16> to vector<8x8xbf16>
    %86 = vector.extract_strided_slice %11 {offsets = [0, 24], sizes = [8, 8], strides = [1, 1]} : vector<8x32xbf16> to vector<8x8xbf16>
    %cst_32 = arith.constant dense<0.000000e+00> : vector<4x8xf32>
    %87 = tpu.matmul %84, %85, %cst_32 {dimension_numbers = #tpu.dot_dimension_numbers<[1], [1], [0], [0], [0, 0, 1, 0], [], []>} : vector<4x8xbf16>, vector<8x8xbf16>, vector<4x8xf32> -> vector<4x8xf32>
    %cst_33 = arith.constant dense<0xFF800000> : vector<4xf32>
    %88 = vector.multi_reduction <maximumf>, %87, %cst_33 [1] : vector<4x8xf32> to vector<4xf32>
    %89 = vector.shape_cast %88 : vector<4xf32> to vector<4x1xf32>
    %90 = vector.broadcast %89 : vector<4x1xf32> to vector<4x8xf32>
    %91 = arith.subf %87, %90 : vector<4x8xf32>
    %92 = math.exp %91 : vector<4x8xf32>
    %cst_34 = arith.constant dense<0.000000e+00> : vector<4xf32>
    %93 = vector.multi_reduction <add>, %92, %cst_34 [1] : vector<4x8xf32> to vector<4xf32>
    %94 = vector.shape_cast %93 : vector<4xf32> to vector<4x1xf32>
    %95 = tpu.reciprocal %94 {approx = true} : vector<4x1xf32> -> vector<4x1xf32>
    %96 = vector.broadcast %95 : vector<4x1xf32> to vector<4x8xf32>
    %97 = arith.mulf %92, %96 : vector<4x8xf32>
    %98 = arith.truncf %97 : vector<4x8xf32> to vector<4x8xbf16>
    %cst_35 = arith.constant dense<0.000000e+00> : vector<4x8xf32>
    %99 = tpu.matmul %98, %86, %cst_35 {dimension_numbers = #tpu.dot_dimension_numbers<[1], [0], [0], [1], [0, 0, 1, 1], [], []>} : vector<4x8xbf16>, vector<8x8xbf16>, vector<4x8xf32> -> vector<4x8xf32>
    %100 = arith.truncf %99 : vector<4x8xf32> to vector<4x8xbf16>
    %c0_36 = arith.constant 0 : index
    %c0_37 = arith.constant 0 : index
    %c24 = arith.constant 24 : index
    %101 = vector.load %arg5[%c0_36, %c0_37, %c24] : memref<1x4x32xbf16, #tpu.memory_space<vmem>>, vector<1x4x8xbf16>
    %102 = vector.shape_cast %101 : vector<1x4x8xbf16> to vector<4x8xbf16>
    %103 = vector.shape_cast %100 : vector<4x8xbf16> to vector<1x4x8xbf16>
    tpu.vector_store %arg5[%c0_36, %c0_37, %c24], %103 {strides = array<i32>} : memref<1x4x32xbf16, #tpu.memory_space<vmem>>, vector<1x4x8xbf16>,
    return
  }
  func.func @transform_0(%arg0: i32) -> (i32, i32, i32) {
    %c0_i32 = arith.constant 0 : i32
    %c0_i32_0 = arith.constant 0 : i32
    %c0_i32_1 = arith.constant 0 : i32
    return %arg0, %c0_i32, %c0_i32_0 : i32, i32, i32
  }
  func.func @transform_1(%arg0: i32) -> (i32, i32) {
    %c0_i32 = arith.constant 0 : i32
    %c0_i32_0 = arith.constant 0 : i32
    %c0_i32_1 = arith.constant 0 : i32
    return %c0_i32, %c0_i32_0 : i32, i32
  }
  func.func @transform_2(%arg0: i32) -> (i32, i32) {
    %c0_i32 = arith.constant 0 : i32
    %c0_i32_0 = arith.constant 0 : i32
    %c0_i32_1 = arith.constant 0 : i32
    return %c0_i32, %c0_i32_0 : i32, i32
  }
  func.func @transform_3(%arg0: i32) -> (i32, i32, i32) {
    %c0_i32 = arith.constant 0 : i32
    %c0_i32_0 = arith.constant 0 : i32
    %c0_i32_1 = arith.constant 0 : i32
    %c0_i32_2 = arith.constant 0 : i32
    return %c0_i32, %c0_i32_0, %c0_i32_1 : i32, i32, i32
  }
  func.func @transform_4(%arg0: i32) -> (i32, i32, i32) {
    %c0_i32 = arith.constant 0 : i32
    %c0_i32_0 = arith.constant 0 : i32
    %c0_i32_1 = arith.constant 0 : i32
    return %arg0, %c0_i32, %c0_i32_0 : i32, i32, i32
  }
}

module attributes {stable_mosaic.version = 11 : i64} {
  func.func @_add_ln_kernel(%arg0: i32, %arg1: memref<1x4x32xf32, #tpu.memory_space<vmem>>, %arg2: memref<1x4x32xf32, #tpu.memory_space<vmem>>, %arg3: memref<1x1x32xf32, #tpu.memory_space<vmem>>, %arg4: memref<1x1x32xf32, #tpu.memory_space<vmem>>, %arg5: memref<1x4x32xf32, #tpu.memory_space<vmem>>, %arg6: memref<1x4x32xbf16, #tpu.memory_space<vmem>>) attributes {dimension_semantics = [#tpu.dimension_semantics<parallel>], iteration_bounds = array<i64: 2>, scalar_prefetch = 0 : i64, scratch_operands = 0 : i64, tpu.core_type = #tpu.core_type<tc>, window_params = [{transform_indices = @transform_0, window_bounds = array<i64: 1, 4, 32>}, {pipeline_mode = #tpu.pipeline_mode<synchronous>, transform_indices = @transform_1, window_bounds = array<i64: 1, 4, 32>}, {pipeline_mode = #tpu.pipeline_mode<synchronous>, transform_indices = @transform_2, window_bounds = array<i64: 1, 1, 32>}, {pipeline_mode = #tpu.pipeline_mode<synchronous>, transform_indices = @transform_3, window_bounds = array<i64: 1, 1, 32>}, {transform_indices = @transform_4, window_bounds = array<i64: 1, 4, 32>}, {transform_indices = @transform_5, window_bounds = array<i64: 1, 4, 32>}]} {
    %c0 = arith.constant 0 : index
    %c0_0 = arith.constant 0 : index
    %c0_1 = arith.constant 0 : index
    %0 = vector.load %arg1[%c0, %c0_0, %c0_1] : memref<1x4x32xf32, #tpu.memory_space<vmem>>, vector<1x4x32xf32>
    %1 = vector.shape_cast %0 : vector<1x4x32xf32> to vector<4x32xf32>
    %c0_2 = arith.constant 0 : index
    %c0_3 = arith.constant 0 : index
    %c0_4 = arith.constant 0 : index
    %2 = vector.load %arg2[%c0_2, %c0_3, %c0_4] : memref<1x4x32xf32, #tpu.memory_space<vmem>>, vector<1x4x32xf32>
    %3 = vector.shape_cast %2 : vector<1x4x32xf32> to vector<4x32xf32>
    %4 = arith.addf %1, %3 : vector<4x32xf32>
    %c0_5 = arith.constant 0 : index
    %c0_6 = arith.constant 0 : index
    %c0_7 = arith.constant 0 : index
    %5 = vector.load %arg5[%c0_5, %c0_6, %c0_7] : memref<1x4x32xf32, #tpu.memory_space<vmem>>, vector<1x4x32xf32>
    %6 = vector.shape_cast %5 : vector<1x4x32xf32> to vector<4x32xf32>
    %7 = vector.shape_cast %4 : vector<4x32xf32> to vector<1x4x32xf32>
    tpu.vector_store %arg5[%c0_5, %c0_6, %c0_7], %7 {strides = array<i32>} : memref<1x4x32xf32, #tpu.memory_space<vmem>>, vector<1x4x32xf32>,
    %cst = arith.constant dense<0.000000e+00> : vector<4xf32>
    %8 = vector.multi_reduction <add>, %4, %cst [1] : vector<4x32xf32> to vector<4xf32>
    %9 = vector.shape_cast %8 : vector<4xf32> to vector<4x1xf32>
    %cst_8 = arith.constant 3.200000e+01 : f32
    %10 = vector.broadcast %cst_8 : f32 to vector<4x1xf32>
    %11 = arith.divf %9, %10 : vector<4x1xf32>
    %12 = vector.broadcast %11 : vector<4x1xf32> to vector<4x32xf32>
    %13 = arith.subf %4, %12 : vector<4x32xf32>
    %14 = arith.mulf %13, %13 : vector<4x32xf32>
    %cst_9 = arith.constant dense<0.000000e+00> : vector<4xf32>
    %15 = vector.multi_reduction <add>, %14, %cst_9 [1] : vector<4x32xf32> to vector<4xf32>
    %16 = vector.shape_cast %15 : vector<4xf32> to vector<4x1xf32>
    %cst_10 = arith.constant 3.200000e+01 : f32
    %17 = vector.broadcast %cst_10 : f32 to vector<4x1xf32>
    %18 = arith.divf %16, %17 : vector<4x1xf32>
    %19 = vector.broadcast %11 : vector<4x1xf32> to vector<4x32xf32>
    %20 = arith.subf %4, %19 : vector<4x32xf32>
    %cst_11 = arith.constant 9.99999974E-6 : f32
    %21 = vector.broadcast %cst_11 : f32 to vector<4x1xf32>
    %22 = arith.addf %18, %21 : vector<4x1xf32>
    %23 = math.rsqrt %22 : vector<4x1xf32>
    %24 = vector.broadcast %23 : vector<4x1xf32> to vector<4x32xf32>
    %25 = arith.mulf %20, %24 : vector<4x32xf32>
    %c0_12 = arith.constant 0 : index
    %c0_13 = arith.constant 0 : index
    %c0_14 = arith.constant 0 : index
    %26 = vector.load %arg3[%c0_12, %c0_13, %c0_14] : memref<1x1x32xf32, #tpu.memory_space<vmem>>, vector<1x1x32xf32>
    %27 = vector.shape_cast %26 : vector<1x1x32xf32> to vector<1x32xf32>
    %28 = vector.broadcast %27 : vector<1x32xf32> to vector<4x32xf32>
    %29 = arith.mulf %25, %28 : vector<4x32xf32>
    %c0_15 = arith.constant 0 : index
    %c0_16 = arith.constant 0 : index
    %c0_17 = arith.constant 0 : index
    %30 = vector.load %arg4[%c0_15, %c0_16, %c0_17] : memref<1x1x32xf32, #tpu.memory_space<vmem>>, vector<1x1x32xf32>
    %31 = vector.shape_cast %30 : vector<1x1x32xf32> to vector<1x32xf32>
    %32 = vector.broadcast %31 : vector<1x32xf32> to vector<4x32xf32>
    %33 = arith.addf %29, %32 : vector<4x32xf32>
    %34 = arith.truncf %33 : vector<4x32xf32> to vector<4x32xbf16>
    %c0_18 = arith.constant 0 : index
    %c0_19 = arith.constant 0 : index
    %c0_20 = arith.constant 0 : index
    %35 = vector.load %arg6[%c0_18, %c0_19, %c0_20] : memref<1x4x32xbf16, #tpu.memory_space<vmem>>, vector<1x4x32xbf16>
    %36 = vector.shape_cast %35 : vector<1x4x32xbf16> to vector<4x32xbf16>
    %37 = vector.shape_cast %34 : vector<4x32xbf16> to vector<1x4x32xbf16>
    tpu.vector_store %arg6[%c0_18, %c0_19, %c0_20], %37 {strides = array<i32>} : memref<1x4x32xbf16, #tpu.memory_space<vmem>>, vector<1x4x32xbf16>,
    return
  }
  func.func @transform_0(%arg0: i32) -> (i32, i32, i32) {
    %c0_i32 = arith.constant 0 : i32
    %c0_i32_0 = arith.constant 0 : i32
    %c0_i32_1 = arith.constant 0 : i32
    return %arg0, %c0_i32, %c0_i32_0 : i32, i32, i32
  }
  func.func @transform_1(%arg0: i32) -> (i32, i32, i32) {
    %c0_i32 = arith.constant 0 : i32
    %c0_i32_0 = arith.constant 0 : i32
    %c0_i32_1 = arith.constant 0 : i32
    %c0_i32_2 = arith.constant 0 : i32
    return %c0_i32, %c0_i32_0, %c0_i32_1 : i32, i32, i32
  }
  func.func @transform_2(%arg0: i32) -> (i32, i32, i32) {
    %c0_i32 = arith.constant 0 : i32
    %c0_i32_0 = arith.constant 0 : i32
    %c0_i32_1 = arith.constant 0 : i32
    %c0_i32_2 = arith.constant 0 : i32
    return %c0_i32, %c0_i32_0, %c0_i32_1 : i32, i32, i32
  }
  func.func @transform_3(%arg0: i32) -> (i32, i32, i32) {
    %c0_i32 = arith.constant 0 : i32
    %c0_i32_0 = arith.constant 0 : i32
    %c0_i32_1 = arith.constant 0 : i32
    %c0_i32_2 = arith.constant 0 : i32
    return %c0_i32, %c0_i32_0, %c0_i32_1 : i32, i32, i32
  }
  func.func @transform_4(%arg0: i32) -> (i32, i32, i32) {
    %c0_i32 = arith.constant 0 : i32
    %c0_i32_0 = arith.constant 0 : i32
    %c0_i32_1 = arith.constant 0 : i32
    return %arg0, %c0_i32, %c0_i32_0 : i32, i32, i32
  }
  func.func @transform_5(%arg0: i32) -> (i32, i32, i32) {
    %c0_i32 = arith.constant 0 : i32
    %c0_i32_0 = arith.constant 0 : i32
    %c0_i32_1 = arith.constant 0 : i32
    return %arg0, %c0_i32, %c0_i32_0 : i32, i32, i32
  }
}

module attributes {stable_mosaic.version = 11 : i64} {
  func.func @_linear_res_ln_1k_kernel(%arg0: i32, %arg1: memref<8x32xbf16, #tpu.memory_space<vmem>>, %arg2: memref<32x32xbf16, #tpu.memory_space<vmem>>, %arg3: memref<1x32xf32, #tpu.memory_space<vmem>>, %arg4: memref<8x32xf32, #tpu.memory_space<vmem>>, %arg5: memref<1x32xf32, #tpu.memory_space<vmem>>, %arg6: memref<1x32xf32, #tpu.memory_space<vmem>>, %arg7: memref<8x32xf32, #tpu.memory_space<vmem>>, %arg8: memref<8x32xbf16, #tpu.memory_space<vmem>>) attributes {dimension_semantics = [#tpu.dimension_semantics<parallel>], iteration_bounds = array<i64: 1>, scalar_prefetch = 0 : i64, scratch_operands = 0 : i64, tpu.core_type = #tpu.core_type<tc>, window_params = [{transform_indices = @transform_0, window_bounds = array<i64: 8, 32>}, {pipeline_mode = #tpu.pipeline_mode<synchronous>, transform_indices = @transform_1, window_bounds = array<i64: 32, 32>}, {pipeline_mode = #tpu.pipeline_mode<synchronous>, transform_indices = @transform_2, window_bounds = array<i64: 1, 32>}, {transform_indices = @transform_3, window_bounds = array<i64: 8, 32>}, {pipeline_mode = #tpu.pipeline_mode<synchronous>, transform_indices = @transform_4, window_bounds = array<i64: 1, 32>}, {pipeline_mode = #tpu.pipeline_mode<synchronous>, transform_indices = @transform_5, window_bounds = array<i64: 1, 32>}, {transform_indices = @transform_6, window_bounds = array<i64: 8, 32>}, {transform_indices = @transform_7, window_bounds = array<i64: 8, 32>}]} {
    %c0 = arith.constant 0 : index
    %c0_0 = arith.constant 0 : index
    %0 = vector.load %arg1[%c0, %c0_0] : memref<8x32xbf16, #tpu.memory_space<vmem>>, vector<8x32xbf16>
    %c0_1 = arith.constant 0 : index
    %c0_2 = arith.constant 0 : index
    %1 = vector.load %arg2[%c0_1, %c0_2] : memref<32x32xbf16, #tpu.memory_space<vmem>>, vector<32x32xbf16>
    %cst = arith.constant dense<0.000000e+00> : vector<8x32xf32>
    %2 = tpu.matmul %0, %1, %cst {dimension_numbers = #tpu.dot_dimension_numbers<[1], [0], [0], [1], [0, 0, 1, 1], [], []>} : vector<8x32xbf16>, vector<32x32xbf16>, vector<8x32xf32> -> vector<8x32xf32>
    %c0_3 = arith.constant 0 : index
    %c0_4 = arith.constant 0 : index
    %3 = vector.load %arg3[%c0_3, %c0_4] : memref<1x32xf32, #tpu.memory_space<vmem>>, vector<1x32xf32>
    %4 = vector.broadcast %3 : vector<1x32xf32> to vector<8x32xf32>
    %5 = arith.addf %2, %4 : vector<8x32xf32>
    %c0_5 = arith.constant 0 : index
    %c0_6 = arith.constant 0 : index
    %6 = vector.load %arg4[%c0_5, %c0_6] : memref<8x32xf32, #tpu.memory_space<vmem>>, vector<8x32xf32>
    %7 = arith.addf %5, %6 : vector<8x32xf32>
    %c0_7 = arith.constant 0 : index
    %c0_8 = arith.constant 0 : index
    %8 = vector.load %arg7[%c0_7, %c0_8] : memref<8x32xf32, #tpu.memory_space<vmem>>, vector<8x32xf32>
    tpu.vector_store %arg7[%c0_7, %c0_8], %7 {strides = array<i32>} : memref<8x32xf32, #tpu.memory_space<vmem>>, vector<8x32xf32>,
    %cst_9 = arith.constant dense<0.000000e+00> : vector<8xf32>
    %9 = vector.multi_reduction <add>, %7, %cst_9 [1] : vector<8x32xf32> to vector<8xf32>
    %10 = vector.shape_cast %9 : vector<8xf32> to vector<8x1xf32>
    %cst_10 = arith.constant 3.200000e+01 : f32
    %11 = vector.broadcast %cst_10 : f32 to vector<8x1xf32>
    %12 = arith.divf %10, %11 : vector<8x1xf32>
    %13 = vector.broadcast %12 : vector<8x1xf32> to vector<8x32xf32>
    %14 = arith.subf %7, %13 : vector<8x32xf32>
    %15 = arith.mulf %14, %14 : vector<8x32xf32>
    %cst_11 = arith.constant dense<0.000000e+00> : vector<8xf32>
    %16 = vector.multi_reduction <add>, %15, %cst_11 [1] : vector<8x32xf32> to vector<8xf32>
    %17 = vector.shape_cast %16 : vector<8xf32> to vector<8x1xf32>
    %cst_12 = arith.constant 3.200000e+01 : f32
    %18 = vector.broadcast %cst_12 : f32 to vector<8x1xf32>
    %19 = arith.divf %17, %18 : vector<8x1xf32>
    %20 = vector.broadcast %12 : vector<8x1xf32> to vector<8x32xf32>
    %21 = arith.subf %7, %20 : vector<8x32xf32>
    %cst_13 = arith.constant 9.99999974E-6 : f32
    %22 = vector.broadcast %cst_13 : f32 to vector<8x1xf32>
    %23 = arith.addf %19, %22 : vector<8x1xf32>
    %24 = math.rsqrt %23 : vector<8x1xf32>
    %25 = vector.broadcast %24 : vector<8x1xf32> to vector<8x32xf32>
    %26 = arith.mulf %21, %25 : vector<8x32xf32>
    %c0_14 = arith.constant 0 : index
    %c0_15 = arith.constant 0 : index
    %27 = vector.load %arg5[%c0_14, %c0_15] : memref<1x32xf32, #tpu.memory_space<vmem>>, vector<1x32xf32>
    %28 = vector.broadcast %27 : vector<1x32xf32> to vector<8x32xf32>
    %29 = arith.mulf %26, %28 : vector<8x32xf32>
    %c0_16 = arith.constant 0 : index
    %c0_17 = arith.constant 0 : index
    %30 = vector.load %arg6[%c0_16, %c0_17] : memref<1x32xf32, #tpu.memory_space<vmem>>, vector<1x32xf32>
    %31 = vector.broadcast %30 : vector<1x32xf32> to vector<8x32xf32>
    %32 = arith.addf %29, %31 : vector<8x32xf32>
    %33 = arith.truncf %32 : vector<8x32xf32> to vector<8x32xbf16>
    %c0_18 = arith.constant 0 : index
    %c0_19 = arith.constant 0 : index
    %34 = vector.load %arg8[%c0_18, %c0_19] : memref<8x32xbf16, #tpu.memory_space<vmem>>, vector<8x32xbf16>
    tpu.vector_store %arg8[%c0_18, %c0_19], %33 {strides = array<i32>} : memref<8x32xbf16, #tpu.memory_space<vmem>>, vector<8x32xbf16>,
    return
  }
  func.func @transform_0(%arg0: i32) -> (i32, i32) {
    %c0_i32 = arith.constant 0 : i32
    %c0_i32_0 = arith.constant 0 : i32
    return %arg0, %c0_i32 : i32, i32
  }
  func.func @transform_1(%arg0: i32) -> (i32, i32) {
    %c0_i32 = arith.constant 0 : i32
    %c0_i32_0 = arith.constant 0 : i32
    %c0_i32_1 = arith.constant 0 : i32
    return %c0_i32, %c0_i32_0 : i32, i32
  }
  func.func @transform_2(%arg0: i32) -> (i32, i32) {
    %c0_i32 = arith.constant 0 : i32
    %c0_i32_0 = arith.constant 0 : i32
    %c0_i32_1 = arith.constant 0 : i32
    return %c0_i32, %c0_i32_0 : i32, i32
  }
  func.func @transform_3(%arg0: i32) -> (i32, i32) {
    %c0_i32 = arith.constant 0 : i32
    %c0_i32_0 = arith.constant 0 : i32
    return %arg0, %c0_i32 : i32, i32
  }
  func.func @transform_4(%arg0: i32) -> (i32, i32) {
    %c0_i32 = arith.constant 0 : i32
    %c0_i32_0 = arith.constant 0 : i32
    %c0_i32_1 = arith.constant 0 : i32
    return %c0_i32, %c0_i32_0 : i32, i32
  }
  func.func @transform_5(%arg0: i32) -> (i32, i32) {
    %c0_i32 = arith.constant 0 : i32
    %c0_i32_0 = arith.constant 0 : i32
    %c0_i32_1 = arith.constant 0 : i32
    return %c0_i32, %c0_i32_0 : i32, i32
  }
  func.func @transform_6(%arg0: i32) -> (i32, i32) {
    %c0_i32 = arith.constant 0 : i32
    %c0_i32_0 = arith.constant 0 : i32
    return %arg0, %c0_i32 : i32, i32
  }
  func.func @transform_7(%arg0: i32) -> (i32, i32) {
    %c0_i32 = arith.constant 0 : i32
    %c0_i32_0 = arith.constant 0 : i32
    return %arg0, %c0_i32 : i32, i32
  }
}

module attributes {stable_mosaic.version = 11 : i64} {
  func.func @_fused_self_attn_kernel(%arg0: i32, %arg1: memref<1x4x32xbf16, #tpu.memory_space<vmem>>, %arg2: memref<32x96xbf16, #tpu.memory_space<vmem>>, %arg3: memref<1x96xf32, #tpu.memory_space<vmem>>, %arg4: memref<1x4x32xbf16, #tpu.memory_space<vmem>>) attributes {dimension_semantics = [#tpu.dimension_semantics<parallel>], iteration_bounds = array<i64: 2>, scalar_prefetch = 0 : i64, scratch_operands = 0 : i64, tpu.core_type = #tpu.core_type<tc>, window_params = [{transform_indices = @transform_0, window_bounds = array<i64: 1, 4, 32>}, {pipeline_mode = #tpu.pipeline_mode<synchronous>, transform_indices = @transform_1, window_bounds = array<i64: 32, 96>}, {pipeline_mode = #tpu.pipeline_mode<synchronous>, transform_indices = @transform_2, window_bounds = array<i64: 1, 96>}, {transform_indices = @transform_3, window_bounds = array<i64: 1, 4, 32>}]} {
    %c0 = arith.constant 0 : index
    %c0_0 = arith.constant 0 : index
    %c0_1 = arith.constant 0 : index
    %0 = vector.load %arg1[%c0, %c0_0, %c0_1] : memref<1x4x32xbf16, #tpu.memory_space<vmem>>, vector<1x4x32xbf16>
    %1 = vector.shape_cast %0 : vector<1x4x32xbf16> to vector<4x32xbf16>
    %c0_2 = arith.constant 0 : index
    %c0_3 = arith.constant 0 : index
    %2 = vector.load %arg2[%c0_2, %c0_3] : memref<32x96xbf16, #tpu.memory_space<vmem>>, vector<32x96xbf16>
    %cst = arith.constant dense<0.000000e+00> : vector<4x96xf32>
    %3 = tpu.matmul %1, %2, %cst {dimension_numbers = #tpu.dot_dimension_numbers<[1], [0], [0], [1], [0, 0, 1, 1], [], []>} : vector<4x32xbf16>, vector<32x96xbf16>, vector<4x96xf32> -> vector<4x96xf32>
    %c0_4 = arith.constant 0 : index
    %c0_5 = arith.constant 0 : index
    %4 = vector.load %arg3[%c0_4, %c0_5] : memref<1x96xf32, #tpu.memory_space<vmem>>, vector<1x96xf32>
    %5 = vector.broadcast %4 : vector<1x96xf32> to vector<4x96xf32>
    %6 = arith.addf %3, %5 : vector<4x96xf32>
    %7 = vector.extract_strided_slice %6 {offsets = [0, 0], sizes = [4, 32], strides = [1, 1]} : vector<4x96xf32> to vector<4x32xf32>
    %8 = vector.extract_strided_slice %6 {offsets = [0, 32], sizes = [4, 32], strides = [1, 1]} : vector<4x96xf32> to vector<4x32xf32>
    %9 = vector.extract_strided_slice %6 {offsets = [0, 64], sizes = [4, 32], strides = [1, 1]} : vector<4x96xf32> to vector<4x32xf32>
    %10 = tpu.iota {dimensions = array<i32: 0>} : vector<4x4xi32>
    %11 = tpu.iota {dimensions = array<i32: 1>} : vector<4x4xi32>
    %12 = arith.cmpi sle, %11, %10 : vector<4x4xi32>
    %cst_6 = arith.constant 0.000000e+00 : f32
    %cst_7 = arith.constant -1.70141173E+38 : f32
    %13 = vector.broadcast %cst_6 : f32 to vector<4x4xf32>
    %14 = vector.broadcast %cst_7 : f32 to vector<4x4xf32>
    %15 = arith.select %12, %13, %14 : vector<4x4xi1>, vector<4x4xf32>
    %16 = vector.extract_strided_slice %7 {offsets = [0, 0], sizes = [4, 8], strides = [1, 1]} : vector<4x32xf32> to vector<4x8xf32>
    %cst_8 = arith.constant 0.353553385 : f32
    %17 = vector.broadcast %cst_8 : f32 to vector<4x8xf32>
    %18 = arith.mulf %16, %17 : vector<4x8xf32>
    %19 = arith.truncf %18 : vector<4x8xf32> to vector<4x8xbf16>
    %20 = vector.extract_strided_slice %8 {offsets = [0, 0], sizes = [4, 8], strides = [1, 1]} : vector<4x32xf32> to vector<4x8xf32>
    %21 = arith.truncf %20 : vector<4x8xf32> to vector<4x8xbf16>
    %22 = vector.extract_strided_slice %9 {offsets = [0, 0], sizes = [4, 8], strides = [1, 1]} : vector<4x32xf32> to vector<4x8xf32>
    %23 = arith.truncf %22 : vector<4x8xf32> to vector<4x8xbf16>
    %cst_9 = arith.constant dense<0.000000e+00> : vector<4x4xf32>
    %24 = tpu.matmul %19, %21, %cst_9 {dimension_numbers = #tpu.dot_dimension_numbers<[1], [1], [0], [0], [0, 0, 1, 0], [], []>} : vector<4x8xbf16>, vector<4x8xbf16>, vector<4x4xf32> -> vector<4x4xf32>
    %25 = arith.addf %24, %15 : vector<4x4xf32>
    %cst_10 = arith.constant dense<0xFF800000> : vector<4xf32>
    %26 = vector.multi_reduction <maximumf>, %25, %cst_10 [1] : vector<4x4xf32> to vector<4xf32>
    %27 = vector.shape_cast %26 : vector<4xf32> to vector<4x1xf32>
    %28 = vector.broadcast %27 : vector<4x1xf32> to vector<4x4xf32>
    %29 = arith.subf %25, %28 : vector<4x4xf32>
    %30 = math.exp %29 : vector<4x4xf32>
    %cst_11 = arith.constant dense<0.000000e+00> : vector<4xf32>
    %31 = vector.multi_reduction <add>, %30, %cst_11 [1] : vector<4x4xf32> to vector<4xf32>
    %32 = vector.shape_cast %31 : vector<4xf32> to vector<4x1xf32>
    %33 = tpu.reciprocal %32 {approx = true} : vector<4x1xf32> -> vector<4x1xf32>
    %34 = vector.broadcast %33 : vector<4x1xf32> to vector<4x4xf32>
    %35 = arith.mulf %30, %34 : vector<4x4xf32>
    %36 = arith.truncf %35 : vector<4x4xf32> to vector<4x4xbf16>
    %cst_12 = arith.constant dense<0.000000e+00> : vector<4x8xf32>
    %37 = tpu.matmul %36, %23, %cst_12 {dimension_numbers = #tpu.dot_dimension_numbers<[1], [0], [0], [1], [0, 0, 1, 1], [], []>} : vector<4x4xbf16>, vector<4x8xbf16>, vector<4x8xf32> -> vector<4x8xf32>
    %38 = arith.truncf %37 : vector<4x8xf32> to vector<4x8xbf16>
    %c0_13 = arith.constant 0 : index
    %c0_14 = arith.constant 0 : index
    %c0_15 = arith.constant 0 : index
    %39 = vector.load %arg4[%c0_13, %c0_14, %c0_15] : memref<1x4x32xbf16, #tpu.memory_space<vmem>>, vector<1x4x8xbf16>
    %40 = vector.shape_cast %39 : vector<1x4x8xbf16> to vector<4x8xbf16>
    %41 = vector.shape_cast %38 : vector<4x8xbf16> to vector<1x4x8xbf16>
    tpu.vector_store %arg4[%c0_13, %c0_14, %c0_15], %41 {strides = array<i32>} : memref<1x4x32xbf16, #tpu.memory_space<vmem>>, vector<1x4x8xbf16>,
    %42 = vector.extract_strided_slice %7 {offsets = [0, 8], sizes = [4, 8], strides = [1, 1]} : vector<4x32xf32> to vector<4x8xf32>
    %cst_16 = arith.constant 0.353553385 : f32
    %43 = vector.broadcast %cst_16 : f32 to vector<4x8xf32>
    %44 = arith.mulf %42, %43 : vector<4x8xf32>
    %45 = arith.truncf %44 : vector<4x8xf32> to vector<4x8xbf16>
    %46 = vector.extract_strided_slice %8 {offsets = [0, 8], sizes = [4, 8], strides = [1, 1]} : vector<4x32xf32> to vector<4x8xf32>
    %47 = arith.truncf %46 : vector<4x8xf32> to vector<4x8xbf16>
    %48 = vector.extract_strided_slice %9 {offsets = [0, 8], sizes = [4, 8], strides = [1, 1]} : vector<4x32xf32> to vector<4x8xf32>
    %49 = arith.truncf %48 : vector<4x8xf32> to vector<4x8xbf16>
    %cst_17 = arith.constant dense<0.000000e+00> : vector<4x4xf32>
    %50 = tpu.matmul %45, %47, %cst_17 {dimension_numbers = #tpu.dot_dimension_numbers<[1], [1], [0], [0], [0, 0, 1, 0], [], []>} : vector<4x8xbf16>, vector<4x8xbf16>, vector<4x4xf32> -> vector<4x4xf32>
    %51 = arith.addf %50, %15 : vector<4x4xf32>
    %cst_18 = arith.constant dense<0xFF800000> : vector<4xf32>
    %52 = vector.multi_reduction <maximumf>, %51, %cst_18 [1] : vector<4x4xf32> to vector<4xf32>
    %53 = vector.shape_cast %52 : vector<4xf32> to vector<4x1xf32>
    %54 = vector.broadcast %53 : vector<4x1xf32> to vector<4x4xf32>
    %55 = arith.subf %51, %54 : vector<4x4xf32>
    %56 = math.exp %55 : vector<4x4xf32>
    %cst_19 = arith.constant dense<0.000000e+00> : vector<4xf32>
    %57 = vector.multi_reduction <add>, %56, %cst_19 [1] : vector<4x4xf32> to vector<4xf32>
    %58 = vector.shape_cast %57 : vector<4xf32> to vector<4x1xf32>
    %59 = tpu.reciprocal %58 {approx = true} : vector<4x1xf32> -> vector<4x1xf32>
    %60 = vector.broadcast %59 : vector<4x1xf32> to vector<4x4xf32>
    %61 = arith.mulf %56, %60 : vector<4x4xf32>
    %62 = arith.truncf %61 : vector<4x4xf32> to vector<4x4xbf16>
    %cst_20 = arith.constant dense<0.000000e+00> : vector<4x8xf32>
    %63 = tpu.matmul %62, %49, %cst_20 {dimension_numbers = #tpu.dot_dimension_numbers<[1], [0], [0], [1], [0, 0, 1, 1], [], []>} : vector<4x4xbf16>, vector<4x8xbf16>, vector<4x8xf32> -> vector<4x8xf32>
    %64 = arith.truncf %63 : vector<4x8xf32> to vector<4x8xbf16>
    %c0_21 = arith.constant 0 : index
    %c0_22 = arith.constant 0 : index
    %c8 = arith.constant 8 : index
    %65 = vector.load %arg4[%c0_21, %c0_22, %c8] : memref<1x4x32xbf16, #tpu.memory_space<vmem>>, vector<1x4x8xbf16>
    %66 = vector.shape_cast %65 : vector<1x4x8xbf16> to vector<4x8xbf16>
    %67 = vector.shape_cast %64 : vector<4x8xbf16> to vector<1x4x8xbf16>
    tpu.vector_store %arg4[%c0_21, %c0_22, %c8], %67 {strides = array<i32>} : memref<1x4x32xbf16, #tpu.memory_space<vmem>>, vector<1x4x8xbf16>,
    %68 = vector.extract_strided_slice %7 {offsets = [0, 16], sizes = [4, 8], strides = [1, 1]} : vector<4x32xf32> to vector<4x8xf32>
    %cst_23 = arith.constant 0.353553385 : f32
    %69 = vector.broadcast %cst_23 : f32 to vector<4x8xf32>
    %70 = arith.mulf %68, %69 : vector<4x8xf32>
    %71 = arith.truncf %70 : vector<4x8xf32> to vector<4x8xbf16>
    %72 = vector.extract_strided_slice %8 {offsets = [0, 16], sizes = [4, 8], strides = [1, 1]} : vector<4x32xf32> to vector<4x8xf32>
    %73 = arith.truncf %72 : vector<4x8xf32> to vector<4x8xbf16>
    %74 = vector.extract_strided_slice %9 {offsets = [0, 16], sizes = [4, 8], strides = [1, 1]} : vector<4x32xf32> to vector<4x8xf32>
    %75 = arith.truncf %74 : vector<4x8xf32> to vector<4x8xbf16>
    %cst_24 = arith.constant dense<0.000000e+00> : vector<4x4xf32>
    %76 = tpu.matmul %71, %73, %cst_24 {dimension_numbers = #tpu.dot_dimension_numbers<[1], [1], [0], [0], [0, 0, 1, 0], [], []>} : vector<4x8xbf16>, vector<4x8xbf16>, vector<4x4xf32> -> vector<4x4xf32>
    %77 = arith.addf %76, %15 : vector<4x4xf32>
    %cst_25 = arith.constant dense<0xFF800000> : vector<4xf32>
    %78 = vector.multi_reduction <maximumf>, %77, %cst_25 [1] : vector<4x4xf32> to vector<4xf32>
    %79 = vector.shape_cast %78 : vector<4xf32> to vector<4x1xf32>
    %80 = vector.broadcast %79 : vector<4x1xf32> to vector<4x4xf32>
    %81 = arith.subf %77, %80 : vector<4x4xf32>
    %82 = math.exp %81 : vector<4x4xf32>
    %cst_26 = arith.constant dense<0.000000e+00> : vector<4xf32>
    %83 = vector.multi_reduction <add>, %82, %cst_26 [1] : vector<4x4xf32> to vector<4xf32>
    %84 = vector.shape_cast %83 : vector<4xf32> to vector<4x1xf32>
    %85 = tpu.reciprocal %84 {approx = true} : vector<4x1xf32> -> vector<4x1xf32>
    %86 = vector.broadcast %85 : vector<4x1xf32> to vector<4x4xf32>
    %87 = arith.mulf %82, %86 : vector<4x4xf32>
    %88 = arith.truncf %87 : vector<4x4xf32> to vector<4x4xbf16>
    %cst_27 = arith.constant dense<0.000000e+00> : vector<4x8xf32>
    %89 = tpu.matmul %88, %75, %cst_27 {dimension_numbers = #tpu.dot_dimension_numbers<[1], [0], [0], [1], [0, 0, 1, 1], [], []>} : vector<4x4xbf16>, vector<4x8xbf16>, vector<4x8xf32> -> vector<4x8xf32>
    %90 = arith.truncf %89 : vector<4x8xf32> to vector<4x8xbf16>
    %c0_28 = arith.constant 0 : index
    %c0_29 = arith.constant 0 : index
    %c16 = arith.constant 16 : index
    %91 = vector.load %arg4[%c0_28, %c0_29, %c16] : memref<1x4x32xbf16, #tpu.memory_space<vmem>>, vector<1x4x8xbf16>
    %92 = vector.shape_cast %91 : vector<1x4x8xbf16> to vector<4x8xbf16>
    %93 = vector.shape_cast %90 : vector<4x8xbf16> to vector<1x4x8xbf16>
    tpu.vector_store %arg4[%c0_28, %c0_29, %c16], %93 {strides = array<i32>} : memref<1x4x32xbf16, #tpu.memory_space<vmem>>, vector<1x4x8xbf16>,
    %94 = vector.extract_strided_slice %7 {offsets = [0, 24], sizes = [4, 8], strides = [1, 1]} : vector<4x32xf32> to vector<4x8xf32>
    %cst_30 = arith.constant 0.353553385 : f32
    %95 = vector.broadcast %cst_30 : f32 to vector<4x8xf32>
    %96 = arith.mulf %94, %95 : vector<4x8xf32>
    %97 = arith.truncf %96 : vector<4x8xf32> to vector<4x8xbf16>
    %98 = vector.extract_strided_slice %8 {offsets = [0, 24], sizes = [4, 8], strides = [1, 1]} : vector<4x32xf32> to vector<4x8xf32>
    %99 = arith.truncf %98 : vector<4x8xf32> to vector<4x8xbf16>
    %100 = vector.extract_strided_slice %9 {offsets = [0, 24], sizes = [4, 8], strides = [1, 1]} : vector<4x32xf32> to vector<4x8xf32>
    %101 = arith.truncf %100 : vector<4x8xf32> to vector<4x8xbf16>
    %cst_31 = arith.constant dense<0.000000e+00> : vector<4x4xf32>
    %102 = tpu.matmul %97, %99, %cst_31 {dimension_numbers = #tpu.dot_dimension_numbers<[1], [1], [0], [0], [0, 0, 1, 0], [], []>} : vector<4x8xbf16>, vector<4x8xbf16>, vector<4x4xf32> -> vector<4x4xf32>
    %103 = arith.addf %102, %15 : vector<4x4xf32>
    %cst_32 = arith.constant dense<0xFF800000> : vector<4xf32>
    %104 = vector.multi_reduction <maximumf>, %103, %cst_32 [1] : vector<4x4xf32> to vector<4xf32>
    %105 = vector.shape_cast %104 : vector<4xf32> to vector<4x1xf32>
    %106 = vector.broadcast %105 : vector<4x1xf32> to vector<4x4xf32>
    %107 = arith.subf %103, %106 : vector<4x4xf32>
    %108 = math.exp %107 : vector<4x4xf32>
    %cst_33 = arith.constant dense<0.000000e+00> : vector<4xf32>
    %109 = vector.multi_reduction <add>, %108, %cst_33 [1] : vector<4x4xf32> to vector<4xf32>
    %110 = vector.shape_cast %109 : vector<4xf32> to vector<4x1xf32>
    %111 = tpu.reciprocal %110 {approx = true} : vector<4x1xf32> -> vector<4x1xf32>
    %112 = vector.broadcast %111 : vector<4x1xf32> to vector<4x4xf32>
    %113 = arith.mulf %108, %112 : vector<4x4xf32>
    %114 = arith.truncf %113 : vector<4x4xf32> to vector<4x4xbf16>
    %cst_34 = arith.constant dense<0.000000e+00> : vector<4x8xf32>
    %115 = tpu.matmul %114, %101, %cst_34 {dimension_numbers = #tpu.dot_dimension_numbers<[1], [0], [0], [1], [0, 0, 1, 1], [], []>} : vector<4x4xbf16>, vector<4x8xbf16>, vector<4x8xf32> -> vector<4x8xf32>
    %116 = arith.truncf %115 : vector<4x8xf32> to vector<4x8xbf16>
    %c0_35 = arith.constant 0 : index
    %c0_36 = arith.constant 0 : index
    %c24 = arith.constant 24 : index
    %117 = vector.load %arg4[%c0_35, %c0_36, %c24] : memref<1x4x32xbf16, #tpu.memory_space<vmem>>, vector<1x4x8xbf16>
    %118 = vector.shape_cast %117 : vector<1x4x8xbf16> to vector<4x8xbf16>
    %119 = vector.shape_cast %116 : vector<4x8xbf16> to vector<1x4x8xbf16>
    tpu.vector_store %arg4[%c0_35, %c0_36, %c24], %119 {strides = array<i32>} : memref<1x4x32xbf16, #tpu.memory_space<vmem>>, vector<1x4x8xbf16>,
    return
  }
  func.func @transform_0(%arg0: i32) -> (i32, i32, i32) {
    %c0_i32 = arith.constant 0 : i32
    %c0_i32_0 = arith.constant 0 : i32
    %c0_i32_1 = arith.constant 0 : i32
    return %arg0, %c0_i32, %c0_i32_0 : i32, i32, i32
  }
  func.func @transform_1(%arg0: i32) -> (i32, i32) {
    %c0_i32 = arith.constant 0 : i32
    %c0_i32_0 = arith.constant 0 : i32
    %c0_i32_1 = arith.constant 0 : i32
    return %c0_i32, %c0_i32_0 : i32, i32
  }
  func.func @transform_2(%arg0: i32) -> (i32, i32) {
    %c0_i32 = arith.constant 0 : i32
    %c0_i32_0 = arith.constant 0 : i32
    %c0_i32_1 = arith.constant 0 : i32
    return %c0_i32, %c0_i32_0 : i32, i32
  }
  func.func @transform_3(%arg0: i32) -> (i32, i32, i32) {
    %c0_i32 = arith.constant 0 : i32
    %c0_i32_0 = arith.constant 0 : i32
    %c0_i32_1 = arith.constant 0 : i32
    return %arg0, %c0_i32, %c0_i32_0 : i32, i32, i32
  }
}

module attributes {stable_mosaic.version = 11 : i64} {
  func.func @_matmul_1k_kernel(%arg0: i32, %arg1: i32, %arg2: memref<8x32xbf16, #tpu.memory_space<vmem>>, %arg3: memref<32x128xbf16, #tpu.memory_space<vmem>>, %arg4: memref<1x128xf32, #tpu.memory_space<vmem>>, %arg5: memref<8x128xbf16, #tpu.memory_space<vmem>>) attributes {dimension_semantics = [#tpu.dimension_semantics<parallel>, #tpu.dimension_semantics<parallel>], iteration_bounds = array<i64: 1, 1>, scalar_prefetch = 0 : i64, scratch_operands = 0 : i64, tpu.core_type = #tpu.core_type<tc>, window_params = [{transform_indices = @transform_0, window_bounds = array<i64: 8, 32>}, {transform_indices = @transform_1, window_bounds = array<i64: 32, 128>}, {transform_indices = @transform_2, window_bounds = array<i64: 1, 128>}, {transform_indices = @transform_3, window_bounds = array<i64: 8, 128>}]} {
    %c0 = arith.constant 0 : index
    %c0_0 = arith.constant 0 : index
    %0 = vector.load %arg2[%c0, %c0_0] : memref<8x32xbf16, #tpu.memory_space<vmem>>, vector<8x32xbf16>
    %c0_1 = arith.constant 0 : index
    %c0_2 = arith.constant 0 : index
    %1 = vector.load %arg3[%c0_1, %c0_2] : memref<32x128xbf16, #tpu.memory_space<vmem>>, vector<32x128xbf16>
    %cst = arith.constant dense<0.000000e+00> : vector<8x128xf32>
    %2 = tpu.matmul %0, %1, %cst {dimension_numbers = #tpu.dot_dimension_numbers<[1], [0], [0], [1], [0, 0, 1, 1], [], []>} : vector<8x32xbf16>, vector<32x128xbf16>, vector<8x128xf32> -> vector<8x128xf32>
    %c0_3 = arith.constant 0 : index
    %c0_4 = arith.constant 0 : index
    %3 = vector.load %arg4[%c0_3, %c0_4] : memref<1x128xf32, #tpu.memory_space<vmem>>, vector<1x128xf32>
    %4 = vector.broadcast %3 : vector<1x128xf32> to vector<8x128xf32>
    %5 = arith.addf %2, %4 : vector<8x128xf32>
    %6 = arith.mulf %5, %5 : vector<8x128xf32>
    %7 = arith.mulf %5, %6 : vector<8x128xf32>
    %cst_5 = arith.constant 4.471500e-02 : f32
    %8 = vector.broadcast %cst_5 : f32 to vector<8x128xf32>
    %9 = arith.mulf %8, %7 : vector<8x128xf32>
    %10 = arith.addf %5, %9 : vector<8x128xf32>
    %cst_6 = arith.constant 0.797884583 : f32
    %11 = vector.broadcast %cst_6 : f32 to vector<8x128xf32>
    %12 = arith.mulf %11, %10 : vector<8x128xf32>
    %13 = math.tanh %12 : vector<8x128xf32>
    %cst_7 = arith.constant 1.000000e+00 : f32
    %14 = vector.broadcast %cst_7 : f32 to vector<8x128xf32>
    %15 = arith.addf %14, %13 : vector<8x128xf32>
    %cst_8 = arith.constant 5.000000e-01 : f32
    %16 = vector.broadcast %cst_8 : f32 to vector<8x128xf32>
    %17 = arith.mulf %16, %15 : vector<8x128xf32>
    %18 = arith.mulf %5, %17 : vector<8x128xf32>
    %19 = arith.truncf %18 : vector<8x128xf32> to vector<8x128xbf16>
    %c0_9 = arith.constant 0 : index
    %c0_10 = arith.constant 0 : index
    %20 = vector.load %arg5[%c0_9, %c0_10] : memref<8x128xbf16, #tpu.memory_space<vmem>>, vector<8x128xbf16>
    tpu.vector_store %arg5[%c0_9, %c0_10], %19 {strides = array<i32>} : memref<8x128xbf16, #tpu.memory_space<vmem>>, vector<8x128xbf16>,
    return
  }
  func.func @transform_0(%arg0: i32, %arg1: i32) -> (i32, i32) {
    %c0_i32 = arith.constant 0 : i32
    %c0_i32_0 = arith.constant 0 : i32
    return %arg0, %c0_i32 : i32, i32
  }
  func.func @transform_1(%arg0: i32, %arg1: i32) -> (i32, i32) {
    %c0_i32 = arith.constant 0 : i32
    %c0_i32_0 = arith.constant 0 : i32
    return %c0_i32, %arg1 : i32, i32
  }
  func.func @transform_2(%arg0: i32, %arg1: i32) -> (i32, i32) {
    %c0_i32 = arith.constant 0 : i32
    %c0_i32_0 = arith.constant 0 : i32
    return %c0_i32, %arg1 : i32, i32
  }
  func.func @transform_3(%arg0: i32, %arg1: i32) -> (i32, i32) {
    %c0_i32 = arith.constant 0 : i32
    return %arg0, %arg1 : i32, i32
  }
}

module attributes {stable_mosaic.version = 11 : i64} {
  func.func @_linear_res_ln_1k_kernel(%arg0: i32, %arg1: memref<8x128xbf16, #tpu.memory_space<vmem>>, %arg2: memref<128x32xbf16, #tpu.memory_space<vmem>>, %arg3: memref<1x32xf32, #tpu.memory_space<vmem>>, %arg4: memref<8x32xf32, #tpu.memory_space<vmem>>, %arg5: memref<1x32xf32, #tpu.memory_space<vmem>>, %arg6: memref<1x32xf32, #tpu.memory_space<vmem>>, %arg7: memref<8x32xf32, #tpu.memory_space<vmem>>, %arg8: memref<8x32xbf16, #tpu.memory_space<vmem>>) attributes {dimension_semantics = [#tpu.dimension_semantics<parallel>], iteration_bounds = array<i64: 1>, scalar_prefetch = 0 : i64, scratch_operands = 0 : i64, tpu.core_type = #tpu.core_type<tc>, window_params = [{transform_indices = @transform_0, window_bounds = array<i64: 8, 128>}, {pipeline_mode = #tpu.pipeline_mode<synchronous>, transform_indices = @transform_1, window_bounds = array<i64: 128, 32>}, {pipeline_mode = #tpu.pipeline_mode<synchronous>, transform_indices = @transform_2, window_bounds = array<i64: 1, 32>}, {transform_indices = @transform_3, window_bounds = array<i64: 8, 32>}, {pipeline_mode = #tpu.pipeline_mode<synchronous>, transform_indices = @transform_4, window_bounds = array<i64: 1, 32>}, {pipeline_mode = #tpu.pipeline_mode<synchronous>, transform_indices = @transform_5, window_bounds = array<i64: 1, 32>}, {transform_indices = @transform_6, window_bounds = array<i64: 8, 32>}, {transform_indices = @transform_7, window_bounds = array<i64: 8, 32>}]} {
    %c0 = arith.constant 0 : index
    %c0_0 = arith.constant 0 : index
    %0 = vector.load %arg1[%c0, %c0_0] : memref<8x128xbf16, #tpu.memory_space<vmem>>, vector<8x128xbf16>
    %c0_1 = arith.constant 0 : index
    %c0_2 = arith.constant 0 : index
    %1 = vector.load %arg2[%c0_1, %c0_2] : memref<128x32xbf16, #tpu.memory_space<vmem>>, vector<128x32xbf16>
    %cst = arith.constant dense<0.000000e+00> : vector<8x32xf32>
    %2 = tpu.matmul %0, %1, %cst {dimension_numbers = #tpu.dot_dimension_numbers<[1], [0], [0], [1], [0, 0, 1, 1], [], []>} : vector<8x128xbf16>, vector<128x32xbf16>, vector<8x32xf32> -> vector<8x32xf32>
    %c0_3 = arith.constant 0 : index
    %c0_4 = arith.constant 0 : index
    %3 = vector.load %arg3[%c0_3, %c0_4] : memref<1x32xf32, #tpu.memory_space<vmem>>, vector<1x32xf32>
    %4 = vector.broadcast %3 : vector<1x32xf32> to vector<8x32xf32>
    %5 = arith.addf %2, %4 : vector<8x32xf32>
    %c0_5 = arith.constant 0 : index
    %c0_6 = arith.constant 0 : index
    %6 = vector.load %arg4[%c0_5, %c0_6] : memref<8x32xf32, #tpu.memory_space<vmem>>, vector<8x32xf32>
    %7 = arith.addf %5, %6 : vector<8x32xf32>
    %c0_7 = arith.constant 0 : index
    %c0_8 = arith.constant 0 : index
    %8 = vector.load %arg7[%c0_7, %c0_8] : memref<8x32xf32, #tpu.memory_space<vmem>>, vector<8x32xf32>
    tpu.vector_store %arg7[%c0_7, %c0_8], %7 {strides = array<i32>} : memref<8x32xf32, #tpu.memory_space<vmem>>, vector<8x32xf32>,
    %cst_9 = arith.constant dense<0.000000e+00> : vector<8xf32>
    %9 = vector.multi_reduction <add>, %7, %cst_9 [1] : vector<8x32xf32> to vector<8xf32>
    %10 = vector.shape_cast %9 : vector<8xf32> to vector<8x1xf32>
    %cst_10 = arith.constant 3.200000e+01 : f32
    %11 = vector.broadcast %cst_10 : f32 to vector<8x1xf32>
    %12 = arith.divf %10, %11 : vector<8x1xf32>
    %13 = vector.broadcast %12 : vector<8x1xf32> to vector<8x32xf32>
    %14 = arith.subf %7, %13 : vector<8x32xf32>
    %15 = arith.mulf %14, %14 : vector<8x32xf32>
    %cst_11 = arith.constant dense<0.000000e+00> : vector<8xf32>
    %16 = vector.multi_reduction <add>, %15, %cst_11 [1] : vector<8x32xf32> to vector<8xf32>
    %17 = vector.shape_cast %16 : vector<8xf32> to vector<8x1xf32>
    %cst_12 = arith.constant 3.200000e+01 : f32
    %18 = vector.broadcast %cst_12 : f32 to vector<8x1xf32>
    %19 = arith.divf %17, %18 : vector<8x1xf32>
    %20 = vector.broadcast %12 : vector<8x1xf32> to vector<8x32xf32>
    %21 = arith.subf %7, %20 : vector<8x32xf32>
    %cst_13 = arith.constant 9.99999974E-6 : f32
    %22 = vector.broadcast %cst_13 : f32 to vector<8x1xf32>
    %23 = arith.addf %19, %22 : vector<8x1xf32>
    %24 = math.rsqrt %23 : vector<8x1xf32>
    %25 = vector.broadcast %24 : vector<8x1xf32> to vector<8x32xf32>
    %26 = arith.mulf %21, %25 : vector<8x32xf32>
    %c0_14 = arith.constant 0 : index
    %c0_15 = arith.constant 0 : index
    %27 = vector.load %arg5[%c0_14, %c0_15] : memref<1x32xf32, #tpu.memory_space<vmem>>, vector<1x32xf32>
    %28 = vector.broadcast %27 : vector<1x32xf32> to vector<8x32xf32>
    %29 = arith.mulf %26, %28 : vector<8x32xf32>
    %c0_16 = arith.constant 0 : index
    %c0_17 = arith.constant 0 : index
    %30 = vector.load %arg6[%c0_16, %c0_17] : memref<1x32xf32, #tpu.memory_space<vmem>>, vector<1x32xf32>
    %31 = vector.broadcast %30 : vector<1x32xf32> to vector<8x32xf32>
    %32 = arith.addf %29, %31 : vector<8x32xf32>
    %33 = arith.truncf %32 : vector<8x32xf32> to vector<8x32xbf16>
    %c0_18 = arith.constant 0 : index
    %c0_19 = arith.constant 0 : index
    %34 = vector.load %arg8[%c0_18, %c0_19] : memref<8x32xbf16, #tpu.memory_space<vmem>>, vector<8x32xbf16>
    tpu.vector_store %arg8[%c0_18, %c0_19], %33 {strides = array<i32>} : memref<8x32xbf16, #tpu.memory_space<vmem>>, vector<8x32xbf16>,
    return
  }
  func.func @transform_0(%arg0: i32) -> (i32, i32) {
    %c0_i32 = arith.constant 0 : i32
    %c0_i32_0 = arith.constant 0 : i32
    return %arg0, %c0_i32 : i32, i32
  }
  func.func @transform_1(%arg0: i32) -> (i32, i32) {
    %c0_i32 = arith.constant 0 : i32
    %c0_i32_0 = arith.constant 0 : i32
    %c0_i32_1 = arith.constant 0 : i32
    return %c0_i32, %c0_i32_0 : i32, i32
  }
  func.func @transform_2(%arg0: i32) -> (i32, i32) {
    %c0_i32 = arith.constant 0 : i32
    %c0_i32_0 = arith.constant 0 : i32
    %c0_i32_1 = arith.constant 0 : i32
    return %c0_i32, %c0_i32_0 : i32, i32
  }
  func.func @transform_3(%arg0: i32) -> (i32, i32) {
    %c0_i32 = arith.constant 0 : i32
    %c0_i32_0 = arith.constant 0 : i32
    return %arg0, %c0_i32 : i32, i32
  }
  func.func @transform_4(%arg0: i32) -> (i32, i32) {
    %c0_i32 = arith.constant 0 : i32
    %c0_i32_0 = arith.constant 0 : i32
    %c0_i32_1 = arith.constant 0 : i32
    return %c0_i32, %c0_i32_0 : i32, i32
  }
  func.func @transform_5(%arg0: i32) -> (i32, i32) {
    %c0_i32 = arith.constant 0 : i32
    %c0_i32_0 = arith.constant 0 : i32
    %c0_i32_1 = arith.constant 0 : i32
    return %c0_i32, %c0_i32_0 : i32, i32
  }
  func.func @transform_6(%arg0: i32) -> (i32, i32) {
    %c0_i32 = arith.constant 0 : i32
    %c0_i32_0 = arith.constant 0 : i32
    return %arg0, %c0_i32 : i32, i32
  }
  func.func @transform_7(%arg0: i32) -> (i32, i32) {
    %c0_i32 = arith.constant 0 : i32
    %c0_i32_0 = arith.constant 0 : i32
    return %arg0, %c0_i32 : i32, i32
  }
}

module attributes {stable_mosaic.version = 11 : i64} {
  func.func @_linear_res_ln_1k_kernel(%arg0: i32, %arg1: memref<8x128xbf16, #tpu.memory_space<vmem>>, %arg2: memref<128x32xbf16, #tpu.memory_space<vmem>>, %arg3: memref<1x32xf32, #tpu.memory_space<vmem>>, %arg4: memref<8x32xf32, #tpu.memory_space<vmem>>, %arg5: memref<1x32xf32, #tpu.memory_space<vmem>>, %arg6: memref<1x32xf32, #tpu.memory_space<vmem>>, %arg7: memref<8x32xf32, #tpu.memory_space<vmem>>, %arg8: memref<8x32xf32, #tpu.memory_space<vmem>>) attributes {dimension_semantics = [#tpu.dimension_semantics<parallel>], iteration_bounds = array<i64: 1>, scalar_prefetch = 0 : i64, scratch_operands = 0 : i64, tpu.core_type = #tpu.core_type<tc>, window_params = [{transform_indices = @transform_0, window_bounds = array<i64: 8, 128>}, {pipeline_mode = #tpu.pipeline_mode<synchronous>, transform_indices = @transform_1, window_bounds = array<i64: 128, 32>}, {pipeline_mode = #tpu.pipeline_mode<synchronous>, transform_indices = @transform_2, window_bounds = array<i64: 1, 32>}, {transform_indices = @transform_3, window_bounds = array<i64: 8, 32>}, {pipeline_mode = #tpu.pipeline_mode<synchronous>, transform_indices = @transform_4, window_bounds = array<i64: 1, 32>}, {pipeline_mode = #tpu.pipeline_mode<synchronous>, transform_indices = @transform_5, window_bounds = array<i64: 1, 32>}, {transform_indices = @transform_6, window_bounds = array<i64: 8, 32>}, {transform_indices = @transform_7, window_bounds = array<i64: 8, 32>}]} {
    %c0 = arith.constant 0 : index
    %c0_0 = arith.constant 0 : index
    %0 = vector.load %arg1[%c0, %c0_0] : memref<8x128xbf16, #tpu.memory_space<vmem>>, vector<8x128xbf16>
    %c0_1 = arith.constant 0 : index
    %c0_2 = arith.constant 0 : index
    %1 = vector.load %arg2[%c0_1, %c0_2] : memref<128x32xbf16, #tpu.memory_space<vmem>>, vector<128x32xbf16>
    %cst = arith.constant dense<0.000000e+00> : vector<8x32xf32>
    %2 = tpu.matmul %0, %1, %cst {dimension_numbers = #tpu.dot_dimension_numbers<[1], [0], [0], [1], [0, 0, 1, 1], [], []>} : vector<8x128xbf16>, vector<128x32xbf16>, vector<8x32xf32> -> vector<8x32xf32>
    %c0_3 = arith.constant 0 : index
    %c0_4 = arith.constant 0 : index
    %3 = vector.load %arg3[%c0_3, %c0_4] : memref<1x32xf32, #tpu.memory_space<vmem>>, vector<1x32xf32>
    %4 = vector.broadcast %3 : vector<1x32xf32> to vector<8x32xf32>
    %5 = arith.addf %2, %4 : vector<8x32xf32>
    %c0_5 = arith.constant 0 : index
    %c0_6 = arith.constant 0 : index
    %6 = vector.load %arg4[%c0_5, %c0_6] : memref<8x32xf32, #tpu.memory_space<vmem>>, vector<8x32xf32>
    %7 = arith.addf %5, %6 : vector<8x32xf32>
    %c0_7 = arith.constant 0 : index
    %c0_8 = arith.constant 0 : index
    %8 = vector.load %arg7[%c0_7, %c0_8] : memref<8x32xf32, #tpu.memory_space<vmem>>, vector<8x32xf32>
    tpu.vector_store %arg7[%c0_7, %c0_8], %7 {strides = array<i32>} : memref<8x32xf32, #tpu.memory_space<vmem>>, vector<8x32xf32>,
    %cst_9 = arith.constant dense<0.000000e+00> : vector<8xf32>
    %9 = vector.multi_reduction <add>, %7, %cst_9 [1] : vector<8x32xf32> to vector<8xf32>
    %10 = vector.shape_cast %9 : vector<8xf32> to vector<8x1xf32>
    %cst_10 = arith.constant 3.200000e+01 : f32
    %11 = vector.broadcast %cst_10 : f32 to vector<8x1xf32>
    %12 = arith.divf %10, %11 : vector<8x1xf32>
    %13 = vector.broadcast %12 : vector<8x1xf32> to vector<8x32xf32>
    %14 = arith.subf %7, %13 : vector<8x32xf32>
    %15 = arith.mulf %14, %14 : vector<8x32xf32>
    %cst_11 = arith.constant dense<0.000000e+00> : vector<8xf32>
    %16 = vector.multi_reduction <add>, %15, %cst_11 [1] : vector<8x32xf32> to vector<8xf32>
    %17 = vector.shape_cast %16 : vector<8xf32> to vector<8x1xf32>
    %cst_12 = arith.constant 3.200000e+01 : f32
    %18 = vector.broadcast %cst_12 : f32 to vector<8x1xf32>
    %19 = arith.divf %17, %18 : vector<8x1xf32>
    %20 = vector.broadcast %12 : vector<8x1xf32> to vector<8x32xf32>
    %21 = arith.subf %7, %20 : vector<8x32xf32>
    %cst_13 = arith.constant 9.99999974E-6 : f32
    %22 = vector.broadcast %cst_13 : f32 to vector<8x1xf32>
    %23 = arith.addf %19, %22 : vector<8x1xf32>
    %24 = math.rsqrt %23 : vector<8x1xf32>
    %25 = vector.broadcast %24 : vector<8x1xf32> to vector<8x32xf32>
    %26 = arith.mulf %21, %25 : vector<8x32xf32>
    %c0_14 = arith.constant 0 : index
    %c0_15 = arith.constant 0 : index
    %27 = vector.load %arg5[%c0_14, %c0_15] : memref<1x32xf32, #tpu.memory_space<vmem>>, vector<1x32xf32>
    %28 = vector.broadcast %27 : vector<1x32xf32> to vector<8x32xf32>
    %29 = arith.mulf %26, %28 : vector<8x32xf32>
    %c0_16 = arith.constant 0 : index
    %c0_17 = arith.constant 0 : index
    %30 = vector.load %arg6[%c0_16, %c0_17] : memref<1x32xf32, #tpu.memory_space<vmem>>, vector<1x32xf32>
    %31 = vector.broadcast %30 : vector<1x32xf32> to vector<8x32xf32>
    %32 = arith.addf %29, %31 : vector<8x32xf32>
    %c0_18 = arith.constant 0 : index
    %c0_19 = arith.constant 0 : index
    %33 = vector.load %arg8[%c0_18, %c0_19] : memref<8x32xf32, #tpu.memory_space<vmem>>, vector<8x32xf32>
    tpu.vector_store %arg8[%c0_18, %c0_19], %32 {strides = array<i32>} : memref<8x32xf32, #tpu.memory_space<vmem>>, vector<8x32xf32>,
    return
  }
  func.func @transform_0(%arg0: i32) -> (i32, i32) {
    %c0_i32 = arith.constant 0 : i32
    %c0_i32_0 = arith.constant 0 : i32
    return %arg0, %c0_i32 : i32, i32
  }
  func.func @transform_1(%arg0: i32) -> (i32, i32) {
    %c0_i32 = arith.constant 0 : i32
    %c0_i32_0 = arith.constant 0 : i32
    %c0_i32_1 = arith.constant 0 : i32
    return %c0_i32, %c0_i32_0 : i32, i32
  }
  func.func @transform_2(%arg0: i32) -> (i32, i32) {
    %c0_i32 = arith.constant 0 : i32
    %c0_i32_0 = arith.constant 0 : i32
    %c0_i32_1 = arith.constant 0 : i32
    return %c0_i32, %c0_i32_0 : i32, i32
  }
  func.func @transform_3(%arg0: i32) -> (i32, i32) {
    %c0_i32 = arith.constant 0 : i32
    %c0_i32_0 = arith.constant 0 : i32
    return %arg0, %c0_i32 : i32, i32
  }
  func.func @transform_4(%arg0: i32) -> (i32, i32) {
    %c0_i32 = arith.constant 0 : i32
    %c0_i32_0 = arith.constant 0 : i32
    %c0_i32_1 = arith.constant 0 : i32
    return %c0_i32, %c0_i32_0 : i32, i32
  }
  func.func @transform_5(%arg0: i32) -> (i32, i32) {
    %c0_i32 = arith.constant 0 : i32
    %c0_i32_0 = arith.constant 0 : i32
    %c0_i32_1 = arith.constant 0 : i32
    return %c0_i32, %c0_i32_0 : i32, i32
  }
  func.func @transform_6(%arg0: i32) -> (i32, i32) {
    %c0_i32 = arith.constant 0 : i32
    %c0_i32_0 = arith.constant 0 : i32
    return %arg0, %c0_i32 : i32, i32
  }
  func.func @transform_7(%arg0: i32) -> (i32, i32) {
    %c0_i32 = arith.constant 0 : i32
    %c0_i32_0 = arith.constant 0 : i32
    return %arg0, %c0_i32 : i32, i32
  }
}

module attributes {stable_mosaic.version = 11 : i64} {
  func.func @_matmul_1k_kernel(%arg0: i32, %arg1: i32, %arg2: memref<16x32xf32, #tpu.memory_space<vmem>>, %arg3: memref<32x8xbf16, #tpu.memory_space<vmem>>, %arg4: memref<1x8xf32, #tpu.memory_space<vmem>>, %arg5: memref<16x8xf32, #tpu.memory_space<vmem>>) attributes {dimension_semantics = [#tpu.dimension_semantics<parallel>, #tpu.dimension_semantics<parallel>], iteration_bounds = array<i64: 1, 1>, scalar_prefetch = 0 : i64, scratch_operands = 0 : i64, tpu.core_type = #tpu.core_type<tc>, window_params = [{transform_indices = @transform_0, window_bounds = array<i64: 16, 32>}, {transform_indices = @transform_1, window_bounds = array<i64: 32, 8>}, {transform_indices = @transform_2, window_bounds = array<i64: 1, 8>}, {transform_indices = @transform_3, window_bounds = array<i64: 16, 8>}]} {
    %c0 = arith.constant 0 : index
    %c0_0 = arith.constant 0 : index
    %0 = vector.load %arg2[%c0, %c0_0] : memref<16x32xf32, #tpu.memory_space<vmem>>, vector<16x32xf32>
    %1 = arith.truncf %0 : vector<16x32xf32> to vector<16x32xbf16>
    %c0_1 = arith.constant 0 : index
    %c0_2 = arith.constant 0 : index
    %2 = vector.load %arg3[%c0_1, %c0_2] : memref<32x8xbf16, #tpu.memory_space<vmem>>, vector<32x8xbf16>
    %cst = arith.constant dense<0.000000e+00> : vector<16x8xf32>
    %3 = tpu.matmul %1, %2, %cst {dimension_numbers = #tpu.dot_dimension_numbers<[1], [0], [0], [1], [0, 0, 1, 1], [], []>} : vector<16x32xbf16>, vector<32x8xbf16>, vector<16x8xf32> -> vector<16x8xf32>
    %c0_3 = arith.constant 0 : index
    %c0_4 = arith.constant 0 : index
    %4 = vector.load %arg4[%c0_3, %c0_4] : memref<1x8xf32, #tpu.memory_space<vmem>>, vector<1x8xf32>
    %5 = vector.broadcast %4 : vector<1x8xf32> to vector<16x8xf32>
    %6 = arith.addf %3, %5 : vector<16x8xf32>
    %c0_5 = arith.constant 0 : index
    %c0_6 = arith.constant 0 : index
    %7 = vector.load %arg5[%c0_5, %c0_6] : memref<16x8xf32, #tpu.memory_space<vmem>>, vector<16x8xf32>
    tpu.vector_store %arg5[%c0_5, %c0_6], %6 {strides = array<i32>} : memref<16x8xf32, #tpu.memory_space<vmem>>, vector<16x8xf32>,
    return
  }
  func.func @transform_0(%arg0: i32, %arg1: i32) -> (i32, i32) {
    %c0_i32 = arith.constant 0 : i32
    %c0_i32_0 = arith.constant 0 : i32
    return %arg0, %c0_i32 : i32, i32
  }
  func.func @transform_1(%arg0: i32, %arg1: i32) -> (i32, i32) {
    %c0_i32 = arith.constant 0 : i32
    %c0_i32_0 = arith.constant 0 : i32
    return %c0_i32, %arg1 : i32, i32
  }
  func.func @transform_2(%arg0: i32, %arg1: i32) -> (i32, i32) {
    %c0_i32 = arith.constant 0 : i32
    %c0_i32_0 = arith.constant 0 : i32
    return %c0_i32, %arg1 : i32, i32
  }
  func.func @transform_3(%arg0: i32, %arg1: i32) -> (i32, i32) {
    %c0_i32 = arith.constant 0 : i32
    return %arg0, %arg1 : i32, i32
  }
}

module attributes {stable_mosaic.version = 11 : i64} {
  func.func @_bmm_kernel(%arg0: i32, %arg1: memref<1x8x32xf32, #tpu.memory_space<vmem>>, %arg2: memref<1x32x32xbf16, #tpu.memory_space<vmem>>, %arg3: memref<1x8x32xf32, #tpu.memory_space<vmem>>) attributes {dimension_semantics = [#tpu.dimension_semantics<parallel>], iteration_bounds = array<i64: 6>, scalar_prefetch = 0 : i64, scratch_operands = 0 : i64, tpu.core_type = #tpu.core_type<tc>, window_params = [{transform_indices = @transform_0, window_bounds = array<i64: 1, 8, 32>}, {transform_indices = @transform_1, window_bounds = array<i64: 1, 32, 32>}, {transform_indices = @transform_2, window_bounds = array<i64: 1, 8, 32>}]} {
    %c0 = arith.constant 0 : index
    %c0_0 = arith.constant 0 : index
    %c0_1 = arith.constant 0 : index
    %0 = vector.load %arg1[%c0, %c0_0, %c0_1] : memref<1x8x32xf32, #tpu.memory_space<vmem>>, vector<1x8x32xf32>
    %1 = vector.shape_cast %0 : vector<1x8x32xf32> to vector<8x32xf32>
    %2 = arith.truncf %1 : vector<8x32xf32> to vector<8x32xbf16>
    %c0_2 = arith.constant 0 : index
    %c0_3 = arith.constant 0 : index
    %c0_4 = arith.constant 0 : index
    %3 = vector.load %arg2[%c0_2, %c0_3, %c0_4] : memref<1x32x32xbf16, #tpu.memory_space<vmem>>, vector<1x32x32xbf16>
    %4 = vector.shape_cast %3 : vector<1x32x32xbf16> to vector<32x32xbf16>
    %cst = arith.constant dense<0.000000e+00> : vector<8x32xf32>
    %5 = tpu.matmul %2, %4, %cst {dimension_numbers = #tpu.dot_dimension_numbers<[1], [0], [0], [1], [0, 0, 1, 1], [], []>} : vector<8x32xbf16>, vector<32x32xbf16>, vector<8x32xf32> -> vector<8x32xf32>
    %c0_5 = arith.constant 0 : index
    %c0_6 = arith.constant 0 : index
    %c0_7 = arith.constant 0 : index
    %6 = vector.load %arg3[%c0_5, %c0_6, %c0_7] : memref<1x8x32xf32, #tpu.memory_space<vmem>>, vector<1x8x32xf32>
    %7 = vector.shape_cast %6 : vector<1x8x32xf32> to vector<8x32xf32>
    %8 = vector.shape_cast %5 : vector<8x32xf32> to vector<1x8x32xf32>
    tpu.vector_store %arg3[%c0_5, %c0_6, %c0_7], %8 {strides = array<i32>} : memref<1x8x32xf32, #tpu.memory_space<vmem>>, vector<1x8x32xf32>,
    return
  }
  func.func @transform_0(%arg0: i32) -> (i32, i32, i32) {
    %c0_i32 = arith.constant 0 : i32
    %c0_i32_0 = arith.constant 0 : i32
    %c0_i32_1 = arith.constant 0 : i32
    return %arg0, %c0_i32, %c0_i32_0 : i32, i32, i32
  }
  func.func @transform_1(%arg0: i32) -> (i32, i32, i32) {
    %c0_i32 = arith.constant 0 : i32
    %c0_i32_0 = arith.constant 0 : i32
    %c0_i32_1 = arith.constant 0 : i32
    return %arg0, %c0_i32, %c0_i32_0 : i32, i32, i32
  }
  func.func @transform_2(%arg0: i32) -> (i32, i32, i32) {
    %c0_i32 = arith.constant 0 : i32
    %c0_i32_0 = arith.constant 0 : i32
    %c0_i32_1 = arith.constant 0 : i32
    return %arg0, %c0_i32, %c0_i32_0 : i32, i32, i32
  }
}

</mosaic_0001>

<bundles_post_ra>
// kernel: forecast.29
= control target key start
LH: loop header
LB: loop body
LE: loop exit
PB: predicated region body
PF: predicated region fallthrough
CT: control target
= control target key end

     0   :  { %s390_s12 = smov 0   ;;  %s430_s0 = inlined_call_operand.vmem [shape: f32[2,16,4], index: 0, kind: input, shape index: {}]   ;;  %s431_s1 = inlined_call_operand.vmem [shape: f32[2,16,4], index: 1, kind: output, shape index: {0}]   ;;  %s432_s2 = inlined_call_operand.vmem [shape: f32[2,1,4], index: 2, kind: output, shape index: {1}]   ;;  %s433_s3 = inlined_call_operand.vmem [shape: f32[2,1,4], index: 3, kind: output, shape index: {2}]  }
   0x1 LB: > { %s337_s13 = sadd.s32 4294967295, %s368_s12   ;;  %p341_p0 = scmp.ge.s32.totalorder %s368_s12, 1  ;;  %s368_s12 = sphi %s390_s12, %s14_s12  }
   0x2   : > { %p142_p1 = scmp.lt.s32.totalorder %s368_s12, 3 }
   0x4   : > { %p143_p2 = pnand %p341_p0, %p142_p1 }
   0x5   : > { %p172_p3 = scmp.lt.s32.totalorder (!%p143_p2), %s337_s13, 1 }
   0x6   : > { %146 = sbr.rel (%p143_p2) target bundleno = 90 (0x5a), region = 24 }
   0xb   : > { %s435_s13 = smov (!%p172_p3, %s337_s13), 1  ;;  %vm190_vm0 = vcmask 31744   ;;  %vm229_vm1 = vcmask 24576  }
   0xc   : > { %s348_s14 = sshll.u32 %s435_s13, 4  ;;  %s184_s20 = scalar_lea.vmem %s432_s2, %s435_s13 }
   0xd   : > { %s176_s17 = scalar_lea.vmem %s430_s0, %s348_s14  ;;  %s187_s23 = scalar_lea.vmem %s433_s3, %s435_s13 }
   0xe   : > { %v188_v0 = vld [vmem:[%s176_s17] sm:$0xff]  ;;  %v189_v1 = vld [vmem:[%s176_s17 + $0x8] sm:$0xff]  ;;  %s181_s26 = scalar_lea.vmem %s431_s1, %s348_s14 }
   0xf   : > { %v191_v2 = vsel %vm190_vm0, %v188_v0, 0.0  ;;  %v192_v3 = vsel %vm190_vm0, %v189_v1, 0.0 }
  0x10   : > { %v193_v4 = vadd.f32 %v192_v3, %v191_v2 }
  0x12   : > { %v194_v5 = vrot.slane %v193_v4, 4 }
  0x14   : > { %v195_v6 = vadd.f32 %v194_v5, %v193_v4 }
  0x16   : > { %v196_v7 = vrot.slane %v195_v6, 2 }
  0x18   : > { %v197_v8 = vadd.f32 %v196_v7, %v195_v6 }
  0x1a   : > { %v198_v9 = vrot.slane %v197_v8, 1 }
  0x1c   : > { %v199_v10 = vadd.f32 %v198_v9, %v197_v8 }
  0x1e   : > { %v201_v11 = vmul.f32 0.0625, %v199_v10 }
  0x20   : > { %v202_v12 = vsub.f32 %v188_v0, %v201_v11  ;;  %v203_v13 = vsub.f32 %v189_v1, %v201_v11  ;;  %230 = vst.msk [vmem:[%s184_s20] sm:$0x1] %vm229_vm1, %v201_v11 }
  0x22   : > { %v204_v14 = vmul.f32 %v202_v12, %v202_v12  ;;  %v205_v15 = vmul.f32 %v203_v13, %v203_v13 }
  0x24   : > { %v206_v16 = vsel %vm190_vm0, %v204_v14, 0.0  ;;  %v207_v17 = vsel %vm190_vm0, %v205_v15, 0.0 }
  0x25   : > { %v208_v18 = vadd.f32 %v207_v17, %v206_v16 }
  0x27   : > { %v209_v19 = vrot.slane %v208_v18, 4 }
  0x29   : > { %v210_v20 = vadd.f32 %v209_v19, %v208_v18 }
  0x2b   : > { %v211_v21 = vrot.slane %v210_v20, 2 }
  0x2d   : > { %v212_v22 = vadd.f32 %v211_v21, %v210_v20 }
  0x2f   : > { %v213_v23 = vrot.slane %v212_v22, 1 }
  0x31   : > { %v214_v24 = vadd.f32 %v213_v23, %v212_v22 }
  0x33   : > { %v215_v25 = vmul.f32 0.0625, %v214_v24 }
  0x35   : > { %v216_v26 = vadd.f32 1e-05, %v215_v25 }
  0x37   : > { %358 = vrsqrt.f32 %v216_v26  ;;  %vm219_vm2 = vcmp.eq.f32.partialorder %v216_v26, inf  ;;  %v222_v28 = vand.u32 2147483648, %v216_v26  ;;  %vm221_vm3 = vcmp.eq.f32.partialorder %v216_v26, 0.0 }
  0x44   : > { %v359_v27 = vpop.eup %358 }
  0x45   : > { %v218_v29 = vmul.f32 %v359_v27, %v216_v26 }
  0x47   : > { %v220_v30 = vsel %vm219_vm2, %v216_v26, %v218_v29 }
  0x48   : > { %v223_v31 = vsel %vm221_vm3, %v222_v28, %v220_v30 }
  0x49   : > { %360 = vrcp.f32 %v223_v31  ;;  %231 = vst.msk [vmem:[%s187_s23] sm:$0x1] %vm229_vm1, %v223_v31 }
  0x56   : > { %v361_v32 = vpop.eup %360 }
  0x57   : > { %v225_v33 = vmul.f32 %v361_v32, %v202_v12  ;;  %v226_v34 = vmul.f32 %v361_v32, %v203_v13 }
  0x59   : > { %227 = vst.msk [vmem:[%s181_s26] sm:$0xff] %vm190_vm0, %v225_v33  ;;  %228 = vst.msk [vmem:[%s181_s26 + $0x8] sm:$0xff] %vm190_vm0, %v226_v34 }
  0x5a PF: > { %s14_s12 = sadd.s32 1, %s368_s12  }
  0x5b   : > { %p11_p4 = scmp.ge.s32.totalorder %s14_s12, 4  }
  0x5d   :  { %13 = sbr.rel (!%p11_p4) target bundleno = 1 (0x1), region = 78 }

// kernel: forecast.35
= control target key start
LH: loop header
LB: loop body
LE: loop exit
PB: predicated region body
PF: predicated region fallthrough
CT: control target
= control target key end

     0   :  { %v110_v0 = vmov 0.0   ;;  %vm111_vm0 = vmmov 0   ;;  %vm40_vm1 = vcmask 261120   ;;  %vm85_vm2 = vcmask 519168   ;;  %s147_s1 = inlined_call_operand.vmem [shape: bf16[32,64], index: 1, kind: input, shape index: {}]   ;;  %s148_s0 = inlined_call_operand.vmem [shape: f32[8,32], index: 0, kind: input, shape index: {}]   ;;  %s149_s2 = inlined_call_operand.vmem [shape: f32[1,64], index: 2, kind: input, shape index: {}]   ;;  %s150_s3 = inlined_call_operand.vmem [shape: bf16[8,64], index: 3, kind: output, shape index: {}]  }
   0x1   :  { %98 = vmatprep.subr.bf16.mxu0 %v110_v0  ;;  %v108_v1 = vld [vmem:[%s147_s1 + $0x8] sm:$0xff]   ;;  %102 = vmatprep.mubr.msk.bf16.mxu0 %vm111_vm0, %v110_v0  ;;  %v109_v2 = vld [vmem:[%s147_s1] sm:$0xff]  }
   0x2   :  { %99 = vmatpush3.bf16.msra.mxu0 %v108_v1  ;;  %v15_v3 = vld [vmem:[%s148_s0] sm:$0xff] }
   0x3   :  { %100 = vmatprep.subr.bf16.mxu0 %v110_v0  ;;  %v16_v4 = vpack.c.bf16 %v15_v3, %v15_v3  ;;  %v91_v5 = vld [vmem:[%s149_s2] ss:$0 sm:$0xff] }
   0x6   :  { %101 = vmatpush3.bf16.msra.mxu0 %v109_v2 }
   0x9   :  { %103 = vmatmul.mubr.msk.bf16.vlgmr.msra.gmra.mxu0 %vm40_vm1, %v16_v4 }
  0xc9   :  { %v78_v6 = vpop.f32.mrf.mxu0 }
  0xca   :  { %v79_v7 = vadd.f32 %v91_v5, %v78_v6 }
  0xcb   :  { %v104_v8 = vpop.f32.mrf.mxu0 }
  0xcc   :  { %v84_v9 = vpack.c.bf16 %v79_v7, %v79_v7 }
  0xcd   :  { %v81_v10 = vpop.f32.mrf.mxu0 }
  0xce   :  { %86 = vst.msk [vmem:[%s150_s3] sm:$0xf] %vm85_vm2, %v84_v9 }
  0xcf   :  { %v105_v11 = vpop.f32.mrf.mxu0 }

// kernel: forecast.30
= control target key start
LH: loop header
LB: loop body
LE: loop exit
PB: predicated region body
PF: predicated region fallthrough
CT: control target
= control target key end

     0   :  { %v96_v0 = vmov 0.0   ;;  %vm97_vm0 = vmmov 0   ;;  %vm32_vm1 = vcmask 130048   ;;  %vm76_vm2 = vcmask 261120   ;;  %s130_s1 = inlined_call_operand.vmem [shape: bf16[16,32], index: 1, kind: input, shape index: {}]   ;;  %s131_s0 = inlined_call_operand.vmem [shape: f32[8,16], index: 0, kind: input, shape index: {}]   ;;  %s132_s2 = inlined_call_operand.vmem [shape: f32[1,32], index: 2, kind: input, shape index: {}]   ;;  %s133_s3 = inlined_call_operand.vmem [shape: f32[8,32], index: 3, kind: output, shape index: {}]  }
   0x1   :  { %87 = vmatprep.subr.bf16.mxu0 %v96_v0  ;;  %v95_v1 = vld [vmem:[%s130_s1] sm:$0xff]   ;;  %89 = vmatprep.mubr.msk.bf16.mxu0 %vm97_vm0, %v96_v0 }
   0x2   :  { %v15_v2 = vld [vmem:[%s131_s0] sm:$0xff]  ;;  %88 = vmatpush3.bf16.msra.mxu0 %v95_v1 }
   0x3   :  { %v16_v3 = vpack.c.bf16 %v15_v2, %v15_v2  ;;  %v82_v4 = vld [vmem:[%s132_s2] ss:$0 sm:$0xff] }
   0x5   :  { %90 = vmatmul.mubr.msk.bf16.vlgmr.msra.gmra.mxu0 %vm32_vm1, %v16_v3 }
  0xc5   :  { %v70_v5 = vpop.f32.mrf.mxu0 }
  0xc6   :  { %v71_v6 = vadd.f32 %v82_v4, %v70_v5 }
  0xc7   :  { %v91_v7 = vpop.f32.mrf.mxu0 }
  0xc8   :  { %77 = vst.msk [vmem:[%s133_s3] sm:$0xff] %vm76_vm2, %v71_v6 }
  0xc9   :  { %v73_v8 = vpop.f32.mrf.mxu0 }
  0xcb   :  { %v92_v9 = vpop.f32.mrf.mxu0 }

// kernel: forecast.31
= control target key start
LH: loop header
LB: loop body
LE: loop exit
PB: predicated region body
PF: predicated region fallthrough
CT: control target
= control target key end

     0   :  { %s965_s12 = smov 0   ;;  %s1063_s0 = inlined_call_operand.vmem [shape: f32[2,4,32], index: 0, kind: input, shape index: {}]   ;;  %s1064_s1 = inlined_call_operand.vmem [shape: bf16[32,96], index: 1, kind: input, shape index: {}]   ;;  %s1065_s2 = inlined_call_operand.vmem [shape: f32[1,96], index: 2, kind: input, shape index: {}]   ;;  %s1066_s3 = inlined_call_operand.vmem [shape: bf16[2,4,32], index: 3, kind: output, shape index: {}]  }
   0x1 LB: > { %s781_s13 = sadd.s32 4294967295, %s926_s12   ;;  %p785_p0 = scmp.ge.s32.totalorder %s926_s12, 1  ;;  %s926_s12 = sphi %s965_s12, %s13_s12  }
   0x2   : > { %p136_p1 = scmp.lt.s32.totalorder %s926_s12, 3 }
   0x4   : > { %p137_p2 = pnand %p785_p0, %p136_p1 }
   0x5   : > { %p158_p3 = scmp.lt.s32.totalorder (!%p137_p2), %s781_s13, 1  ;;  %s930_s24 = smov (!%p137_p2), 96  }
   0x6   : > { %140 = sbr.rel (%p137_p2) target bundleno = 1221 (0x4c5), region = 32  ;;  %s931_s25 = smov (!%p137_p2), 120  }
   0x7   : > { %s932_s26 = smov (!%p137_p2), 88   ;;  %s933_s27 = smov (!%p137_p2), 80  }
   0x8   : > { %s934_s28 = smov (!%p137_p2), 112   ;;  %s935_s29 = smov (!%p137_p2), 72  }
   0x9   : > { %s936_s30 = smov (!%p137_p2), 104   ;;  %s937_s4 = smov (!%p137_p2), 56  }
   0xa   : > { %s938_s5 = smov (!%p137_p2), 64   ;;  %s939_s6 = smov (!%p137_p2), 40  }
   0xb   : > { %v902_v0 = vld [vmem:[%s1064_s1 + $0x8] sm:$0xff]   ;;  %v928_v1 = vmov 0.0   ;;  %v903_v2 = vld [vmem:[%s1064_s1] sm:$0xff]   ;;  %vm929_vm0 = vmmov 0   ;;  %s1068_s13 = smov (!%p158_p3, %s781_s13), 1  ;;  %vm192_vm1 = vcmask 261120  }
   0xc   : > { %821 = vmatprep.subr.bf16.mxu0 %v928_v1  ;;  %829 = vmatprep.subr.bf16.mxu1 %v928_v1  ;;  %s786_s18 = sshll.u32 %s1068_s13, 2  ;;  %v788_v5 = vld [vmem:[%s1065_s2] ss:$0 sm:$0xff]  ;;  %vm242_vm2 = vcmask 64512   ;;  %vm289_vm3 = vcmask 27648   ;;  %s940_s7 = smov 48  }
   0xd   : > { %822 = vmatpush3.bf16.msra.mxu0 %v902_v0  ;;  %825 = vmatprep.mubr.msk.bf16.mxu0 %vm929_vm0, %v928_v1  ;;  %s161_s21 = scalar_lea.vmem %s1063_s0, %s786_s18  ;;  %vm308_vm4 = vcmask 1041408   ;;  %vm304_vm5 = vcmask 31744   ;;  %s787_s8 = sshll.u32 %s1068_s13, 1  ;;  %vm353_vm6 = vcmask 58368   ;;  %vm478_vm7 = vcmask 123968  }
   0xe   : > { %823 = vmatprep.subr.bf16.mxu0 %v928_v1  ;;  %831 = vmatprep.mubr.msk.bf16.mxu1 %vm929_vm0, %v928_v1  ;;  %v167_v3 = vld [vmem:[%s161_s21] sm:$0xf]  ;;  %s1054_s11 = scalar_lea.vmem %s1066_s3, %s787_s8  ;;  %s942_s13 = smov 8   ;;  %vm602_vm8 = vcmask 189568   ;;  %vm726_vm9 = vcmask 255168  }
   0xf   : > { %v168_v4 = vpack.c.bf16 %v167_v3, %v167_v3  ;;  %s943_s14 = smov 16   ;;  %s944_s15 = smov 24  }
  0x11   : > { %824 = vmatpush3.bf16.msra.mxu0 %v903_v2 }
  0x12   : > { %835 = vmatprep.subr.bf16.mxu0 %v928_v1 }
  0x14   : > { %826 = vmatmul.mubr.msk.bf16.vlgmr.msra.gmra.mxu0 %vm192_vm1, %v168_v4 }
  0x15   : > { %837 = vmatprep.mubr.msk.bf16.mxu0 %vm929_vm0, %v928_v1 }
  0xd4   : > { %v230_v6 = vpop.f32.mrf.mxu0 }
  0xd5   : > { %v231_v7 = vadd.f32 %v788_v5, %v230_v6 }
  0xd6   : > { %v827_v8 = vpop.f32.mrf.mxu0 }
  0xd7   : > { %v236_v9 = vmul.f32 0.35355338, %v231_v7  ;;  %v998_v10 = vpack.c.bf16 %v231_v7, %v231_v7 }
  0xd8   : > { %v233_v11 = vpop.f32.mrf.mxu0 }
  0xd9   : > { %v237_v12 = vpack.c.bf16 %v236_v9, %v236_v9  ;;  %240 = vrot.lane.b32.xlu0 %v998_v10, %s930_s24 }
  0xda   : > { %v828_v13 = vpop.f32.mrf.mxu0 }
  0xdb   : > { %356 = vrot.lane.b32.xlu1 %v237_v12, %s931_s25 }
  0xdd   : > { %358 = vrot.lane.b32.xlu0 %v998_v10, %s932_s26 }
  0xdf   : > { %482 = vrot.lane.b32.xlu1 %v998_v10, %s933_s27 }
  0xe1   : > { %480 = vrot.lane.b32.xlu0 %v237_v12, %s934_s28 }
  0xe3   : > { %606 = vrot.lane.b32.xlu1 %v998_v10, %s935_s29 }
  0xe5   : > { %604 = vrot.lane.b32.xlu0 %v237_v12, %s936_s30 }
 0x14b   : > { %v241_v14 = vpop.permute.xlu0 %240 }
 0x14c   : > { %v247_v15 = vsel %vm242_vm2, %v241_v14, 0 }
 0x14d   : > { %830 = vmatpush3.bf16.xpose.msra.mxu1 %v247_v15  ;;  %v357_v17 = vpop.permute.xlu1 %356 }
 0x14e   : > { %841 = vmatprep.subr.bf16.mxu1 %v928_v1 }
 0x14f   : > { %v359_v16 = vpop.permute.xlu0 %358 }
 0x150   : > { %v364_v18 = vsel %vm242_vm2, %v359_v16, 0 }
 0x151   : > { %v483_v19 = vpop.permute.xlu1 %482 }
 0x152   : > { %v488_v20 = vsel %vm242_vm2, %v483_v19, 0 }
 0x153   : > { %v481_v22 = vpop.permute.xlu0 %480 }
 0x154   : > { %832 = vmatmul.mubr.msk.bf16.vlgmr.msra.gmra.mxu1 %vm242_vm2, %v237_v12 }
 0x155   : > { %842 = vmatpush3.bf16.xpose.msra.mxu1 %v364_v18  ;;  %843 = vmatprep.mubr.msk.bf16.mxu1 %vm929_vm0, %v928_v1  ;;  %v607_v21 = vpop.permute.xlu1 %606 }
 0x156   : > { %853 = vmatprep.subr.bf16.mxu1 %v928_v1  ;;  %v612_v23 = vsel %vm242_vm2, %v607_v21, 0 }
 0x157   : > { %v605_v24 = vpop.permute.xlu0 %604 }
 0x15c   : > { %844 = vmatmul.mubr.msk.bf16.vlgmr.msra.gmra.mxu1 %vm242_vm2, %v357_v17 }
 0x15d   : > { %854 = vmatpush3.bf16.xpose.msra.mxu1 %v488_v20  ;;  %855 = vmatprep.mubr.msk.bf16.mxu1 %vm929_vm0, %v928_v1 }
 0x15e   : > { %865 = vmatprep.subr.bf16.mxu1 %v928_v1 }
 0x164   : > { %856 = vmatmul.mubr.msk.bf16.vlgmr.msra.gmra.mxu1 %vm242_vm2, %v481_v22 }
 0x165   : > { %866 = vmatpush3.bf16.xpose.msra.mxu1 %v612_v23  ;;  %867 = vmatprep.mubr.msk.bf16.mxu1 %vm929_vm0, %v928_v1 }
 0x16c   : > { %868 = vmatmul.mubr.msk.bf16.vlgmr.msra.gmra.mxu1 %vm242_vm2, %v605_v24 }
 0x214   : > { %v283_v25 = vpop.f32.mrf.mxu1 }
 0x215   : > { %v290_v26 = vsel %vm289_vm3, %v283_v25, -inf }
 0x216   : > { %291 = vmax.xlane.f32.xlu1 %v290_v26  ;;  %v833_v27 = vpop.f32.mrf.mxu1  ;;  %v941_v26 = vmov 1983009808  }
 0x217   : > { %v469_v27 = vunpack.c.l.s4 %v941_v26 }
 0x218   : > { %v286_v28 = vpop.f32.mrf.mxu1 }
 0x219   : > { %v471_v28 = vlaneseq }
 0x21a   : > { %v834_v29 = vpop.f32.mrf.mxu1 }
 0x21c   : > { %v400_v30 = vpop.f32.mrf.mxu1 }
 0x21d   : > { %v406_v31 = vsel %vm289_vm3, %v400_v30, -inf }
 0x21e   : > { %407 = vmax.xlane.f32.xlu0 %v406_v31  ;;  %v845_v32 = vpop.f32.mrf.mxu1 }
 0x21f   : > { %v472_v32 = vshrl.u32 %v471_v28, 7 }
 0x220   : > { %v403_v33 = vpop.f32.mrf.mxu1 }
 0x222   : > { %v846_v34 = vpop.f32.mrf.mxu1 }
 0x224   : > { %v524_v35 = vpop.f32.mrf.mxu1 }
 0x225   : > { %v530_v36 = vsel %vm289_vm3, %v524_v35, -inf }
 0x226   : > { %531 = vmax.xlane.f32.xlu0 %v530_v36  ;;  %v857_v37 = vpop.f32.mrf.mxu1 }
 0x228   : > { %v527_v38 = vpop.f32.mrf.mxu1 }
 0x22a   : > { %v858_v39 = vpop.f32.mrf.mxu1 }
 0x22c   : > { %v648_v40 = vpop.f32.mrf.mxu1 }
 0x22d   : > { %v654_v41 = vsel %vm289_vm3, %v648_v40, -inf }
 0x22e   : > { %655 = vmax.xlane.f32.xlu1 %v654_v41  ;;  %v869_v42 = vpop.f32.mrf.mxu1 }
 0x230   : > { %v651_v43 = vpop.f32.mrf.mxu1 }
 0x232   : > { %v870_v44 = vpop.f32.mrf.mxu1 }
 0x29f   : > { %v292_v45 = vpop.xlane.xlu1 %291 }
 0x2a0   : > { %v293_v46 = vsub.f32 %v283_v25, %v292_v45 }
 0x2a2   : > { %v294_v47 = vmul.f32 1.442695, %v293_v46 }
 0x2a4   : > { %904 = vpow2.f32 %v294_v47 }
 0x2a7   : > { %v408_v48 = vpop.xlane.xlu0 %407 }
 0x2a8   : > { %v409_v49 = vsub.f32 %v400_v30, %v408_v48 }
 0x2aa   : > { %v410_v50 = vmul.f32 1.442695, %v409_v49 }
 0x2ac   : > { %906 = vpow2.f32 %v410_v50 }
 0x2af   : > { %v532_v51 = vpop.xlane.xlu0 %531 }
 0x2b0   : > { %v533_v52 = vsub.f32 %v524_v35, %v532_v51 }
 0x2b1   : > { %v905_v53 = vpop.eup %904 }
 0x2b2   : > { %v534_v54 = vmul.f32 1.442695, %v533_v52  ;;  %v296_v55 = vsel %vm289_vm3, %v905_v53, 0.0 }
 0x2b3   : > { %297 = vadd.xlane.f32.xlu0 %v296_v55 }
 0x2b4   : > { %908 = vpow2.f32 %v534_v54 }
 0x2b7   : > { %v656_v60 = vpop.xlane.xlu1 %655 }
 0x2b8   : > { %v657_v61 = vsub.f32 %v648_v40, %v656_v60 }
 0x2b9   : > { %v907_v56 = vpop.eup %906 }
 0x2ba   : > { %v412_v57 = vsel %vm289_vm3, %v907_v56, 0.0  ;;  %v658_v62 = vmul.f32 1.442695, %v657_v61 }
 0x2bb   : > { %413 = vadd.xlane.f32.xlu1 %v412_v57 }
 0x2bc   : > { %910 = vpow2.f32 %v658_v62 }
 0x2c1   : > { %v909_v58 = vpop.eup %908 }
 0x2c2   : > { %v536_v59 = vsel %vm289_vm3, %v909_v58, 0.0 }
 0x2c3   : > { %537 = vadd.xlane.f32.xlu0 %v536_v59 }
 0x2c9   : > { %v911_v63 = vpop.eup %910 }
 0x2ca   : > { %v660_v0 = vsel %vm289_vm3, %v911_v63, 0.0 }
 0x2cc   : > { %418 = vrot.lane.b32.xlu1 %v998_v10, %s937_s4 }
 0x2d9   : > { %302 = vrot.lane.b32.xlu0 %v998_v10, %s938_s5 }
 0x2dd   : > { %666 = vrot.lane.b32.xlu0 %v998_v10, %s939_s6 }
 0x2f0   : > { %661 = vadd.xlane.f32.xlu1 %v660_v0 }
 0x301   : > { %542 = vrot.lane.b32.xlu1 %v998_v10, %s940_s7 }
 0x33c   : > { %v298_v2 = vpop.xlane.xlu0 %297 }
 0x33d   : > { %912 = vrcp.f32 %v298_v2 }
 0x344   : > { %v414_v3 = vpop.xlane.xlu1 %413 }
 0x345   : > { %914 = vrcp.f32 %v414_v3 }
 0x348   : > { %v419_v9 = vpop.permute.xlu1 %418 }
 0x349   : > { %v424_v10 = vsel %vm308_vm4, %v419_v9, 0 }
 0x34a   : > { %v913_v4 = vpop.eup %912 }
 0x34b   : > { %v300_v6 = vmul.f32 %v913_v4, %v905_v53 }
 0x34c   : > { %v538_v5 = vpop.xlane.xlu0 %537 }
 0x34d   : > { %v301_v11 = vpack.c.bf16 %v300_v6, %v300_v6  ;;  %916 = vrcp.f32 %v538_v5 }
 0x350   : > { %v303_v7 = vpop.permute.xlu0 %302 }
 0x351   : > { %v310_v8 = vsel %vm308_vm4, %v303_v7, 0 }
 0x352   : > { %836 = vmatpush3.bf16.msra.mxu0 %v310_v8  ;;  %v915_v12 = vpop.eup %914 }
 0x353   : > { %847 = vmatprep.subr.bf16.mxu0 %v928_v1  ;;  %v416_v13 = vmul.f32 %v915_v12, %v907_v56 }
 0x354   : > { %v667_v20 = vpop.permute.xlu0 %666 }
 0x355   : > { %838 = vmatmul.mubr.msk.bf16.vlgmr.msra.gmra.mxu0 %vm304_vm5, %v301_v11  ;;  %v417_v14 = vpack.c.bf16 %v416_v13, %v416_v13  ;;  %v672_v22 = vsel %vm308_vm4, %v667_v20, 0 }
 0x356   : > { %848 = vmatpush3.bf16.msra.mxu0 %v424_v10  ;;  %849 = vmatprep.mubr.msk.bf16.mxu0 %vm929_vm0, %v928_v1 }
 0x357   : > { %859 = vmatprep.subr.bf16.mxu0 %v928_v1 }
 0x35a   : > { %v917_v15 = vpop.eup %916 }
 0x35b   : > { %v540_v17 = vmul.f32 %v917_v15, %v909_v58 }
 0x35d   : > { %850 = vmatmul.mubr.msk.bf16.vlgmr.msra.gmra.mxu0 %vm304_vm5, %v417_v14  ;;  %v541_v21 = vpack.c.bf16 %v540_v17, %v540_v17 }
 0x35e   : > { %861 = vmatprep.mubr.msk.bf16.mxu0 %vm929_vm0, %v928_v1 }
 0x379   : > { %v662_v16 = vpop.xlane.xlu1 %661 }
 0x37a   : > { %918 = vrcp.f32 %v662_v16 }
 0x37d   : > { %v543_v18 = vpop.permute.xlu1 %542 }
 0x37e   : > { %v548_v19 = vsel %vm308_vm4, %v543_v18, 0 }
 0x37f   : > { %860 = vmatpush3.bf16.msra.mxu0 %v548_v19 }
 0x380   : > { %871 = vmatprep.subr.bf16.mxu0 %v928_v1 }
 0x382   : > { %862 = vmatmul.mubr.msk.bf16.vlgmr.msra.gmra.mxu0 %vm304_vm5, %v541_v21 }
 0x383   : > { %872 = vmatpush3.bf16.msra.mxu0 %v672_v22  ;;  %873 = vmatprep.mubr.msk.bf16.mxu0 %vm929_vm0, %v928_v1  ;;  %v470_v1 = vunpack.c.0.s8 %v469_v27 }
 0x385   : > { %v473_v35 = vsub.s32 %v470_v1, %v472_v32 }
 0x387   : > { %v919_v23 = vpop.eup %918 }
 0x388   : > { %v664_v24 = vmul.f32 %v919_v23, %v911_v63 }
 0x38a   : > { %v665_v25 = vpack.c.bf16 %v664_v24, %v664_v24 }
 0x38c   : > { %874 = vmatmul.mubr.msk.bf16.vlgmr.msra.gmra.mxu0 %vm304_vm5, %v665_v25 }
 0x415   : > { %v346_v29 = vpop.f32.mrf.mxu0 }
 0x416   : > { %v352_v30 = vpack.c.bf16 %v346_v29, %v346_v29 }
 0x417   : > { %v839_v31 = vpop.f32.mrf.mxu0 }
 0x418   : > { %354 = vst.msk [vmem:[%s1054_s11] sm:$0x3] %vm353_vm6, %v352_v30 }
 0x419   : > { %v349_v33 = vpop.f32.mrf.mxu0 }
 0x41b   : > { %v840_v34 = vpop.f32.mrf.mxu0 }
 0x41d   : > { %v460_v36 = vpop.f32.mrf.mxu0 }
 0x41e   : > { %v466_v37 = vpack.c.bf16 %v460_v36, %v460_v36 }
 0x41f   : > { %v851_v38 = vpop.f32.mrf.mxu0 }
 0x420   : > { %v474_v39 = vrot.slane %v466_v37, %v473_v35 }
 0x421   : > { %v463_v40 = vpop.f32.mrf.mxu0 }
 0x422   : > { %475 = vrot.lane.b32.xlu1 %v474_v39, %s942_s13 }
 0x423   : > { %v852_v41 = vpop.f32.mrf.mxu0 }
 0x442   : > { %v584_v42 = vpop.f32.mrf.mxu0 }
 0x443   : > { %v590_v43 = vpack.c.bf16 %v584_v42, %v584_v42 }
 0x444   : > { %v863_v44 = vpop.f32.mrf.mxu0 }
 0x445   : > { %v598_v45 = vrot.slane %v590_v43, %v473_v35 }
 0x446   : > { %v587_v46 = vpop.f32.mrf.mxu0 }
 0x447   : > { %599 = vrot.lane.b32.xlu0 %v598_v45, %s943_s14 }
 0x448   : > { %v864_v47 = vpop.f32.mrf.mxu0 }
 0x44c   : > { %v708_v48 = vpop.f32.mrf.mxu0 }
 0x44d   : > { %v714_v49 = vpack.c.bf16 %v708_v48, %v708_v48 }
 0x44e   : > { %v875_v50 = vpop.f32.mrf.mxu0 }
 0x44f   : > { %v722_v51 = vrot.slane %v714_v49, %v473_v35 }
 0x450   : > { %v711_v52 = vpop.f32.mrf.mxu0 }
 0x451   : > { %723 = vrot.lane.b32.xlu1 %v722_v51, %s944_s15 }
 0x452   : > { %v876_v53 = vpop.f32.mrf.mxu0 }
 0x494   : > { %v476_v54 = vpop.permute.xlu1 %475 }
 0x495   : > { %479 = vst.msk [vmem:[%s1054_s11] sm:$0x3] %vm478_vm7, %v476_v54 }
 0x4b9   : > { %v600_v55 = vpop.permute.xlu0 %599 }
 0x4ba   : > { %603 = vst.msk [vmem:[%s1054_s11] sm:$0x3] %vm602_vm8, %v600_v55 }
 0x4c3   : > { %v724_v56 = vpop.permute.xlu1 %723 }
 0x4c4   : > { %727 = vst.msk [vmem:[%s1054_s11] sm:$0x3] %vm726_vm9, %v724_v56 }
 0x4c5 PF: > { %s13_s12 = sadd.s32 1, %s926_s12  }
 0x4c6   : > { %p10_p4 = scmp.ge.s32.totalorder %s13_s12, 4  }
 0x4c8   :  { %12 = sbr.rel (!%p10_p4) target bundleno = 1 (0x1), region = 62 }

// kernel: forecast.33
= control target key start
LH: loop header
LB: loop body
LE: loop exit
PB: predicated region body
PF: predicated region fallthrough
CT: control target
= control target key end

     0   :  { %v111_v0 = vmov 0.0   ;;  %vm112_vm0 = vmmov 0   ;;  %vm40_vm1 = vcmask 261120   ;;  %vm86_vm2 = vcmask 519168   ;;  %s148_s1 = inlined_call_operand.vmem [shape: bf16[32,64], index: 1, kind: input, shape index: {}]   ;;  %s149_s0 = inlined_call_operand.vmem [shape: f32[8,32], index: 0, kind: input, shape index: {}]   ;;  %s150_s2 = inlined_call_operand.vmem [shape: f32[1,64], index: 2, kind: input, shape index: {}]   ;;  %s151_s3 = inlined_call_operand.vmem [shape: bf16[8,64], index: 3, kind: output, shape index: {}]  }
   0x1   :  { %99 = vmatprep.subr.bf16.mxu0 %v111_v0  ;;  %v109_v1 = vld [vmem:[%s148_s1 + $0x8] sm:$0xff]   ;;  %103 = vmatprep.mubr.msk.bf16.mxu0 %vm112_vm0, %v111_v0  ;;  %v110_v2 = vld [vmem:[%s148_s1] sm:$0xff]  }
   0x2   :  { %100 = vmatpush3.bf16.msra.mxu0 %v109_v1  ;;  %v15_v3 = vld [vmem:[%s149_s0] sm:$0xff] }
   0x3   :  { %101 = vmatprep.subr.bf16.mxu0 %v111_v0  ;;  %v16_v4 = vpack.c.bf16 %v15_v3, %v15_v3  ;;  %v92_v5 = vld [vmem:[%s150_s2] ss:$0 sm:$0xff] }
   0x6   :  { %102 = vmatpush3.bf16.msra.mxu0 %v110_v2 }
   0x9   :  { %104 = vmatmul.mubr.msk.bf16.vlgmr.msra.gmra.mxu0 %vm40_vm1, %v16_v4 }
  0xc9   :  { %v78_v6 = vpop.f32.mrf.mxu0 }
  0xca   :  { %v79_v7 = vadd.f32 %v92_v5, %v78_v6 }
  0xcb   :  { %v105_v8 = vpop.f32.mrf.mxu0 }
  0xcc   :  { %v84_v9 = vmax.f32 %v79_v7, 0.0 }
  0xcd   :  { %v81_v10 = vpop.f32.mrf.mxu0 }
  0xce   :  { %v85_v11 = vpack.c.bf16 %v84_v9, %v84_v9 }
  0xcf   :  { %v106_v12 = vpop.f32.mrf.mxu0 }
  0xd0   :  { %87 = vst.msk [vmem:[%s151_s3] sm:$0xf] %vm86_vm2, %v85_v11 }

// kernel: forecast.32
= control target key start
LH: loop header
LB: loop body
LE: loop exit
PB: predicated region body
PF: predicated region fallthrough
CT: control target
= control target key end

     0   :  { %v193_v1 = vmov 0.0   ;;  %vm194_vm0 = vmmov 0   ;;  %s268_s0 = inlined_call_operand.vmem [shape: bf16[8,32], index: 0, kind: input, shape index: {}]   ;;  %s269_s1 = inlined_call_operand.vmem [shape: bf16[32,32], index: 1, kind: input, shape index: {}]   ;;  %s270_s2 = inlined_call_operand.vmem [shape: f32[1,32], index: 2, kind: input, shape index: {}]   ;;  %s271_s3 = inlined_call_operand.vmem [shape: f32[8,32], index: 3, kind: input, shape index: {}]   ;;  %s272_s4 = inlined_call_operand.vmem [shape: f32[1,32], index: 4, kind: input, shape index: {}]   ;;  %s273_s5 = inlined_call_operand.vmem [shape: f32[1,32], index: 5, kind: input, shape index: {}]   ;;  %s274_s6 = inlined_call_operand.hbm [shape: f32[8,32], index: 6, kind: output, shape index: {0}]   ;;  %s275_s7 = inlined_call_operand.vmem [shape: f32[8,32], index: 7, kind: output, shape index: {1}]  }
   0x1   :  { %v167_v0 = vld [vmem:[%s269_s1 + $0x8] sm:$0xff]   ;;  %156 = vmatprep.subr.bf16.mxu0 %v193_v1  ;;  %v168_v2 = vld [vmem:[%s269_s1] sm:$0xff]   ;;  %160 = vmatprep.mubr.msk.bf16.mxu0 %vm194_vm0, %v193_v1 }
   0x2   :  { %157 = vmatpush3.bf16.msra.mxu0 %v167_v0 }
   0x3   :  { %158 = vmatprep.subr.bf16.mxu0 %v193_v1 }
   0x4   :  { %13 = vsyncpa [#allocation3], 0  ;;  %v27_v3 = vld [vmem:[%s268_s0] sm:$0xf]  ;;  %vm51_vm1 = vcmask 261120   ;;  %s195_s0 = smov [#allocation2]  }
   0x5   :  { %v147_v4 = vld [vmem:[%s270_s2] ss:$0 sm:$0xff]  ;;  %s135_s1 = sshll.u32 %s195_s0, 4  ;;  %s136_s1 = int_to_ptr.vmem [resolvable:$true] %s135_s1 }
   0x6   :  { %159 = vmatpush3.bf16.msra.mxu0 %v168_v2  ;;  %v95_v6 = vld [vmem:[%s271_s3] sm:$0xff]  ;;  %s171_s2 = scalar_lea.vmem %s136_s1, 128  ;;  %p176_p1 = scmp.lt.s32.totalorder %s136_s1, %s136_s1 }
   0x7   :  { %p172_p0 = scmp.ne.s32.totalorder %s136_s1, %s171_s2  ;;  %p177_p2 = scmp.lt.s32.totalorder %s171_s2, %s171_s2 }
   0x9   :  { %161 = vmatmul.mubr.msk.bf16.vlgmr.msra.gmra.mxu0 %vm51_vm1, %v27_v3  ;;  %p178_p3 = por %p177_p2, %p176_p1 }
   0xb   :  { %p179_p4 = pnand %p178_p3, %p172_p0 }
  0xc9   :  { %v89_v5 = vpop.f32.mrf.mxu0 }
  0xca   :  { %v90_v7 = vadd.f32 %v147_v4, %v89_v5 }
  0xcb   :  { %v162_v8 = vpop.f32.mrf.mxu0 }
  0xcc   :  { %v96_v9 = vadd.f32 %v95_v6, %v90_v7 }
  0xcd   :  { %v92_v10 = vpop.f32.mrf.mxu0 }
  0xce   :  { %97 = vst.msk [vmem:[#allocation2] sm:$0xff] %vm51_vm1, %v96_v9  ;;  %v98_v11 = vsel %vm51_vm1, %v96_v9, 0.0 }
  0xcf   :  { %99 = vadd.xlane.f32.xlu0 %v98_v11  ;;  %v163_v12 = vpop.f32.mrf.mxu0 }
 0x158   :  { %v100_v13 = vpop.xlane.xlu0 %99 }
 0x159   :  { %v102_v14 = vmul.f32 0.03125, %v100_v13 }
 0x15b   :  { %v103_v15 = vsub.f32 %v96_v9, %v102_v14 }
 0x15d   :  { %v104_v16 = vmul.f32 %v103_v15, %v103_v15 }
 0x15f   :  { %v105_v17 = vsel %vm51_vm1, %v104_v16, 0.0 }
 0x160   :  { %106 = vadd.xlane.f32.xlu0 %v105_v17 }
 0x161   :  { %182 = shalt.err (!%p179_p4)
}
 0x162   :  { %138 = dma.vmem_to_hbm [thread:$0]  %s136_s1, 128, %s274_s6, [#allocation3]   ;;  %v151_v22 = vld [vmem:[%s272_s4] ss:$0 sm:$0xff] }
 0x163   :  { %v152_v24 = vld [vmem:[%s273_s5] ss:$0 sm:$0xff] }
 0x1e9   :  { %v107_v18 = vpop.xlane.xlu0 %106 }
 0x1ea   :  { %v108_v19 = vmul.f32 0.03125, %v107_v18 }
 0x1ec   :  { %v109_v20 = vadd.f32 1e-05, %v108_v19 }
 0x1ee   :  { %169 = vrsqrt.f32 %v109_v20 }
 0x1fb   :  { %v170_v21 = vpop.eup %169 }
 0x1fc   :  { %v111_v23 = vmul.f32 %v170_v21, %v103_v15 }
 0x1fe   :  { %v119_v25 = vmul.f32 %v151_v22, %v111_v23 }
 0x200   :  { %v127_v26 = vadd.f32 %v152_v24, %v119_v25 }
 0x202   :  { %128 = vst.msk [vmem:[%s275_s7] sm:$0xff] %vm51_vm1, %v127_v26 }
 0x203   :  { %191 = dma.done.wait [#allocation3], 128  }
 0x204   :  { %192 = vsyncadd [#allocation3], 4294967168 }
 0x205   :  { %146 = vsyncpa [#allocation3], 1 }

// kernel: forecast.34
= control target key start
LH: loop header
LB: loop body
LE: loop exit
PB: predicated region body
PF: predicated region fallthrough
CT: control target
= control target key end

     0   :  { %v220_v1 = vmov 0.0   ;;  %vm221_vm0 = vmmov 0   ;;  %s300_s0 = inlined_call_operand.vmem [shape: bf16[8,64], index: 0, kind: input, shape index: {}]   ;;  %s301_s1 = inlined_call_operand.vmem [shape: bf16[64,32], index: 1, kind: input, shape index: {}]   ;;  %s302_s2 = inlined_call_operand.vmem [shape: f32[1,32], index: 2, kind: input, shape index: {}]   ;;  %s303_s3 = inlined_call_operand.vmem [shape: f32[8,32], index: 3, kind: input, shape index: {}]   ;;  %s304_s4 = inlined_call_operand.vmem [shape: f32[1,32], index: 4, kind: input, shape index: {}]   ;;  %s305_s5 = inlined_call_operand.vmem [shape: f32[1,32], index: 5, kind: input, shape index: {}]   ;;  %s306_s6 = inlined_call_operand.hbm [shape: f32[8,32], index: 6, kind: output, shape index: {0}]   ;;  %s307_s7 = inlined_call_operand.vmem [shape: f32[8,32], index: 7, kind: output, shape index: {1}]  }
   0x1   :  { %v192_v0 = vld [vmem:[%s301_s1 + $0x18] sm:$0xff]   ;;  %177 = vmatprep.subr.bf16.mxu0 %v220_v1  ;;  %v193_v2 = vld [vmem:[%s301_s1 + $0x10] sm:$0xff]   ;;  %185 = vmatprep.mubr.msk.bf16.mxu0 %vm221_vm0, %v220_v1 }
   0x2   :  { %178 = vmatpush3.bf16.msra.mxu0 %v192_v0 }
   0x3   :  { %179 = vmatprep.subr.bf16.mxu0 %v220_v1 }
   0x4   :  { %13 = vsyncpa [#allocation3], 0  ;;  %v194_v3 = vld [vmem:[%s301_s1 + $0x8] sm:$0xff]   ;;  %v195_v4 = vld [vmem:[%s301_s1] sm:$0xff]   ;;  %vm67_vm1 = vcmask 523264   ;;  %vm113_vm2 = vcmask 261120  }
   0x5   :  { %v27_v5 = vld [vmem:[%s300_s0] sm:$0xf]  ;;  %s222_s0 = smov [#allocation2]  }
   0x6   :  { %180 = vmatpush3.bf16.msra.mxu0 %v193_v2  ;;  %v164_v6 = vld [vmem:[%s302_s2] ss:$0 sm:$0xff]  ;;  %s152_s1 = sshll.u32 %s222_s0, 4  ;;  %s153_s1 = int_to_ptr.vmem [resolvable:$true] %s152_s1 }
   0x7   :  { %181 = vmatprep.subr.bf16.mxu0 %v220_v1  ;;  %v111_v8 = vld [vmem:[%s303_s3] sm:$0xff]  ;;  %s198_s2 = scalar_lea.vmem %s153_s1, 128  ;;  %p203_p1 = scmp.lt.s32.totalorder %s153_s1, %s153_s1 }
   0x8   :  { %p199_p0 = scmp.ne.s32.totalorder %s153_s1, %s198_s2  ;;  %p204_p2 = scmp.lt.s32.totalorder %s198_s2, %s198_s2 }
   0xa   :  { %182 = vmatpush3.bf16.msra.mxu0 %v194_v3  ;;  %p205_p3 = por %p204_p2, %p203_p1 }
   0xb   :  { %183 = vmatprep.subr.bf16.mxu0 %v220_v1 }
   0xc   :  { %p206_p4 = pnand %p205_p3, %p199_p0 }
   0xe   :  { %184 = vmatpush3.bf16.msra.mxu0 %v195_v4 }
  0x11   :  { %186 = vmatmul.mubr.msk.bf16.vlgmr.msra.gmra.mxu0 %vm67_vm1, %v27_v5 }
  0xd1   :  { %v105_v7 = vpop.f32.mrf.mxu0 }
  0xd2   :  { %v106_v9 = vadd.f32 %v164_v6, %v105_v7 }
  0xd3   :  { %v187_v10 = vpop.f32.mrf.mxu0 }
  0xd4   :  { %v112_v11 = vadd.f32 %v111_v8, %v106_v9 }
  0xd5   :  { %v108_v12 = vpop.f32.mrf.mxu0 }
  0xd6   :  { %v115_v13 = vsel %vm113_vm2, %v112_v11, 0.0  ;;  %114 = vst.msk [vmem:[#allocation2] sm:$0xff] %vm113_vm2, %v112_v11 }
  0xd7   :  { %116 = vadd.xlane.f32.xlu0 %v115_v13  ;;  %v188_v14 = vpop.f32.mrf.mxu0 }
 0x160   :  { %v117_v15 = vpop.xlane.xlu0 %116 }
 0x161   :  { %v119_v16 = vmul.f32 0.03125, %v117_v15 }
 0x163   :  { %v120_v17 = vsub.f32 %v112_v11, %v119_v16 }
 0x165   :  { %v121_v18 = vmul.f32 %v120_v17, %v120_v17 }
 0x167   :  { %v122_v19 = vsel %vm113_vm2, %v121_v18, 0.0 }
 0x168   :  { %123 = vadd.xlane.f32.xlu0 %v122_v19 }
 0x169   :  { %209 = shalt.err (!%p206_p4)
}
 0x16a   :  { %155 = dma.vmem_to_hbm [thread:$0]  %s153_s1, 128, %s306_s6, [#allocation3]   ;;  %v170_v24 = vld [vmem:[%s304_s4] ss:$0 sm:$0xff] }
 0x16b   :  { %v171_v26 = vld [vmem:[%s305_s5] ss:$0 sm:$0xff] }
 0x1f1   :  { %v124_v20 = vpop.xlane.xlu0 %123 }
 0x1f2   :  { %v125_v21 = vmul.f32 0.03125, %v124_v20 }
 0x1f4   :  { %v126_v22 = vadd.f32 1e-05, %v125_v21 }
 0x1f6   :  { %196 = vrsqrt.f32 %v126_v22 }
 0x203   :  { %v197_v23 = vpop.eup %196 }
 0x204   :  { %v128_v25 = vmul.f32 %v197_v23, %v120_v17 }
 0x206   :  { %v136_v27 = vmul.f32 %v170_v24, %v128_v25 }
 0x208   :  { %v144_v28 = vadd.f32 %v171_v26, %v136_v27 }
 0x20a   :  { %145 = vst.msk [vmem:[%s307_s7] sm:$0xff] %vm113_vm2, %v144_v28 }
 0x20b   :  { %218 = dma.done.wait [#allocation3], 128  }
 0x20c   :  { %219 = vsyncadd [#allocation3], 4294967168 }
 0x20d   :  { %163 = vsyncpa [#allocation3], 1 }

// kernel: forecast.37
= control target key start
LH: loop header
LB: loop body
LE: loop exit
PB: predicated region body
PF: predicated region fallthrough
CT: control target
= control target key end

     0   :  { %v107_v0 = vmov 0.0   ;;  %vm108_vm0 = vmmov 0   ;;  %vm39_vm1 = vcmask 261120   ;;  %s144_s1 = inlined_call_operand.vmem [shape: bf16[32,32], index: 1, kind: input, shape index: {}]   ;;  %s145_s0 = inlined_call_operand.vmem [shape: bf16[8,32], index: 0, kind: input, shape index: {}]   ;;  %s146_s2 = inlined_call_operand.vmem [shape: f32[1,32], index: 2, kind: input, shape index: {}]   ;;  %s147_s3 = inlined_call_operand.vmem [shape: f32[8,32], index: 3, kind: output, shape index: {}]  }
   0x1   :  { %95 = vmatprep.subr.bf16.mxu0 %v107_v0  ;;  %v105_v1 = vld [vmem:[%s144_s1 + $0x8] sm:$0xff]   ;;  %99 = vmatprep.mubr.msk.bf16.mxu0 %vm108_vm0, %v107_v0  ;;  %v106_v2 = vld [vmem:[%s144_s1] sm:$0xff]  }
   0x2   :  { %96 = vmatpush3.bf16.msra.mxu0 %v105_v1  ;;  %v15_v3 = vld [vmem:[%s145_s0] sm:$0xf] }
   0x3   :  { %97 = vmatprep.subr.bf16.mxu0 %v107_v0  ;;  %v88_v4 = vld [vmem:[%s146_s2] ss:$0 sm:$0xff] }
   0x6   :  { %98 = vmatpush3.bf16.msra.mxu0 %v106_v2 }
   0x9   :  { %100 = vmatmul.mubr.msk.bf16.vlgmr.msra.gmra.mxu0 %vm39_vm1, %v15_v3 }
  0xc9   :  { %v77_v5 = vpop.f32.mrf.mxu0 }
  0xca   :  { %v78_v6 = vadd.f32 %v88_v4, %v77_v5 }
  0xcb   :  { %v101_v7 = vpop.f32.mrf.mxu0 }
  0xcc   :  { %83 = vst.msk [vmem:[%s147_s3] sm:$0xff] %vm39_vm1, %v78_v6 }
  0xcd   :  { %v80_v8 = vpop.f32.mrf.mxu0 }
  0xcf   :  { %v102_v9 = vpop.f32.mrf.mxu0 }

// kernel: forecast.36
= control target key start
LH: loop header
LB: loop body
LE: loop exit
PB: predicated region body
PF: predicated region fallthrough
CT: control target
= control target key end

     0   :  { %s990_s15 = smov 0   ;;  %s1090_s0 = inlined_call_operand.vmem [shape: f32[2,4,32], index: 0, kind: input, shape index: {}]   ;;  %s1091_s1 = inlined_call_operand.vmem [shape: bf16[32,32], index: 1, kind: input, shape index: {}]   ;;  %s1092_s2 = inlined_call_operand.vmem [shape: f32[1,32], index: 2, kind: input, shape index: {}]   ;;  %s1093_s3 = inlined_call_operand.vmem [shape: bf16[1,8,64], index: 3, kind: input, shape index: {}]   ;;  %s1094_s4 = inlined_call_operand.vmem [shape: bf16[2,4,32], index: 4, kind: output, shape index: {}]  }
   0x1 LB: > { %s807_s16 = sadd.s32 4294967295, %s950_s15   ;;  %p811_p0 = scmp.ge.s32.totalorder %s950_s15, 1  ;;  %s950_s15 = sphi %s990_s15, %s14_s15  }
   0x2   : > { %p161_p1 = scmp.lt.s32.totalorder %s950_s15, 3 }
   0x4   : > { %p162_p2 = pnand %p811_p0, %p161_p1 }
   0x5   : > { %p185_p3 = scmp.lt.s32.totalorder (!%p162_p2), %s807_s16, 1  ;;  %s954_s23 = smov (!%p162_p2), 120  }
   0x6   : > { %165 = sbr.rel (%p162_p2) target bundleno = 1176 (0x498), region = 36  ;;  %s955_s28 = smov (!%p162_p2), 112  }
   0x7   : > { %s956_s5 = smov (!%p162_p2), 104   ;;  %s957_s6 = smov (!%p162_p2), 96  }
   0x8   : > { %s958_s7 = smov (!%p162_p2), 80   ;;  %s959_s8 = smov (!%p162_p2), 72  }
   0x9   : > { %s960_s9 = smov (!%p162_p2), 88   ;;  %s962_s14 = smov (!%p162_p2), 8  }
   0xa   : > { %s964_s17 = smov (!%p162_p2), 24  }
   0xb   : > { %v925_v0 = vld [vmem:[%s1091_s1 + $0x8] sm:$0xff]   ;;  %v952_v1 = vmov 0.0   ;;  %v926_v2 = vld [vmem:[%s1091_s1] sm:$0xff]   ;;  %vm953_vm0 = vmmov 0   ;;  %s1096_s16 = smov (!%p185_p3, %s807_s16), 1  ;;  %vm219_vm1 = vcmask 261120  }
   0xc   : > { %848 = vmatprep.subr.bf16.mxu0 %v952_v1  ;;  %856 = vmatprep.subr.bf16.mxu1 %v952_v1  ;;  %v263_v3 = vld [vmem:[%s1093_s3] sm:$0xf]  ;;  %s812_s24 = sshll.u32 %s1096_s16, 2  ;;  %vm266_vm2 = vcmask 64512   ;;  %vm313_vm3 = vcmask 60416   ;;  %vm334_vm4 = vcmask 1043456  }
   0xd   : > { %849 = vmatpush3.bf16.msra.mxu0 %v925_v0  ;;  %852 = vmatprep.mubr.msk.bf16.mxu0 %vm953_vm0, %v952_v1  ;;  %v1012_v4 = vcombine.low %v263_v3, %v263_v3  ;;  %s188_s27 = scalar_lea.vmem %s1090_s0, %s812_s24  ;;  %v271_v7 = vsel %vm266_vm2, %v263_v3, 0  ;;  %v814_v8 = vld [vmem:[%s1092_s2] ss:$0 sm:$0xff]  ;;  %s813_s10 = sshll.u32 %s1096_s16, 1  ;;  %vm379_vm5 = vcmask 58368   ;;  %vm504_vm6 = vcmask 123968  }
   0xe   : > { %850 = vmatprep.subr.bf16.mxu0 %v952_v1  ;;  %858 = vmatprep.mubr.msk.bf16.mxu1 %vm953_vm0, %v952_v1  ;;  %v194_v5 = vld [vmem:[%s188_s27] sm:$0xf]  ;;  %s1081_s13 = scalar_lea.vmem %s1094_s4, %s813_s10  ;;  %s963_s16 = smov 16   ;;  %vm628_vm7 = vcmask 189568   ;;  %vm752_vm8 = vcmask 255168  }
   0xf   : > { %384 = vrot.lane.b32.xlu0 %v1012_v4, %s954_s23  ;;  %v195_v6 = vpack.c.bf16 %v194_v5, %v194_v5  ;;  %857 = vmatpush3.bf16.xpose.msra.mxu1 %v271_v7 }
  0x10   : > { %868 = vmatprep.subr.bf16.mxu1 %v952_v1  ;;  %508 = vrot.lane.b32.xlu1 %v1012_v4, %s955_s28 }
  0x11   : > { %851 = vmatpush3.bf16.msra.mxu0 %v926_v2 }
  0x12   : > { %862 = vmatprep.subr.bf16.mxu0 %v952_v1 }
  0x14   : > { %853 = vmatmul.mubr.msk.bf16.vlgmr.msra.gmra.mxu0 %vm219_vm1, %v195_v6 }
  0x15   : > { %864 = vmatprep.mubr.msk.bf16.mxu0 %vm953_vm0, %v952_v1 }
  0x81   : > { %v385_v13 = vpop.permute.xlu0 %384 }
  0x82   : > { %v390_v17 = vsel %vm266_vm2, %v385_v13, 0  ;;  %v509_v18 = vpop.permute.xlu1 %508 }
  0x83   : > { %v514_v19 = vsel %vm266_vm2, %v509_v18, 0 }
  0xd4   : > { %v257_v9 = vpop.f32.mrf.mxu0 }
  0xd5   : > { %v258_v10 = vadd.f32 %v814_v8, %v257_v9 }
  0xd6   : > { %v854_v11 = vpop.f32.mrf.mxu0 }
  0xd7   : > { %v264_v12 = vmul.f32 0.35355338, %v258_v10 }
  0xd8   : > { %v260_v14 = vpop.f32.mrf.mxu0 }
  0xd9   : > { %v265_v15 = vpack.c.bf16 %v264_v12, %v264_v12 }
  0xda   : > { %v855_v16 = vpop.f32.mrf.mxu0 }
  0xdb   : > { %506 = vrot.lane.b32.xlu1 %v265_v15, %s955_s28  ;;  %382 = vrot.lane.b32.xlu0 %v265_v15, %s954_s23 }
  0xdc   : > { %859 = vmatmul.mubr.msk.bf16.vlgmr.msra.gmra.mxu1 %vm266_vm2, %v265_v15 }
  0xdd   : > { %869 = vmatpush3.bf16.xpose.msra.mxu1 %v390_v17  ;;  %870 = vmatprep.mubr.msk.bf16.mxu1 %vm953_vm0, %v952_v1 }
  0xde   : > { %880 = vmatprep.subr.bf16.mxu1 %v952_v1 }
  0xdf   : > { %630 = vrot.lane.b32.xlu1 %v265_v15, %s956_s5  ;;  %632 = vrot.lane.b32.xlu0 %v1012_v4, %s956_s5 }
 0x14d   : > { %v383_v20 = vpop.permute.xlu0 %382  ;;  %v507_v23 = vpop.permute.xlu1 %506 }
 0x14e   : > { %871 = vmatmul.mubr.msk.bf16.vlgmr.msra.gmra.mxu1 %vm266_vm2, %v383_v20 }
 0x14f   : > { %881 = vmatpush3.bf16.xpose.msra.mxu1 %v514_v19  ;;  %882 = vmatprep.mubr.msk.bf16.mxu1 %vm953_vm0, %v952_v1 }
 0x150   : > { %892 = vmatprep.subr.bf16.mxu1 %v952_v1 }
 0x151   : > { %v633_v21 = vpop.permute.xlu0 %632  ;;  %v631_v24 = vpop.permute.xlu1 %630 }
 0x152   : > { %v638_v22 = vsel %vm266_vm2, %v633_v21, 0 }
 0x156   : > { %883 = vmatmul.mubr.msk.bf16.vlgmr.msra.gmra.mxu1 %vm266_vm2, %v507_v23 }
 0x157   : > { %893 = vmatpush3.bf16.xpose.msra.mxu1 %v638_v22  ;;  %894 = vmatprep.mubr.msk.bf16.mxu1 %vm953_vm0, %v952_v1 }
 0x15e   : > { %895 = vmatmul.mubr.msk.bf16.vlgmr.msra.gmra.mxu1 %vm266_vm2, %v631_v24 }
 0x19c   : > { %v307_v25 = vpop.f32.mrf.mxu1 }
 0x19d   : > { %v314_v26 = vsel %vm313_vm3, %v307_v25, -inf }
 0x19e   : > { %315 = vmax.xlane.f32.xlu0 %v314_v26  ;;  %v860_v27 = vpop.f32.mrf.mxu1 }
 0x1a0   : > { %v310_v28 = vpop.f32.mrf.mxu1 }
 0x1a2   : > { %v861_v29 = vpop.f32.mrf.mxu1 }
 0x20e   : > { %v426_v30 = vpop.f32.mrf.mxu1 }
 0x20f   : > { %v432_v31 = vsel %vm313_vm3, %v426_v30, -inf }
 0x210   : > { %433 = vmax.xlane.f32.xlu1 %v432_v31  ;;  %v872_v32 = vpop.f32.mrf.mxu1  ;;  %v961_v31 = vmov 1983009808  }
 0x211   : > { %v497_v32 = vlaneseq }
 0x212   : > { %v429_v33 = vpop.f32.mrf.mxu1 }
 0x214   : > { %v873_v34 = vpop.f32.mrf.mxu1 }
 0x215   : > { %v498_v34 = vshrl.u32 %v497_v32, 7 }
 0x216   : > { %v550_v35 = vpop.f32.mrf.mxu1 }
 0x217   : > { %v556_v36 = vsel %vm313_vm3, %v550_v35, -inf }
 0x218   : > { %557 = vmax.xlane.f32.xlu0 %v556_v36  ;;  %v884_v37 = vpop.f32.mrf.mxu1 }
 0x21a   : > { %v553_v38 = vpop.f32.mrf.mxu1 }
 0x21c   : > { %v885_v39 = vpop.f32.mrf.mxu1 }
 0x21e   : > { %v674_v40 = vpop.f32.mrf.mxu1 }
 0x21f   : > { %v680_v41 = vsel %vm313_vm3, %v674_v40, -inf }
 0x220   : > { %681 = vmax.xlane.f32.xlu0 %v680_v41  ;;  %v896_v42 = vpop.f32.mrf.mxu1 }
 0x222   : > { %v677_v43 = vpop.f32.mrf.mxu1 }
 0x224   : > { %v897_v44 = vpop.f32.mrf.mxu1 }
 0x227   : > { %v316_v45 = vpop.xlane.xlu0 %315 }
 0x228   : > { %v317_v46 = vsub.f32 %v307_v25, %v316_v45 }
 0x22a   : > { %v318_v47 = vmul.f32 1.442695, %v317_v46 }
 0x22c   : > { %928 = vpow2.f32 %v318_v47 }
 0x239   : > { %v929_v48 = vpop.eup %928 }
 0x23a   : > { %v320_v49 = vsel %vm313_vm3, %v929_v48, 0.0 }
 0x23b   : > { %321 = vadd.xlane.f32.xlu1 %v320_v49 }
 0x24c   : > { %329 = vrot.lane.b32.xlu1 %v1012_v4, %s957_s6 }
 0x299   : > { %v434_v50 = vpop.xlane.xlu1 %433 }
 0x29a   : > { %v435_v51 = vsub.f32 %v426_v30, %v434_v50 }
 0x29c   : > { %v436_v52 = vmul.f32 1.442695, %v435_v51 }
 0x29e   : > { %930 = vpow2.f32 %v436_v52 }
 0x2a1   : > { %v558_v53 = vpop.xlane.xlu0 %557 }
 0x2a2   : > { %v559_v54 = vsub.f32 %v550_v35, %v558_v53 }
 0x2a4   : > { %v560_v55 = vmul.f32 1.442695, %v559_v54 }
 0x2a6   : > { %932 = vpow2.f32 %v560_v55 }
 0x2a9   : > { %v682_v56 = vpop.xlane.xlu0 %681 }
 0x2aa   : > { %v683_v57 = vsub.f32 %v674_v40, %v682_v56 }
 0x2ab   : > { %v931_v58 = vpop.eup %930 }
 0x2ac   : > { %v684_v59 = vmul.f32 1.442695, %v683_v57  ;;  %v438_v60 = vsel %vm313_vm3, %v931_v58, 0.0 }
 0x2ad   : > { %439 = vadd.xlane.f32.xlu0 %v438_v60 }
 0x2ae   : > { %934 = vpow2.f32 %v684_v59 }
 0x2b3   : > { %v933_v61 = vpop.eup %932 }
 0x2b4   : > { %v562_v62 = vsel %vm313_vm3, %v933_v61, 0.0 }
 0x2b5   : > { %563 = vadd.xlane.f32.xlu1 %v562_v62 }
 0x2bb   : > { %v935_v63 = vpop.eup %934 }
 0x2bc   : > { %v686_v0 = vsel %vm313_vm3, %v935_v63, 0.0 }
 0x2bd   : > { %687 = vadd.xlane.f32.xlu0 %v686_v0 }
 0x2c4   : > { %v322_v2 = vpop.xlane.xlu1 %321 }
 0x2c5   : > { %936 = vrcp.f32 %v322_v2 }
 0x2c6   : > { %568 = vrot.lane.b32.xlu1 %v1012_v4, %s958_s7 }
 0x2c8   : > { %v330_v3 = vpop.permute.xlu1 %329 }
 0x2c9   : > { %v336_v5 = vsel %vm334_vm4, %v330_v3, 0 }
 0x2ca   : > { %863 = vmatpush3.bf16.msra.mxu0 %v336_v5  ;;  %692 = vrot.lane.b32.xlu1 %v1012_v4, %s959_s8 }
 0x2cb   : > { %874 = vmatprep.subr.bf16.mxu0 %v952_v1 }
 0x2d2   : > { %v937_v6 = vpop.eup %936 }
 0x2d3   : > { %v324_v7 = vmul.f32 %v937_v6, %v929_v48  ;;  %444 = vrot.lane.b32.xlu0 %v1012_v4, %s960_s9 }
 0x2d5   : > { %v325_v8 = vpack.c.bf16 %v324_v7, %v324_v7 }
 0x2d7   : > { %865 = vmatmul.mubr.msk.bf16.vlgmr.msra.gmra.mxu0 %vm266_vm2, %v325_v8 }
 0x2d8   : > { %876 = vmatprep.mubr.msk.bf16.mxu0 %vm953_vm0, %v952_v1 }
 0x336   : > { %v440_v9 = vpop.xlane.xlu0 %439 }
 0x337   : > { %938 = vrcp.f32 %v440_v9 }
 0x33e   : > { %v564_v10 = vpop.xlane.xlu1 %563 }
 0x33f   : > { %940 = vrcp.f32 %v564_v10 }
 0x342   : > { %v569_v15 = vpop.permute.xlu1 %568 }
 0x343   : > { %v574_v17 = vsel %vm334_vm4, %v569_v15, 0 }
 0x344   : > { %v939_v11 = vpop.eup %938 }
 0x345   : > { %v442_v13 = vmul.f32 %v939_v11, %v931_v58 }
 0x346   : > { %v688_v12 = vpop.xlane.xlu0 %687  ;;  %v693_v20 = vpop.permute.xlu1 %692 }
 0x347   : > { %942 = vrcp.f32 %v688_v12  ;;  %v443_v4 = vpack.c.bf16 %v442_v13, %v442_v13  ;;  %v698_v22 = vsel %vm334_vm4, %v693_v20, 0 }
 0x34a   : > { %v445_v14 = vpop.permute.xlu0 %444 }
 0x34b   : > { %v450_v16 = vsel %vm334_vm4, %v445_v14, 0 }
 0x34c   : > { %875 = vmatpush3.bf16.msra.mxu0 %v450_v16  ;;  %v941_v18 = vpop.eup %940 }
 0x34d   : > { %886 = vmatprep.subr.bf16.mxu0 %v952_v1  ;;  %v566_v19 = vmul.f32 %v941_v18, %v933_v61 }
 0x34f   : > { %877 = vmatmul.mubr.msk.bf16.vlgmr.msra.gmra.mxu0 %vm266_vm2, %v443_v4  ;;  %v567_v21 = vpack.c.bf16 %v566_v19, %v566_v19 }
 0x350   : > { %887 = vmatpush3.bf16.msra.mxu0 %v574_v17  ;;  %888 = vmatprep.mubr.msk.bf16.mxu0 %vm953_vm0, %v952_v1 }
 0x351   : > { %898 = vmatprep.subr.bf16.mxu0 %v952_v1 }
 0x354   : > { %v943_v23 = vpop.eup %942 }
 0x355   : > { %v690_v24 = vmul.f32 %v943_v23, %v935_v63 }
 0x357   : > { %889 = vmatmul.mubr.msk.bf16.vlgmr.msra.gmra.mxu0 %vm266_vm2, %v567_v21  ;;  %v691_v25 = vpack.c.bf16 %v690_v24, %v690_v24 }
 0x358   : > { %899 = vmatpush3.bf16.msra.mxu0 %v698_v22  ;;  %900 = vmatprep.mubr.msk.bf16.mxu0 %vm953_vm0, %v952_v1  ;;  %v495_v1 = vunpack.c.l.s4 %v961_v31 }
 0x35a   : > { %v496_v33 = vunpack.c.0.s8 %v495_v1 }
 0x35c   : > { %v499_v35 = vsub.s32 %v496_v33, %v498_v34 }
 0x35f   : > { %901 = vmatmul.mubr.msk.bf16.vlgmr.msra.gmra.mxu0 %vm266_vm2, %v691_v25 }
 0x397   : > { %v372_v26 = vpop.f32.mrf.mxu0 }
 0x398   : > { %v378_v27 = vpack.c.bf16 %v372_v26, %v372_v26 }
 0x399   : > { %v866_v28 = vpop.f32.mrf.mxu0 }
 0x39a   : > { %380 = vst.msk [vmem:[%s1081_s13] sm:$0x3] %vm379_vm5, %v378_v27 }
 0x39b   : > { %v375_v29 = vpop.f32.mrf.mxu0 }
 0x39d   : > { %v867_v30 = vpop.f32.mrf.mxu0 }
 0x40f   : > { %v486_v36 = vpop.f32.mrf.mxu0 }
 0x410   : > { %v492_v37 = vpack.c.bf16 %v486_v36, %v486_v36 }
 0x411   : > { %v878_v38 = vpop.f32.mrf.mxu0 }
 0x412   : > { %v500_v39 = vrot.slane %v492_v37, %v499_v35 }
 0x413   : > { %v489_v40 = vpop.f32.mrf.mxu0 }
 0x414   : > { %501 = vrot.lane.b32.xlu0 %v500_v39, %s962_s14 }
 0x415   : > { %v879_v41 = vpop.f32.mrf.mxu0 }
 0x417   : > { %v610_v42 = vpop.f32.mrf.mxu0 }
 0x418   : > { %v616_v43 = vpack.c.bf16 %v610_v42, %v610_v42 }
 0x419   : > { %v890_v44 = vpop.f32.mrf.mxu0 }
 0x41a   : > { %v624_v45 = vrot.slane %v616_v43, %v499_v35 }
 0x41b   : > { %v613_v46 = vpop.f32.mrf.mxu0 }
 0x41c   : > { %625 = vrot.lane.b32.xlu1 %v624_v45, %s963_s16 }
 0x41d   : > { %v891_v47 = vpop.f32.mrf.mxu0 }
 0x41f   : > { %v734_v48 = vpop.f32.mrf.mxu0 }
 0x420   : > { %v740_v49 = vpack.c.bf16 %v734_v48, %v734_v48 }
 0x421   : > { %v902_v50 = vpop.f32.mrf.mxu0 }
 0x422   : > { %v748_v51 = vrot.slane %v740_v49, %v499_v35 }
 0x423   : > { %v737_v52 = vpop.f32.mrf.mxu0 }
 0x424   : > { %749 = vrot.lane.b32.xlu0 %v748_v51, %s964_s17 }
 0x425   : > { %v903_v53 = vpop.f32.mrf.mxu0 }
 0x486   : > { %v502_v54 = vpop.permute.xlu0 %501 }
 0x487   : > { %505 = vst.msk [vmem:[%s1081_s13] sm:$0x3] %vm504_vm6, %v502_v54 }
 0x48e   : > { %v626_v55 = vpop.permute.xlu1 %625 }
 0x48f   : > { %629 = vst.msk [vmem:[%s1081_s13] sm:$0x3] %vm628_vm7, %v626_v55 }
 0x496   : > { %v750_v56 = vpop.permute.xlu0 %749 }
 0x497   : > { %753 = vst.msk [vmem:[%s1081_s13] sm:$0x3] %vm752_vm8, %v750_v56 }
 0x498 PF: > { %s14_s15 = sadd.s32 1, %s950_s15  }
 0x499   : > { %p11_p4 = scmp.ge.s32.totalorder %s14_s15, 4  }
 0x49b   :  { %13 = sbr.rel (!%p11_p4) target bundleno = 1 (0x1), region = 66 }

// kernel: forecast.47
= control target key start
LH: loop header
LB: loop body
LE: loop exit
PB: predicated region body
PF: predicated region fallthrough
CT: control target
= control target key end

     0   :  { %s413_s18 = smov 0   ;;  %s446_s0 = inlined_call_operand.vmem [shape: f32[2,4,32], index: 0, kind: input, shape index: {}]   ;;  %s447_s1 = inlined_call_operand.vmem [shape: f32[1,4,32], index: 1, kind: input, shape index: {}]   ;;  %s448_s2 = inlined_call_operand.vmem [shape: f32[1,1,32], index: 2, kind: input, shape index: {}]   ;;  %s449_s3 = inlined_call_operand.vmem [shape: f32[1,1,32], index: 3, kind: input, shape index: {}]   ;;  %s450_s4 = inlined_call_operand.vmem [shape: f32[2,4,32], index: 4, kind: output, shape index: {0}]   ;;  %s451_s5 = inlined_call_operand.vmem [shape: bf16[2,4,32], index: 5, kind: output, shape index: {1}]  }
   0x1 LB: > { %s353_s19 = sadd.s32 4294967295, %s381_s18   ;;  %p357_p0 = scmp.ge.s32.totalorder %s381_s18, 1  ;;  %s381_s18 = sphi %s413_s18, %s16_s18  }
   0x2   : > { %p189_p1 = scmp.lt.s32.totalorder %s381_s18, 3 }
   0x4   : > { %p190_p2 = pnand %p357_p0, %p189_p1 }
   0x5   : > { %p219_p3 = scmp.lt.s32.totalorder (!%p190_p2), %s353_s19, 1 }
   0x6   : > { %193 = sbr.rel (%p190_p2) target bundleno = 328 (0x148), region = 36 }
   0xb   : > { %s453_s19 = smov (!%p219_p3, %s353_s19), 1  ;;  %v232_v0 = vld [vmem:[%s447_s1] sm:$0xf]  ;;  %vm234_vm0 = vcmask 257024   ;;  %vm267_vm1 = vcmask 254976  }
   0xc   : > { %s358_s20 = sshll.u32 %s453_s19, 2  ;;  %v361_v13 = vld [vmem:[%s448_s2] ss:$0 sm:$0xff]  ;;  %s360_s8 = sshll.u32 %s453_s19, 1 }
   0xd   : > { %s222_s25 = scalar_lea.vmem %s446_s0, %s358_s20  ;;  %s226_s28 = scalar_lea.vmem %s450_s4, %s358_s20  ;;  %v362_v15 = vld [vmem:[%s449_s3] ss:$0 sm:$0xff] }
   0xe   : > { %v231_v1 = vld [vmem:[%s222_s25] sm:$0xf]  ;;  %s230_s11 = scalar_lea.vmem %s451_s5, %s360_s8 }
   0xf   : > { %v233_v2 = vadd.f32 %v232_v0, %v231_v1 }
  0x11   : > { %v236_v3 = vsel %vm234_vm0, %v233_v2, 0.0  ;;  %235 = vst.msk [vmem:[%s226_s28] sm:$0xf] %vm234_vm0, %v233_v2 }
  0x12   : > { %237 = vadd.xlane.f32.xlu0 %v236_v3 }
  0x9b   : > { %v238_v4 = vpop.xlane.xlu0 %237 }
  0x9c   : > { %v240_v5 = vmul.f32 0.03125, %v238_v4 }
  0x9e   : > { %v241_v6 = vsub.f32 %v233_v2, %v240_v5 }
  0xa0   : > { %v242_v7 = vmul.f32 %v241_v6, %v241_v6 }
  0xa2   : > { %v243_v8 = vsel %vm234_vm0, %v242_v7, 0.0 }
  0xa3   : > { %244 = vadd.xlane.f32.xlu0 %v243_v8 }
 0x12c   : > { %v245_v9 = vpop.xlane.xlu0 %244 }
 0x12d   : > { %v246_v10 = vmul.f32 0.03125, %v245_v9 }
 0x12f   : > { %v247_v11 = vadd.f32 1e-05, %v246_v10 }
 0x131   : > { %373 = vrsqrt.f32 %v247_v11 }
 0x13e   : > { %v374_v12 = vpop.eup %373 }
 0x13f   : > { %v249_v14 = vmul.f32 %v374_v12, %v241_v6 }
 0x141   : > { %v257_v16 = vmul.f32 %v361_v13, %v249_v14 }
 0x143   : > { %v265_v17 = vadd.f32 %v362_v15, %v257_v16 }
 0x145   : > { %v266_v18 = vpack.c.bf16 %v265_v17, %v265_v17 }
 0x147   : > { %268 = vst.msk [vmem:[%s230_s11] sm:$0x3] %vm267_vm1, %v266_v18 }
 0x148 PF: > { %s16_s18 = sadd.s32 1, %s381_s18  }
 0x149   : > { %p13_p4 = scmp.ge.s32.totalorder %s16_s18, 4  }
 0x14b   :  { %15 = sbr.rel (!%p13_p4) target bundleno = 1 (0x1), region = 78 }

// kernel: forecast.49
= control target key start
LH: loop header
LB: loop body
LE: loop exit
PB: predicated region body
PF: predicated region fallthrough
CT: control target
= control target key end

     0   :  { %v161_v0 = vmov 0.0   ;;  %vm162_vm0 = vmmov 0   ;;  %vm50_vm1 = vcmask 261120   ;;  %vm128_vm2 = vcmask 257024   ;;  %s234_s1 = inlined_call_operand.vmem [shape: bf16[32,32], index: 1, kind: input, shape index: {}]   ;;  %s235_s0 = inlined_call_operand.vmem [shape: bf16[8,32], index: 0, kind: input, shape index: {}]   ;;  %s236_s2 = inlined_call_operand.vmem [shape: f32[1,32], index: 2, kind: input, shape index: {}]   ;;  %s237_s3 = inlined_call_operand.vmem [shape: f32[8,32], index: 3, kind: input, shape index: {}]   ;;  %s238_s6 = inlined_call_operand.vmem [shape: f32[8,32], index: 6, kind: output, shape index: {0}]   ;;  %s239_s4 = inlined_call_operand.vmem [shape: f32[1,32], index: 4, kind: input, shape index: {}]   ;;  %s240_s5 = inlined_call_operand.vmem [shape: f32[1,32], index: 5, kind: input, shape index: {}]   ;;  %s241_s7 = inlined_call_operand.vmem [shape: bf16[8,32], index: 7, kind: output, shape index: {1}]  }
   0x1   :  { %147 = vmatprep.subr.bf16.mxu0 %v161_v0  ;;  %v157_v1 = vld [vmem:[%s234_s1 + $0x8] sm:$0xff]   ;;  %151 = vmatprep.mubr.msk.bf16.mxu0 %vm162_vm0, %v161_v0  ;;  %v158_v2 = vld [vmem:[%s234_s1] sm:$0xff]  }
   0x2   :  { %148 = vmatpush3.bf16.msra.mxu0 %v157_v1  ;;  %v26_v3 = vld [vmem:[%s235_s0] sm:$0xf] }
   0x3   :  { %149 = vmatprep.subr.bf16.mxu0 %v161_v0  ;;  %v138_v4 = vld [vmem:[%s236_s2] ss:$0 sm:$0xff] }
   0x4   :  { %v94_v6 = vld [vmem:[%s237_s3] sm:$0xff] }
   0x5   :  { %v142_v22 = vld [vmem:[%s239_s4] ss:$0 sm:$0xff] }
   0x6   :  { %150 = vmatpush3.bf16.msra.mxu0 %v158_v2  ;;  %v143_v24 = vld [vmem:[%s240_s5] ss:$0 sm:$0xff] }
   0x9   :  { %152 = vmatmul.mubr.msk.bf16.vlgmr.msra.gmra.mxu0 %vm50_vm1, %v26_v3 }
  0xc9   :  { %v88_v5 = vpop.f32.mrf.mxu0 }
  0xca   :  { %v89_v7 = vadd.f32 %v138_v4, %v88_v5 }
  0xcb   :  { %v153_v8 = vpop.f32.mrf.mxu0 }
  0xcc   :  { %v95_v9 = vadd.f32 %v94_v6, %v89_v7 }
  0xcd   :  { %v91_v10 = vpop.f32.mrf.mxu0 }
  0xce   :  { %96 = vst.msk [vmem:[%s238_s6] sm:$0xff] %vm50_vm1, %v95_v9  ;;  %v97_v11 = vsel %vm50_vm1, %v95_v9, 0.0 }
  0xcf   :  { %98 = vadd.xlane.f32.xlu0 %v97_v11  ;;  %v154_v12 = vpop.f32.mrf.mxu0 }
 0x158   :  { %v99_v13 = vpop.xlane.xlu0 %98 }
 0x159   :  { %v101_v14 = vmul.f32 0.03125, %v99_v13 }
 0x15b   :  { %v102_v15 = vsub.f32 %v95_v9, %v101_v14 }
 0x15d   :  { %v103_v16 = vmul.f32 %v102_v15, %v102_v15 }
 0x15f   :  { %v104_v17 = vsel %vm50_vm1, %v103_v16, 0.0 }
 0x160   :  { %105 = vadd.xlane.f32.xlu0 %v104_v17 }
 0x1e9   :  { %v106_v18 = vpop.xlane.xlu0 %105 }
 0x1ea   :  { %v107_v19 = vmul.f32 0.03125, %v106_v18 }
 0x1ec   :  { %v108_v20 = vadd.f32 1e-05, %v107_v19 }
 0x1ee   :  { %159 = vrsqrt.f32 %v108_v20 }
 0x1fb   :  { %v160_v21 = vpop.eup %159 }
 0x1fc   :  { %v110_v23 = vmul.f32 %v160_v21, %v102_v15 }
 0x1fe   :  { %v118_v25 = vmul.f32 %v142_v22, %v110_v23 }
 0x200   :  { %v126_v26 = vadd.f32 %v143_v24, %v118_v25 }
 0x202   :  { %v127_v27 = vpack.c.bf16 %v126_v26, %v126_v26 }
 0x204   :  { %129 = vst.msk [vmem:[%s241_s7] sm:$0xf] %vm128_vm2, %v127_v27 }

// kernel: forecast.48
= control target key start
LH: loop header
LB: loop body
LE: loop exit
PB: predicated region body
PF: predicated region fallthrough
CT: control target
= control target key end

     0   :  { %s972_s12 = smov 0   ;;  %s1077_s0 = inlined_call_operand.vmem [shape: bf16[2,4,32], index: 0, kind: input, shape index: {}]   ;;  %s1078_s1 = inlined_call_operand.vmem [shape: bf16[32,96], index: 1, kind: input, shape index: {}]   ;;  %s1079_s2 = inlined_call_operand.vmem [shape: f32[1,96], index: 2, kind: input, shape index: {}]   ;;  %s1080_s3 = inlined_call_operand.vmem [shape: bf16[2,4,32], index: 3, kind: output, shape index: {}]  }
   0x1 LB: > { %s786_s13 = sadd.s32 4294967295, %s932_s12   ;;  %p790_p0 = scmp.ge.s32.totalorder %s932_s12, 1  ;;  %s932_s12 = sphi %s972_s12, %s13_s12  }
   0x2   : > { %p136_p1 = scmp.lt.s32.totalorder %s932_s12, 3 }
   0x4   : > { %p137_p2 = pnand %p790_p0, %p136_p1 }
   0x5   : > { %p158_p3 = scmp.lt.s32.totalorder (!%p137_p2), %s786_s13, 1  ;;  %s936_s24 = smov (!%p137_p2), 96  }
   0x6   : > { %140 = sbr.rel (%p137_p2) target bundleno = 1223 (0x4c7), region = 32  ;;  %s937_s25 = smov (!%p137_p2), 120  }
   0x7   : > { %s938_s26 = smov (!%p137_p2), 88   ;;  %s939_s27 = smov (!%p137_p2), 80  }
   0x8   : > { %s940_s28 = smov (!%p137_p2), 112   ;;  %s941_s29 = smov (!%p137_p2), 72  }
   0x9   : > { %s942_s30 = smov (!%p137_p2), 104   ;;  %s944_s4 = smov (!%p137_p2), 56  }
   0xa   : > { %s945_s5 = smov (!%p137_p2), 64   ;;  %s946_s6 = smov (!%p137_p2), 40  }
   0xb   : > { %v908_v0 = vld [vmem:[%s1078_s1 + $0x8] sm:$0xff]   ;;  %v934_v1 = vmov 0.0   ;;  %v909_v2 = vld [vmem:[%s1078_s1] sm:$0xff]   ;;  %vm935_vm0 = vmmov 0   ;;  %s1082_s13 = smov (!%p158_p3, %s786_s13), 1  ;;  %vm191_vm1 = vcmask 261120   ;;  %v235_v24 = vlaneseq }
   0xc   : > { %826 = vmatprep.subr.bf16.mxu0 %v934_v1  ;;  %834 = vmatprep.subr.bf16.mxu1 %v934_v1  ;;  %s791_s18 = sshll.u32 %s1082_s13, 1  ;;  %v793_v4 = vld [vmem:[%s1079_s2] ss:$0 sm:$0xff]  ;;  %vm247_vm2 = vcmask 64512   ;;  %v943_v27 = vmov -1.7014117e+38  }
   0xd   : > { %827 = vmatpush3.bf16.msra.mxu0 %v908_v0  ;;  %830 = vmatprep.mubr.msk.bf16.mxu0 %vm935_vm0, %v934_v1  ;;  %s161_s21 = scalar_lea.vmem %s1077_s0, %s791_s18  ;;  %v1030_v25 = vshrl.u32 %v235_v24, 7  ;;  %v238_v26 = vand.u32 127, %v235_v24  ;;  %vm294_vm4 = vcmask 27648   ;;  %s947_s7 = smov 48   ;;  %vm313_vm5 = vcmask 1041408  }
   0xe   : > { %828 = vmatprep.subr.bf16.mxu0 %v934_v1  ;;  %836 = vmatprep.mubr.msk.bf16.mxu1 %vm935_vm0, %v934_v1  ;;  %v167_v3 = vld [vmem:[%s161_s21] sm:$0x3]  ;;  %vm309_vm6 = vcmask 31744   ;;  %s1067_s10 = scalar_lea.vmem %s1080_s3, %s791_s18  ;;  %vm358_vm7 = vcmask 58368   ;;  %s949_s11 = smov 8   ;;  %vm483_vm8 = vcmask 123968  }
   0xf   : > { %vm239_vm3 = vcmp.le.s32.totalorder %v238_v26, %v1030_v25  ;;  %s950_s13 = smov 16   ;;  %s951_s14 = smov 24   ;;  %vm607_vm9 = vcmask 189568   ;;  %vm731_vm10 = vcmask 255168  }
  0x10   : > { %v240_v28 = vsel %vm239_vm3, 0.0, %v943_v27 }
  0x11   : > { %829 = vmatpush3.bf16.msra.mxu0 %v909_v2 }
  0x12   : > { %840 = vmatprep.subr.bf16.mxu0 %v934_v1 }
  0x14   : > { %831 = vmatmul.mubr.msk.bf16.vlgmr.msra.gmra.mxu0 %vm191_vm1, %v167_v3 }
  0x15   : > { %842 = vmatprep.mubr.msk.bf16.mxu0 %vm935_vm0, %v934_v1 }
  0xd4   : > { %v229_v5 = vpop.f32.mrf.mxu0 }
  0xd5   : > { %v230_v6 = vadd.f32 %v793_v4, %v229_v5 }
  0xd6   : > { %v832_v7 = vpop.f32.mrf.mxu0 }
  0xd7   : > { %v241_v8 = vmul.f32 0.35355338, %v230_v6  ;;  %v1007_v9 = vpack.c.bf16 %v230_v6, %v230_v6 }
  0xd8   : > { %v232_v10 = vpop.f32.mrf.mxu0 }
  0xd9   : > { %v242_v11 = vpack.c.bf16 %v241_v8, %v241_v8  ;;  %245 = vrot.lane.b32.xlu0 %v1007_v9, %s936_s24 }
  0xda   : > { %v833_v12 = vpop.f32.mrf.mxu0 }
  0xdb   : > { %361 = vrot.lane.b32.xlu1 %v242_v11, %s937_s25 }
  0xdd   : > { %363 = vrot.lane.b32.xlu0 %v1007_v9, %s938_s26 }
  0xdf   : > { %487 = vrot.lane.b32.xlu1 %v1007_v9, %s939_s27 }
  0xe1   : > { %485 = vrot.lane.b32.xlu0 %v242_v11, %s940_s28 }
  0xe3   : > { %611 = vrot.lane.b32.xlu1 %v1007_v9, %s941_s29 }
  0xe5   : > { %609 = vrot.lane.b32.xlu0 %v242_v11, %s942_s30 }
 0x14b   : > { %v246_v13 = vpop.permute.xlu0 %245 }
 0x14c   : > { %v252_v14 = vsel %vm247_vm2, %v246_v13, 0 }
 0x14d   : > { %835 = vmatpush3.bf16.xpose.msra.mxu1 %v252_v14  ;;  %v362_v16 = vpop.permute.xlu1 %361 }
 0x14e   : > { %846 = vmatprep.subr.bf16.mxu1 %v934_v1 }
 0x14f   : > { %v364_v15 = vpop.permute.xlu0 %363 }
 0x150   : > { %v369_v17 = vsel %vm247_vm2, %v364_v15, 0 }
 0x151   : > { %v488_v18 = vpop.permute.xlu1 %487 }
 0x152   : > { %v493_v19 = vsel %vm247_vm2, %v488_v18, 0 }
 0x153   : > { %v486_v21 = vpop.permute.xlu0 %485 }
 0x154   : > { %837 = vmatmul.mubr.msk.bf16.vlgmr.msra.gmra.mxu1 %vm247_vm2, %v242_v11 }
 0x155   : > { %847 = vmatpush3.bf16.xpose.msra.mxu1 %v369_v17  ;;  %848 = vmatprep.mubr.msk.bf16.mxu1 %vm935_vm0, %v934_v1  ;;  %v612_v20 = vpop.permute.xlu1 %611 }
 0x156   : > { %858 = vmatprep.subr.bf16.mxu1 %v934_v1  ;;  %v617_v22 = vsel %vm247_vm2, %v612_v20, 0 }
 0x157   : > { %v610_v23 = vpop.permute.xlu0 %609 }
 0x15c   : > { %849 = vmatmul.mubr.msk.bf16.vlgmr.msra.gmra.mxu1 %vm247_vm2, %v362_v16 }
 0x15d   : > { %859 = vmatpush3.bf16.xpose.msra.mxu1 %v493_v19  ;;  %860 = vmatprep.mubr.msk.bf16.mxu1 %vm935_vm0, %v934_v1 }
 0x15e   : > { %870 = vmatprep.subr.bf16.mxu1 %v934_v1 }
 0x164   : > { %861 = vmatmul.mubr.msk.bf16.vlgmr.msra.gmra.mxu1 %vm247_vm2, %v486_v21 }
 0x165   : > { %871 = vmatpush3.bf16.xpose.msra.mxu1 %v617_v22  ;;  %872 = vmatprep.mubr.msk.bf16.mxu1 %vm935_vm0, %v934_v1 }
 0x16c   : > { %873 = vmatmul.mubr.msk.bf16.vlgmr.msra.gmra.mxu1 %vm247_vm2, %v610_v23 }
 0x214   : > { %v288_v29 = vpop.f32.mrf.mxu1 }
 0x215   : > { %v289_v30 = vadd.f32 %v288_v29, %v240_v28 }
 0x216   : > { %v838_v31 = vpop.f32.mrf.mxu1 }
 0x217   : > { %v295_v32 = vsel %vm294_vm4, %v289_v30, -inf }
 0x218   : > { %296 = vmax.xlane.f32.xlu1 %v295_v32  ;;  %v291_v33 = vpop.f32.mrf.mxu1 }
 0x21a   : > { %v839_v34 = vpop.f32.mrf.mxu1 }
 0x21c   : > { %v405_v35 = vpop.f32.mrf.mxu1 }
 0x21d   : > { %v406_v36 = vadd.f32 %v405_v35, %v240_v28  ;;  %v948_v35 = vmov 1983009808  }
 0x21e   : > { %v850_v37 = vpop.f32.mrf.mxu1 }
 0x21f   : > { %v411_v38 = vsel %vm294_vm4, %v406_v36, -inf }
 0x220   : > { %412 = vmax.xlane.f32.xlu0 %v411_v38  ;;  %v408_v39 = vpop.f32.mrf.mxu1 }
 0x222   : > { %v851_v40 = vpop.f32.mrf.mxu1 }
 0x224   : > { %v529_v41 = vpop.f32.mrf.mxu1 }
 0x225   : > { %v530_v42 = vadd.f32 %v529_v41, %v240_v28 }
 0x226   : > { %v862_v43 = vpop.f32.mrf.mxu1 }
 0x227   : > { %v535_v44 = vsel %vm294_vm4, %v530_v42, -inf }
 0x228   : > { %536 = vmax.xlane.f32.xlu0 %v535_v44  ;;  %v532_v45 = vpop.f32.mrf.mxu1 }
 0x22a   : > { %v863_v46 = vpop.f32.mrf.mxu1 }
 0x22c   : > { %v653_v47 = vpop.f32.mrf.mxu1 }
 0x22d   : > { %v654_v48 = vadd.f32 %v653_v47, %v240_v28 }
 0x22e   : > { %v874_v49 = vpop.f32.mrf.mxu1 }
 0x22f   : > { %v659_v50 = vsel %vm294_vm4, %v654_v48, -inf }
 0x230   : > { %660 = vmax.xlane.f32.xlu1 %v659_v50  ;;  %v656_v51 = vpop.f32.mrf.mxu1 }
 0x232   : > { %v875_v52 = vpop.f32.mrf.mxu1 }
 0x2a1   : > { %v297_v53 = vpop.xlane.xlu1 %296 }
 0x2a2   : > { %v298_v54 = vsub.f32 %v289_v30, %v297_v53 }
 0x2a4   : > { %v299_v55 = vmul.f32 1.442695, %v298_v54 }
 0x2a6   : > { %910 = vpow2.f32 %v299_v55 }
 0x2a9   : > { %v413_v56 = vpop.xlane.xlu0 %412 }
 0x2aa   : > { %v414_v57 = vsub.f32 %v406_v36, %v413_v56  ;;  %v474_v36 = vunpack.c.l.s4 %v948_v35 }
 0x2ac   : > { %v415_v58 = vmul.f32 1.442695, %v414_v57 }
 0x2ae   : > { %912 = vpow2.f32 %v415_v58 }
 0x2b1   : > { %v537_v59 = vpop.xlane.xlu0 %536 }
 0x2b2   : > { %v538_v60 = vsub.f32 %v530_v42, %v537_v59 }
 0x2b3   : > { %v911_v61 = vpop.eup %910 }
 0x2b4   : > { %v539_v62 = vmul.f32 1.442695, %v538_v60  ;;  %v301_v63 = vsel %vm294_vm4, %v911_v61, 0.0 }
 0x2b5   : > { %302 = vadd.xlane.f32.xlu0 %v301_v63 }
 0x2b6   : > { %914 = vpow2.f32 %v539_v62 }
 0x2b9   : > { %v661_v5 = vpop.xlane.xlu1 %660 }
 0x2ba   : > { %v662_v6 = vsub.f32 %v654_v48, %v661_v5 }
 0x2bb   : > { %v913_v0 = vpop.eup %912 }
 0x2bc   : > { %v417_v2 = vsel %vm294_vm4, %v913_v0, 0.0  ;;  %v663_v7 = vmul.f32 1.442695, %v662_v6 }
 0x2bd   : > { %418 = vadd.xlane.f32.xlu1 %v417_v2 }
 0x2be   : > { %916 = vpow2.f32 %v663_v7 }
 0x2c3   : > { %v915_v3 = vpop.eup %914 }
 0x2c4   : > { %v541_v4 = vsel %vm294_vm4, %v915_v3, 0.0 }
 0x2c5   : > { %542 = vadd.xlane.f32.xlu0 %v541_v4 }
 0x2cb   : > { %v917_v8 = vpop.eup %916 }
 0x2cc   : > { %v665_v10 = vsel %vm294_vm4, %v917_v8, 0.0 }
 0x2ce   : > { %423 = vrot.lane.b32.xlu1 %v1007_v9, %s944_s4 }
 0x2db   : > { %307 = vrot.lane.b32.xlu0 %v1007_v9, %s945_s5 }
 0x2df   : > { %671 = vrot.lane.b32.xlu0 %v1007_v9, %s946_s6 }
 0x2f2   : > { %666 = vadd.xlane.f32.xlu1 %v665_v10 }
 0x303   : > { %547 = vrot.lane.b32.xlu1 %v1007_v9, %s947_s7 }
 0x33e   : > { %v303_v11 = vpop.xlane.xlu0 %302 }
 0x33f   : > { %918 = vrcp.f32 %v303_v11 }
 0x346   : > { %v419_v12 = vpop.xlane.xlu1 %418 }
 0x347   : > { %920 = vrcp.f32 %v419_v12 }
 0x34a   : > { %v424_v18 = vpop.permute.xlu1 %423 }
 0x34b   : > { %v429_v9 = vsel %vm313_vm5, %v424_v18, 0 }
 0x34c   : > { %v919_v13 = vpop.eup %918 }
 0x34d   : > { %v305_v15 = vmul.f32 %v919_v13, %v911_v61 }
 0x34e   : > { %v543_v14 = vpop.xlane.xlu0 %542 }
 0x34f   : > { %v306_v19 = vpack.c.bf16 %v305_v15, %v305_v15  ;;  %922 = vrcp.f32 %v543_v14 }
 0x352   : > { %v308_v16 = vpop.permute.xlu0 %307 }
 0x353   : > { %v315_v17 = vsel %vm313_vm5, %v308_v16, 0 }
 0x354   : > { %841 = vmatpush3.bf16.msra.mxu0 %v315_v17  ;;  %v921_v20 = vpop.eup %920 }
 0x355   : > { %852 = vmatprep.subr.bf16.mxu0 %v934_v1  ;;  %v421_v21 = vmul.f32 %v921_v20, %v913_v0 }
 0x356   : > { %v672_v29 = vpop.permute.xlu0 %671 }
 0x357   : > { %843 = vmatmul.mubr.msk.bf16.vlgmr.msra.gmra.mxu0 %vm309_vm6, %v306_v19  ;;  %v422_v22 = vpack.c.bf16 %v421_v21, %v421_v21  ;;  %v677_v31 = vsel %vm313_vm5, %v672_v29, 0 }
 0x358   : > { %853 = vmatpush3.bf16.msra.mxu0 %v429_v9  ;;  %854 = vmatprep.mubr.msk.bf16.mxu0 %vm935_vm0, %v934_v1 }
 0x359   : > { %864 = vmatprep.subr.bf16.mxu0 %v934_v1 }
 0x35c   : > { %v923_v23 = vpop.eup %922 }
 0x35d   : > { %v545_v26 = vmul.f32 %v923_v23, %v915_v3 }
 0x35f   : > { %855 = vmatmul.mubr.msk.bf16.vlgmr.msra.gmra.mxu0 %vm309_vm6, %v422_v22  ;;  %v546_v30 = vpack.c.bf16 %v545_v26, %v545_v26 }
 0x360   : > { %866 = vmatprep.mubr.msk.bf16.mxu0 %vm935_vm0, %v934_v1 }
 0x37b   : > { %v667_v24 = vpop.xlane.xlu1 %666 }
 0x37c   : > { %924 = vrcp.f32 %v667_v24 }
 0x37f   : > { %v548_v27 = vpop.permute.xlu1 %547 }
 0x380   : > { %v553_v28 = vsel %vm313_vm5, %v548_v27, 0 }
 0x381   : > { %865 = vmatpush3.bf16.msra.mxu0 %v553_v28 }
 0x382   : > { %876 = vmatprep.subr.bf16.mxu0 %v934_v1 }
 0x384   : > { %867 = vmatmul.mubr.msk.bf16.vlgmr.msra.gmra.mxu0 %vm309_vm6, %v546_v30 }
 0x385   : > { %877 = vmatpush3.bf16.msra.mxu0 %v677_v31  ;;  %878 = vmatprep.mubr.msk.bf16.mxu0 %vm935_vm0, %v934_v1  ;;  %v475_v1 = vunpack.c.0.s8 %v474_v36 }
 0x387   : > { %v478_v42 = vsub.s32 %v475_v1, %v1030_v25 }
 0x389   : > { %v925_v32 = vpop.eup %924 }
 0x38a   : > { %v669_v33 = vmul.f32 %v925_v32, %v917_v8 }
 0x38c   : > { %v670_v34 = vpack.c.bf16 %v669_v33, %v669_v33 }
 0x38e   : > { %879 = vmatmul.mubr.msk.bf16.vlgmr.msra.gmra.mxu0 %vm309_vm6, %v670_v34 }
 0x417   : > { %v351_v37 = vpop.f32.mrf.mxu0 }
 0x418   : > { %v357_v38 = vpack.c.bf16 %v351_v37, %v351_v37 }
 0x419   : > { %v844_v39 = vpop.f32.mrf.mxu0 }
 0x41a   : > { %359 = vst.msk [vmem:[%s1067_s10] sm:$0x3] %vm358_vm7, %v357_v38 }
 0x41b   : > { %v354_v40 = vpop.f32.mrf.mxu0 }
 0x41d   : > { %v845_v41 = vpop.f32.mrf.mxu0 }
 0x41f   : > { %v465_v43 = vpop.f32.mrf.mxu0 }
 0x420   : > { %v471_v44 = vpack.c.bf16 %v465_v43, %v465_v43 }
 0x421   : > { %v856_v45 = vpop.f32.mrf.mxu0 }
 0x422   : > { %v479_v46 = vrot.slane %v471_v44, %v478_v42 }
 0x423   : > { %v468_v47 = vpop.f32.mrf.mxu0 }
 0x424   : > { %480 = vrot.lane.b32.xlu1 %v479_v46, %s949_s11 }
 0x425   : > { %v857_v48 = vpop.f32.mrf.mxu0 }
 0x444   : > { %v589_v49 = vpop.f32.mrf.mxu0 }
 0x445   : > { %v595_v50 = vpack.c.bf16 %v589_v49, %v589_v49 }
 0x446   : > { %v868_v51 = vpop.f32.mrf.mxu0 }
 0x447   : > { %v603_v52 = vrot.slane %v595_v50, %v478_v42 }
 0x448   : > { %v592_v53 = vpop.f32.mrf.mxu0 }
 0x449   : > { %604 = vrot.lane.b32.xlu0 %v603_v52, %s950_s13 }
 0x44a   : > { %v869_v54 = vpop.f32.mrf.mxu0 }
 0x44e   : > { %v713_v55 = vpop.f32.mrf.mxu0 }
 0x44f   : > { %v719_v25 = vpack.c.bf16 %v713_v55, %v713_v55 }
 0x450   : > { %v880_v56 = vpop.f32.mrf.mxu0 }
 0x451   : > { %v727_v57 = vrot.slane %v719_v25, %v478_v42 }
 0x452   : > { %v716_v58 = vpop.f32.mrf.mxu0 }
 0x453   : > { %728 = vrot.lane.b32.xlu1 %v727_v57, %s951_s14 }
 0x454   : > { %v881_v59 = vpop.f32.mrf.mxu0 }
 0x496   : > { %v481_v60 = vpop.permute.xlu1 %480 }
 0x497   : > { %484 = vst.msk [vmem:[%s1067_s10] sm:$0x3] %vm483_vm8, %v481_v60 }
 0x4bb   : > { %v605_v61 = vpop.permute.xlu0 %604 }
 0x4bc   : > { %608 = vst.msk [vmem:[%s1067_s10] sm:$0x3] %vm607_vm9, %v605_v61 }
 0x4c5   : > { %v729_v62 = vpop.permute.xlu1 %728 }
 0x4c6   : > { %732 = vst.msk [vmem:[%s1067_s10] sm:$0x3] %vm731_vm10, %v729_v62 }
 0x4c7 PF: > { %s13_s12 = sadd.s32 1, %s932_s12  }
 0x4c8   : > { %p10_p4 = scmp.ge.s32.totalorder %s13_s12, 4  }
 0x4ca   :  { %12 = sbr.rel (!%p10_p4) target bundleno = 1 (0x1), region = 62 }

// kernel: forecast.50
= control target key start
LH: loop header
LB: loop body
LE: loop exit
PB: predicated region body
PF: predicated region fallthrough
CT: control target
= control target key end

     0   :  { %v119_v0 = vmov 0.0   ;;  %vm120_vm0 = vmmov 0   ;;  %vm39_vm1 = vcmask 261120   ;;  %s156_s1 = inlined_call_operand.vmem [shape: bf16[32,128], index: 1, kind: input, shape index: {}]   ;;  %s157_s0 = inlined_call_operand.vmem [shape: bf16[8,32], index: 0, kind: input, shape index: {}]   ;;  %s158_s2 = inlined_call_operand.vmem [shape: f32[1,128], index: 2, kind: input, shape index: {}]   ;;  %s159_s3 = inlined_call_operand.vmem [shape: bf16[8,128], index: 3, kind: output, shape index: {}]  }
   0x1   :  { %105 = vmatprep.subr.bf16.mxu0 %v119_v0  ;;  %v115_v1 = vld [vmem:[%s156_s1 + $0x8] sm:$0xff]   ;;  %109 = vmatprep.mubr.msk.bf16.mxu0 %vm120_vm0, %v119_v0  ;;  %v116_v2 = vld [vmem:[%s156_s1] sm:$0xff]  }
   0x2   :  { %106 = vmatpush3.bf16.msra.mxu0 %v115_v1  ;;  %v15_v3 = vld [vmem:[%s157_s0] sm:$0xf] }
   0x3   :  { %107 = vmatprep.subr.bf16.mxu0 %v119_v0  ;;  %v98_v4 = vld [vmem:[%s158_s2] ss:$0 sm:$0xff] }
   0x6   :  { %108 = vmatpush3.bf16.msra.mxu0 %v116_v2 }
   0x9   :  { %110 = vmatmul.mubr.msk.bf16.vlgmr.msra.gmra.mxu0 %vm39_vm1, %v15_v3 }
  0xc9   :  { %v77_v5 = vpop.f32.mrf.mxu0 }
  0xca   :  { %v78_v6 = vadd.f32 %v98_v4, %v77_v5 }
  0xcb   :  { %v111_v7 = vpop.f32.mrf.mxu0 }
  0xcc   :  { %v83_v8 = vmul.f32 %v78_v6, %v78_v6 }
  0xcd   :  { %v80_v9 = vpop.f32.mrf.mxu0 }
  0xce   :  { %v84_v10 = vmul.f32 %v83_v8, %v78_v6 }
  0xcf   :  { %v112_v11 = vpop.f32.mrf.mxu0 }
  0xd0   :  { %v85_v12 = vmul.f32 0.044715, %v84_v10 }
  0xd2   :  { %v86_v13 = vadd.f32 %v85_v12, %v78_v6 }
  0xd4   :  { %v87_v14 = vmul.f32 0.7978846, %v86_v13 }
  0xd6   :  { %117 = vtanh.f32 %v87_v14 }
  0xe3   :  { %v118_v15 = vpop.eup %117 }
  0xe4   :  { %v89_v16 = vadd.f32 1.0, %v118_v15 }
  0xe6   :  { %v90_v17 = vmul.f32 0.5, %v89_v16 }
  0xe8   :  { %v91_v18 = vmul.f32 %v90_v17, %v78_v6 }
  0xea   :  { %v92_v19 = vpack.c.bf16 %v91_v18, %v91_v18 }
  0xec   :  { %93 = vst [vmem:[%s159_s3] sm:$0xf] %v92_v19 }

// kernel: forecast.42
= control target key start
LH: loop header
LB: loop body
LE: loop exit
PB: predicated region body
PF: predicated region fallthrough
CT: control target
= control target key end

     0   :  { %v235_v0 = vmov 0.0   ;;  %vm236_vm0 = vmmov 0   ;;  %vm140_vm1 = vcmask 261120   ;;  %vm173_vm2 = vcmask 257024   ;;  %s322_s1 = inlined_call_operand.vmem [shape: bf16[128,32], index: 1, kind: input, shape index: {}]   ;;  %s323_s0 = inlined_call_operand.vmem [shape: bf16[8,128], index: 0, kind: input, shape index: {}]   ;;  %s324_s2 = inlined_call_operand.vmem [shape: f32[1,32], index: 2, kind: input, shape index: {}]   ;;  %s325_s3 = inlined_call_operand.vmem [shape: f32[8,32], index: 3, kind: input, shape index: {}]   ;;  %s326_s6 = inlined_call_operand.vmem [shape: f32[8,32], index: 6, kind: output, shape index: {0}]   ;;  %s327_s4 = inlined_call_operand.vmem [shape: f32[1,32], index: 4, kind: input, shape index: {}]   ;;  %s328_s5 = inlined_call_operand.vmem [shape: f32[1,32], index: 5, kind: input, shape index: {}]   ;;  %s329_s7 = inlined_call_operand.vmem [shape: bf16[8,32], index: 7, kind: output, shape index: {1}]  }
   0x1   :  { %203 = vmatprep.subr.bf16.mxu0 %v235_v0  ;;  %v225_v1 = vld [vmem:[%s322_s1 + $0x38] sm:$0xff]   ;;  %219 = vmatprep.mubr.msk.bf16.mxu0 %vm236_vm0, %v235_v0  ;;  %v226_v2 = vld [vmem:[%s322_s1 + $0x30] sm:$0xff]   ;;  %v227_v3 = vld [vmem:[%s322_s1 + $0x28] sm:$0xff]  }
   0x2   :  { %204 = vmatpush3.bf16.msra.mxu0 %v225_v1  ;;  %v228_v4 = vld [vmem:[%s322_s1 + $0x20] sm:$0xff]   ;;  %v229_v5 = vld [vmem:[%s322_s1 + $0x18] sm:$0xff]   ;;  %v230_v6 = vld [vmem:[%s322_s1 + $0x10] sm:$0xff]  }
   0x3   :  { %205 = vmatprep.subr.bf16.mxu0 %v235_v0  ;;  %v231_v7 = vld [vmem:[%s322_s1 + $0x8] sm:$0xff]   ;;  %v232_v8 = vld [vmem:[%s322_s1] sm:$0xff]  }
   0x4   :  { %v26_v9 = vld [vmem:[%s323_s0] sm:$0xf] }
   0x5   :  { %v183_v10 = vld [vmem:[%s324_s2] ss:$0 sm:$0xff] }
   0x6   :  { %206 = vmatpush3.bf16.msra.mxu0 %v226_v2  ;;  %v138_v12 = vld [vmem:[%s325_s3] sm:$0xff] }
   0x7   :  { %207 = vmatprep.subr.bf16.mxu0 %v235_v0  ;;  %v192_v28 = vld [vmem:[%s327_s4] ss:$0 sm:$0xff] }
   0x8   :  { %v193_v30 = vld [vmem:[%s328_s5] ss:$0 sm:$0xff] }
   0xa   :  { %208 = vmatpush3.bf16.msra.mxu0 %v227_v3 }
   0xb   :  { %209 = vmatprep.subr.bf16.mxu0 %v235_v0 }
   0xe   :  { %210 = vmatpush3.bf16.msra.mxu0 %v228_v4 }
   0xf   :  { %211 = vmatprep.subr.bf16.mxu0 %v235_v0 }
  0x12   :  { %212 = vmatpush3.bf16.msra.mxu0 %v229_v5 }
  0x13   :  { %213 = vmatprep.subr.bf16.mxu0 %v235_v0 }
  0x16   :  { %214 = vmatpush3.bf16.msra.mxu0 %v230_v6 }
  0x17   :  { %215 = vmatprep.subr.bf16.mxu0 %v235_v0 }
  0x1a   :  { %216 = vmatpush3.bf16.msra.mxu0 %v231_v7 }
  0x1b   :  { %217 = vmatprep.subr.bf16.mxu0 %v235_v0 }
  0x1e   :  { %218 = vmatpush3.bf16.msra.mxu0 %v232_v8 }
  0x21   :  { %220 = vmatmul.mubr.bf16.vlgmr.msra.gmra.mxu0 %v26_v9 }
  0xe1   :  { %v132_v11 = vpop.f32.mrf.mxu0 }
  0xe2   :  { %v133_v13 = vadd.f32 %v183_v10, %v132_v11 }
  0xe3   :  { %v221_v14 = vpop.f32.mrf.mxu0 }
  0xe4   :  { %v139_v15 = vadd.f32 %v138_v12, %v133_v13 }
  0xe5   :  { %v135_v16 = vpop.f32.mrf.mxu0 }
  0xe6   :  { %v142_v17 = vsel %vm140_vm1, %v139_v15, 0.0  ;;  %141 = vst.msk [vmem:[%s326_s6] sm:$0xff] %vm140_vm1, %v139_v15 }
  0xe7   :  { %143 = vadd.xlane.f32.xlu0 %v142_v17  ;;  %v222_v18 = vpop.f32.mrf.mxu0 }
 0x170   :  { %v144_v19 = vpop.xlane.xlu0 %143 }
 0x171   :  { %v146_v20 = vmul.f32 0.03125, %v144_v19 }
 0x173   :  { %v147_v21 = vsub.f32 %v139_v15, %v146_v20 }
 0x175   :  { %v148_v22 = vmul.f32 %v147_v21, %v147_v21 }
 0x177   :  { %v149_v23 = vsel %vm140_vm1, %v148_v22, 0.0 }
 0x178   :  { %150 = vadd.xlane.f32.xlu0 %v149_v23 }
 0x201   :  { %v151_v24 = vpop.xlane.xlu0 %150 }
 0x202   :  { %v152_v25 = vmul.f32 0.03125, %v151_v24 }
 0x204   :  { %v153_v26 = vadd.f32 1e-05, %v152_v25 }
 0x206   :  { %233 = vrsqrt.f32 %v153_v26 }
 0x213   :  { %v234_v27 = vpop.eup %233 }
 0x214   :  { %v155_v29 = vmul.f32 %v234_v27, %v147_v21 }
 0x216   :  { %v163_v31 = vmul.f32 %v192_v28, %v155_v29 }
 0x218   :  { %v171_v32 = vadd.f32 %v193_v30, %v163_v31 }
 0x21a   :  { %v172_v33 = vpack.c.bf16 %v171_v32, %v171_v32 }
 0x21c   :  { %174 = vst.msk [vmem:[%s329_s7] sm:$0xf] %vm173_vm2, %v172_v33 }

// kernel: forecast.57
= control target key start
LH: loop header
LB: loop body
LE: loop exit
PB: predicated region body
PF: predicated region fallthrough
CT: control target
= control target key end

     0   :  { %v112_v0 = vmov 0.0   ;;  %vm113_vm0 = vmmov 0   ;;  %vm41_vm1 = vcmask 261120   ;;  %vm86_vm2 = vcmask 64512   ;;  %s155_s1 = inlined_call_operand.vmem [shape: bf16[32,8], index: 1, kind: input, shape index: {}]   ;;  %s156_s0 = inlined_call_operand.vmem [shape: f32[16,32], index: 0, kind: input, shape index: {}]   ;;  %s157_s2 = inlined_call_operand.vmem [shape: f32[1,8], index: 2, kind: input, shape index: {}]   ;;  %s158_s3 = inlined_call_operand.vmem [shape: f32[16,8], index: 3, kind: output, shape index: {}]  }
   0x1   :  { %100 = vmatprep.subr.bf16.mxu0 %v112_v0  ;;  %v110_v1 = vld [vmem:[%s155_s1 + $0x8] sm:$0xff]   ;;  %104 = vmatprep.mubr.msk.bf16.mxu0 %vm113_vm0, %v112_v0  ;;  %v111_v2 = vld [vmem:[%s155_s1] sm:$0xff]  }
   0x2   :  { %101 = vmatpush3.bf16.msra.mxu0 %v110_v1  ;;  %v15_v3 = vld [vmem:[%s156_s0] sm:$0xff]  ;;  %v16_v4 = vld [vmem:[%s156_s0 + $0x8] sm:$0xff] }
   0x3   :  { %102 = vmatprep.subr.bf16.mxu0 %v112_v0  ;;  %v17_v5 = vpack.c.bf16 %v16_v4, %v15_v3  ;;  %v93_v6 = vld [vmem:[%s157_s2] ss:$0 sm:$0xff] }
   0x6   :  { %103 = vmatpush3.bf16.msra.mxu0 %v111_v2 }
   0x9   :  { %105 = vmatmul.mubr.msk.bf16.vlgmr.msra.gmra.mxu0 %vm41_vm1, %v17_v5 }
  0xc9   :  { %v79_v7 = vpop.f32.mrf.mxu0 }
  0xca   :  { %v80_v8 = vadd.f32 %v93_v6, %v79_v7 }
  0xcb   :  { %v106_v9 = vpop.f32.mrf.mxu0 }
  0xcc   :  { %87 = vst.msk [vmem:[%s158_s3] sm:$0xff] %vm86_vm2, %v80_v8 }
  0xcd   :  { %v82_v10 = vpop.f32.mrf.mxu0 }
  0xce   :  { %v83_v11 = vadd.f32 %v93_v6, %v82_v10 }
  0xcf   :  { %v107_v12 = vpop.f32.mrf.mxu0 }
  0xd0   :  { %88 = vst.msk [vmem:[%s158_s3 + $0x8] sm:$0xff] %vm86_vm2, %v83_v11 }

// kernel: forecast.46
= control target key start
LH: loop header
LB: loop body
LE: loop exit
PB: predicated region body
PF: predicated region fallthrough
CT: control target
= control target key end

     0   :  { %v267_v1 = vmov 0.0   ;;  %vm268_vm0 = vmmov 0   ;;  %s359_s0 = inlined_call_operand.vmem [shape: bf16[8,128], index: 0, kind: input, shape index: {}]   ;;  %s360_s1 = inlined_call_operand.vmem [shape: bf16[128,32], index: 1, kind: input, shape index: {}]   ;;  %s361_s2 = inlined_call_operand.vmem [shape: f32[1,32], index: 2, kind: input, shape index: {}]   ;;  %s362_s3 = inlined_call_operand.vmem [shape: f32[8,32], index: 3, kind: input, shape index: {}]   ;;  %s363_s4 = inlined_call_operand.vmem [shape: f32[1,32], index: 4, kind: input, shape index: {}]   ;;  %s364_s5 = inlined_call_operand.vmem [shape: f32[1,32], index: 5, kind: input, shape index: {}]   ;;  %s365_s6 = inlined_call_operand.hbm [shape: f32[8,32], index: 6, kind: output, shape index: {0}]   ;;  %s366_s7 = inlined_call_operand.vmem [shape: f32[8,32], index: 7, kind: output, shape index: {1}]  }
   0x1   :  { %v235_v0 = vld [vmem:[%s360_s1 + $0x38] sm:$0xff]   ;;  %212 = vmatprep.subr.bf16.mxu0 %v267_v1  ;;  %v236_v2 = vld [vmem:[%s360_s1 + $0x30] sm:$0xff]   ;;  %228 = vmatprep.mubr.msk.bf16.mxu0 %vm268_vm0, %v267_v1  ;;  %v237_v3 = vld [vmem:[%s360_s1 + $0x28] sm:$0xff]  }
   0x2   :  { %213 = vmatpush3.bf16.msra.mxu0 %v235_v0 }
   0x3   :  { %214 = vmatprep.subr.bf16.mxu0 %v267_v1 }
   0x6   :  { %215 = vmatpush3.bf16.msra.mxu0 %v236_v2 }
   0x7   :  { %216 = vmatprep.subr.bf16.mxu0 %v267_v1 }
   0x8   :  { %13 = vsyncpa [#allocation3], 0  ;;  %v238_v4 = vld [vmem:[%s360_s1 + $0x20] sm:$0xff]   ;;  %v239_v5 = vld [vmem:[%s360_s1 + $0x18] sm:$0xff]   ;;  %vm141_vm1 = vcmask 261120  }
   0x9   :  { %v240_v6 = vld [vmem:[%s360_s1 + $0x10] sm:$0xff]   ;;  %v241_v7 = vld [vmem:[%s360_s1 + $0x8] sm:$0xff]   ;;  %v242_v8 = vld [vmem:[%s360_s1] sm:$0xff]  }
   0xa   :  { %217 = vmatpush3.bf16.msra.mxu0 %v237_v3  ;;  %v27_v9 = vld [vmem:[%s359_s0] sm:$0xf]  ;;  %s269_s0 = smov [#allocation2]  }
   0xb   :  { %218 = vmatprep.subr.bf16.mxu0 %v267_v1  ;;  %v192_v10 = vld [vmem:[%s361_s2] ss:$0 sm:$0xff]  ;;  %s180_s1 = sshll.u32 %s269_s0, 4  ;;  %s181_s1 = int_to_ptr.vmem [resolvable:$true] %s180_s1 }
   0xc   :  { %v139_v12 = vld [vmem:[%s362_s3] sm:$0xff]  ;;  %s245_s2 = scalar_lea.vmem %s181_s1, 128  ;;  %p250_p1 = scmp.lt.s32.totalorder %s181_s1, %s181_s1 }
   0xd   :  { %p246_p0 = scmp.ne.s32.totalorder %s181_s1, %s245_s2  ;;  %p251_p2 = scmp.lt.s32.totalorder %s245_s2, %s245_s2 }
   0xe   :  { %219 = vmatpush3.bf16.msra.mxu0 %v238_v4 }
   0xf   :  { %220 = vmatprep.subr.bf16.mxu0 %v267_v1  ;;  %p252_p3 = por %p251_p2, %p250_p1 }
  0x11   :  { %p253_p4 = pnand %p252_p3, %p246_p0 }
  0x12   :  { %221 = vmatpush3.bf16.msra.mxu0 %v239_v5 }
  0x13   :  { %222 = vmatprep.subr.bf16.mxu0 %v267_v1 }
  0x16   :  { %223 = vmatpush3.bf16.msra.mxu0 %v240_v6 }
  0x17   :  { %224 = vmatprep.subr.bf16.mxu0 %v267_v1 }
  0x1a   :  { %225 = vmatpush3.bf16.msra.mxu0 %v241_v7 }
  0x1b   :  { %226 = vmatprep.subr.bf16.mxu0 %v267_v1 }
  0x1e   :  { %227 = vmatpush3.bf16.msra.mxu0 %v242_v8 }
  0x21   :  { %229 = vmatmul.mubr.bf16.vlgmr.msra.gmra.mxu0 %v27_v9 }
  0xe1   :  { %v133_v11 = vpop.f32.mrf.mxu0 }
  0xe2   :  { %v134_v13 = vadd.f32 %v192_v10, %v133_v11 }
  0xe3   :  { %v230_v14 = vpop.f32.mrf.mxu0 }
  0xe4   :  { %v140_v15 = vadd.f32 %v139_v12, %v134_v13 }
  0xe5   :  { %v136_v16 = vpop.f32.mrf.mxu0 }
  0xe6   :  { %v143_v17 = vsel %vm141_vm1, %v140_v15, 0.0  ;;  %142 = vst.msk [vmem:[#allocation2] sm:$0xff] %vm141_vm1, %v140_v15 }
  0xe7   :  { %144 = vadd.xlane.f32.xlu0 %v143_v17  ;;  %v231_v18 = vpop.f32.mrf.mxu0 }
 0x170   :  { %v145_v19 = vpop.xlane.xlu0 %144 }
 0x171   :  { %v147_v20 = vmul.f32 0.03125, %v145_v19 }
 0x173   :  { %v148_v21 = vsub.f32 %v140_v15, %v147_v20 }
 0x175   :  { %v149_v22 = vmul.f32 %v148_v21, %v148_v21 }
 0x177   :  { %v150_v23 = vsel %vm141_vm1, %v149_v22, 0.0 }
 0x178   :  { %151 = vadd.xlane.f32.xlu0 %v150_v23 }
 0x179   :  { %256 = shalt.err (!%p253_p4)
}
 0x17a   :  { %183 = dma.vmem_to_hbm [thread:$0]  %s181_s1, 128, %s365_s6, [#allocation3]   ;;  %v201_v28 = vld [vmem:[%s363_s4] ss:$0 sm:$0xff] }
 0x17b   :  { %v202_v30 = vld [vmem:[%s364_s5] ss:$0 sm:$0xff] }
 0x201   :  { %v152_v24 = vpop.xlane.xlu0 %151 }
 0x202   :  { %v153_v25 = vmul.f32 0.03125, %v152_v24 }
 0x204   :  { %v154_v26 = vadd.f32 1e-05, %v153_v25 }
 0x206   :  { %243 = vrsqrt.f32 %v154_v26 }
 0x213   :  { %v244_v27 = vpop.eup %243 }
 0x214   :  { %v156_v29 = vmul.f32 %v244_v27, %v148_v21 }
 0x216   :  { %v164_v31 = vmul.f32 %v201_v28, %v156_v29 }
 0x218   :  { %v172_v32 = vadd.f32 %v202_v30, %v164_v31 }
 0x21a   :  { %173 = vst.msk [vmem:[%s366_s7] sm:$0xff] %vm141_vm1, %v172_v32 }
 0x21b   :  { %265 = dma.done.wait [#allocation3], 128  }
 0x21c   :  { %266 = vsyncadd [#allocation3], 4294967168 }
 0x21d   :  { %191 = vsyncpa [#allocation3], 1 }

// kernel: forecast.56
= control target key start
LH: loop header
LB: loop body
LE: loop exit
PB: predicated region body
PF: predicated region fallthrough
CT: control target
= control target key end

     0   :  { %s351_s9 = smov 0   ;;  %s371_s0 = inlined_call_operand.vmem [shape: f32[6,8,32], index: 0, kind: input, shape index: {}]   ;;  %s372_s1 = inlined_call_operand.vmem [shape: bf16[6,32,32], index: 1, kind: input, shape index: {}]   ;;  %s373_s2 = inlined_call_operand.vmem [shape: f32[6,8,32], index: 2, kind: output, shape index: {}]  }
   0x1 LB: > { %s288_s10 = sadd.s32 4294967295, %s332_s9   ;;  %p292_p0 = scmp.ge.s32.totalorder %s332_s9, 1  ;;  %s332_s9 = sphi %s351_s9, %s12_s9  }
   0x2   : > { %p121_p1 = scmp.lt.s32.totalorder %s332_s9, 7 }
   0x4   : > { %p122_p2 = pnand %p292_p0, %p121_p1 }
   0x5   : > { %p146_p3 = scmp.lt.s32.totalorder (!%p122_p2), %s288_s10, 5 }
   0x6   : > { %125 = sbr.rel (%p122_p2) target bundleno = 221 (0xdd), region = 28 }
   0xb   : > { %v334_v0 = vmov 0.0   ;;  %vm335_vm0 = vmmov 0   ;;  %s375_s10 = smov (!%p146_p3, %s288_s10), 5  ;;  %vm178_vm1 = vcmask 261120  }
   0xc   : > { %306 = vmatprep.subr.bf16.mxu0 %v334_v0  ;;  %310 = vmatprep.mubr.msk.bf16.mxu0 %vm335_vm0, %v334_v0  ;;  %s302_s11 = sshll.u32 %s375_s10, 4  ;;  %s293_s12 = sshll.u32 %s375_s10, 3 }
   0xd   : > { %s154_s15 = scalar_lea.vmem %s372_s1, %s302_s11  ;;  %s149_s18 = scalar_lea.vmem %s371_s0, %s293_s12 }
   0xe   : > { %v324_v1 = vld [vmem:[%s154_s15 + $0x8] sm:$0xff]   ;;  %v325_v2 = vld [vmem:[%s154_s15] sm:$0xff]   ;;  %s158_s21 = scalar_lea.vmem %s373_s2, %s293_s12 }
   0xf   : > { %307 = vmatpush3.bf16.msra.mxu0 %v324_v1  ;;  %v160_v3 = vld [vmem:[%s149_s18] sm:$0xff] }
  0x10   : > { %308 = vmatprep.subr.bf16.mxu0 %v334_v0  ;;  %v161_v4 = vpack.c.bf16 %v160_v3, %v160_v3 }
  0x13   : > { %309 = vmatpush3.bf16.msra.mxu0 %v325_v2 }
  0x16   : > { %311 = vmatmul.mubr.msk.bf16.vlgmr.msra.gmra.mxu0 %vm178_vm1, %v161_v4 }
  0xd6   : > { %v216_v5 = vpop.f32.mrf.mxu0 }
  0xd7   : > { %222 = vst.msk [vmem:[%s158_s21] sm:$0xff] %vm178_vm1, %v216_v5 }
  0xd8   : > { %v312_v6 = vpop.f32.mrf.mxu0 }
  0xda   : > { %v219_v7 = vpop.f32.mrf.mxu0 }
  0xdc   : > { %v313_v8 = vpop.f32.mrf.mxu0 }
  0xdd PF: > { %s12_s9 = sadd.s32 1, %s332_s9  }
  0xde   : > { %p9_p4 = scmp.ge.s32.totalorder %s12_s9, 8  }
  0xe0   :  { %11 = sbr.rel (!%p9_p4) target bundleno = 1 (0x1), region = 61 }

</bundles_post_ra>
